<compile_context>
chip_gen: v7x
topology: tpu7x:2x2x1
jax: 0.10.0
libtpu: 0.0.40
codegen_flags: <defaults>
</compile_context>

<pallas_src>
import numpy as np
import jax
import jax.numpy as jnp
from jax.experimental import pallas as pl
from jax.experimental.pallas import tpu as pltpu

BN_EPS = 1e-5


# ----------------------------------------------------------------------------
# host-side constant builders
# ----------------------------------------------------------------------------
def _bilinear_matrix(n_in: int, n_out: int) -> np.ndarray:
    """1-D interp matrix for nn.Upsample(scale_factor=2, mode='bilinear', align_corners=True)."""
    a = np.zeros((n_out, n_in), dtype=np.float32)
    if n_in == 1 or n_out == 1:
        a[:, 0] = 1.0
        return a
    scale = (n_in - 1) / (n_out - 1)
    for i in range(n_out):
        src = i * scale
        i0 = min(int(np.floor(src)), n_in - 1)
        i1 = min(i0 + 1, n_in - 1)
        w = src - i0
        a[i, i0] += 1.0 - w
        a[i, i1] += w
    return a


def _upsample_pad_rows(n_in: int, n_out: int) -> np.ndarray:
    """(n_out, n_in): 1-D bilinear 2x upsample (align_corners=True), placed at
    offset (n_out - 2*n_in)//2 of a zero canvas (F.pad folded into the matrix)."""
    n_up = 2 * n_in
    assert n_out >= n_up, "negative F.pad (crop) not supported"
    a = _bilinear_matrix(n_in, n_up)
    p0 = (n_out - n_up) // 2
    ap = np.zeros((n_out, n_in), dtype=np.float32)
    ap[p0:p0 + n_up, :] = a
    return ap


def _pack_conv_w(w_oihw):
    """OIHW 3x3 conv weight -> (9*Cin, Cout) im2col matrix, tap-major / channel-minor."""
    cout, cin, kh, kw = w_oihw.shape
    return jnp.transpose(w_oihw, (2, 3, 1, 0)).reshape(kh * kw * cin, cout)


# ----------------------------------------------------------------------------
# kernels
# ----------------------------------------------------------------------------
def up_conv1_kernel(x1_ref, x2_ref, ah_ref, aw_ref, w1_ref, h1_ref, st1_ref):
    # x1_ref: (1, H1, W1, C1)   x2_ref: (1, Ho, Wo, C2)   (NHWC, compact channels)
    # ah_ref: (Ho, H1) f32      aw_ref: (Wo, W1) f32      (upsample+pad matrices)
    # w1_ref: (9*(C2+C1), Cmid) im2col conv1 weight (matmul dtype)
    # h1_ref: (1, Ho, Wo, Cmid) pre-BN conv1 output (f32)
    # st1_ref: (1, 2, Cmid) partial BN1 [sum; sum-of-squares]
    _, sh1, sw1, c1 = x1_ref.shape
    _, ho, wo, c2 = x2_ref.shape
    so = ho * wo
    cc = c1 + c2
    mdt = w1_ref.dtype

    # --- separable bilinear 2x upsample + F.pad (pad folded into ah/aw), f32 ---
    x1n = x1_ref[0].astype(jnp.float32)                               # (H1, W1, C1)
    th = jnp.dot(ah_ref[...], x1n.reshape(sh1, sw1 * c1),
                 preferred_element_type=jnp.float32)                  # (Ho, W1*C1)
    th = th.reshape(ho, sw1, c1)
    awb = jnp.broadcast_to(aw_ref[...], (ho, wo, sw1))                # in-register broadcast
    up = jnp.einsum('hvw,hwc->hvc', awb, th,
                    preferred_element_type=jnp.float32)               # (Ho, Wo, C1)

    # --- concat([x2, up_x1]) + 3x3 conv1 as one compact-K im2col matmul ---
    xcat = jnp.concatenate([x2_ref[0].astype(jnp.float32), up], axis=-1)   # (Ho, Wo, cc)
    xp = jnp.pad(xcat, ((1, 1), (1, 1), (0, 0)))
    patches = jnp.concatenate(
        [xp[dh:dh + ho, dw:dw + wo, :].reshape(so, cc)
         for dh in range(3) for dw in range(3)], axis=-1)             # (So, 9*cc)
    h1n = jnp.dot(patches.astype(mdt), w1_ref[...],
                  preferred_element_type=jnp.float32)                 # (So, Cmid) f32

    h1_ref[0] = h1n.reshape(ho, wo, h1n.shape[-1])
    st1_ref[0] = jnp.concatenate(
        [jnp.sum(h1n, axis=0, keepdims=True),
         jnp.sum(h1n * h1n, axis=0, keepdims=True)], axis=0)          # (2, Cmid)


def bn_conv2_kernel(h1_ref, ss1_ref, w2_ref, h2_ref, st2_ref):
    # h1_ref: (1, Ho, Wo, Cmid) f32;  ss1_ref: (2, Cmid) [scale; shift] f32
    # w2_ref: (9*Cmid, Cout) im2col conv2 weight (matmul dtype)
    _, ho, wo, cmid = h1_ref.shape
    so = ho * wo
    mdt = w2_ref.dtype

    scale = ss1_ref[0:1, :].reshape(1, 1, cmid)
    shift = ss1_ref[1:2, :].reshape(1, 1, cmid)
    y1 = jnp.maximum(h1_ref[0] * scale + shift, 0.0)                  # BN1 + ReLU, f32

    yp = jnp.pad(y1, ((1, 1), (1, 1), (0, 0)))
    p2 = jnp.concatenate(
        [yp[dh:dh + ho, dw:dw + wo, :].reshape(so, cmid)
         for dh in range(3) for dw in range(3)], axis=-1)             # (So, 9*Cmid)
    h2n = jnp.dot(p2.astype(mdt), w2_ref[...],
                  preferred_element_type=jnp.float32)                 # (So, Cout) f32

    h2_ref[0] = h2n.reshape(ho, wo, h2n.shape[-1])
    st2_ref[0] = jnp.concatenate(
        [jnp.sum(h2n, axis=0, keepdims=True),
         jnp.sum(h2n * h2n, axis=0, keepdims=True)], axis=0)          # (2, Cout)


def bn_relu_kernel(h2_ref, ss2_ref, o_ref):
    # h2_ref: (1, Ho, Wo, Cout) f32;  ss2_ref: (2, Cout) [scale; shift] f32
    _, ho, wo, cout = h2_ref.shape
    scale = ss2_ref[0:1, :].reshape(1, 1, cout)
    shift = ss2_ref[1:2, :].reshape(1, 1, cout)
    o_ref[0] = jnp.maximum(h2_ref[0] * scale + shift, 0.0).astype(o_ref.dtype)


# ----------------------------------------------------------------------------
# parameters & wrapper
# ----------------------------------------------------------------------------
def init_params(key, in_ch: int, out_ch: int):
    """Deterministic init matching the shapes of Up.__init__ / DoubleConv."""
    k = jax.random.split(key, 4)
    w1 = 0.1 * jax.random.normal(k[0], (out_ch, in_ch, 3, 3), jnp.float32)   # Conv2d OIHW
    b1 = 0.01 * jax.random.normal(k[1], (out_ch,), jnp.float32)
    w2 = 0.1 * jax.random.normal(k[2], (out_ch, out_ch, 3, 3), jnp.float32)
    b2 = 0.01 * jax.random.normal(k[3], (out_ch,), jnp.float32)
    ones = jnp.ones((out_ch,), jnp.float32)
    zeros = jnp.zeros((out_ch,), jnp.float32)
    # b1/b2 are kept for shape parity with nn.Conv2d but cancel exactly under
    # training-mode BatchNorm (batch-mean subtraction), so the kernels skip them.
    return dict(w1=w1, b1=b1, g1=ones, be1=zeros,
                w2=w2, b2=b2, g2=ones, be2=zeros)


def up_forward(x1_nchw, x2_nchw, params, *, matmul_dtype=jnp.bfloat16):
    """x1, x2 in PyTorch NCHW; returns the NCHW output of Up.forward.
    matmul_dtype controls the conv-matmul operand dtype (f32 accumulation)."""
    n, c1, sh1, sw1 = x1_nchw.shape
    n2, c2, ho, wo = x2_nchw.shape
    assert n == n2
    cmid = params["w1"].shape[0]
    cout = params["w2"].shape[0]
    m_total = n * ho * wo
    par = pltpu.CompilerParams(dimension_semantics=("parallel",))

    # compact NHWC activations (channels keep their real width; no lane padding)
    x1p = jnp.transpose(x1_nchw, (0, 2, 3, 1)).astype(matmul_dtype)
    x2p = jnp.transpose(x2_nchw, (0, 2, 3, 1)).astype(matmul_dtype)

    # separable upsample + pad matrices (F.pad folded in); tiny -> kept in f32
    ah = jnp.asarray(_upsample_pad_rows(sh1, ho), dtype=jnp.float32)     # (Ho, H1)
    aw = jnp.asarray(_upsample_pad_rows(sw1, wo), dtype=jnp.float32)     # (Wo, W1)

    # compact im2col weights (tap-major / channel-minor; cat order = [x2, x1])
    w1m = _pack_conv_w(params["w1"]).astype(matmul_dtype)                # (9*(c2+c1), cmid)
    w2m = _pack_conv_w(params["w2"]).astype(matmul_dtype)                # (9*cmid, cout)

    # ---- pass 1: upsample + concat + conv1 + partial BN1 stats (parallel over batch)
    h1, st1 = pl.pallas_call(
        up_conv1_kernel,
        out_shape=(jax.ShapeDtypeStruct((n, ho, wo, cmid), jnp.float32),
                   jax.ShapeDtypeStruct((n, 2, cmid), jnp.float32)),
        grid=(n,),
        in_specs=[
            pl.BlockSpec((1, sh1, sw1, c1), lambda i: (i, 0, 0, 0)),
            pl.BlockSpec((1, ho, wo, c2), lambda i: (i, 0, 0, 0)),
            pl.BlockSpec((ho, sh1), lambda i: (0, 0)),
            pl.BlockSpec((wo, sw1), lambda i: (0, 0)),
            pl.BlockSpec((9 * (c1 + c2), cmid), lambda i: (0, 0)),
        ],
        out_specs=(pl.BlockSpec((1, ho, wo, cmid), lambda i: (i, 0, 0, 0)),
                   pl.BlockSpec((1, 2, cmid), lambda i: (i, 0, 0))),
        compiler_params=par,
    )(x1p, x2p, ah, aw, w1m)

    # tiny cross-block reduction + gamma/beta fold (training-mode BN, biased var)
    s1, q1 = jnp.sum(st1[:, 0, :], axis=0), jnp.sum(st1[:, 1, :], axis=0)
    mu1 = s1 / m_total
    var1 = jnp.maximum(q1 / m_total - mu1 * mu1, 0.0)
    scale1 = params["g1"] * jax.lax.rsqrt(var1 + BN_EPS)
    ss1 = jnp.stack([scale1, params["be1"] - mu1 * scale1], axis=0)      # (2, cmid) f32

    # ---- pass 2: BN1 + ReLU + conv2 + partial BN2 stats (parallel over batch)
    h2, st2 = pl.pallas_call(
        bn_conv2_kernel,
        out_shape=(jax.ShapeDtypeStruct((n, ho, wo, cout), jnp.float32),
                   jax.ShapeDtypeStruct((n, 2, cout), jnp.float32)),
        grid=(n,),
        in_specs=[
            pl.BlockSpec((1, ho, wo, cmid), lambda i: (i, 0, 0, 0)),
            pl.BlockSpec((2, cmid), lambda i: (0, 0)),
            pl.BlockSpec((9 * cmid, cout), lambda i: (0, 0)),
        ],
        out_specs=(pl.BlockSpec((1, ho, wo, cout), lambda i: (i, 0, 0, 0)),
                   pl.BlockSpec((1, 2, cout), lambda i: (i, 0, 0))),
        compiler_params=par,
    )(h1, ss1, w2m)

    s2, q2 = jnp.sum(st2[:, 0, :], axis=0), jnp.sum(st2[:, 1, :], axis=0)
    mu2 = s2 / m_total
    var2 = jnp.maximum(q2 / m_total - mu2 * mu2, 0.0)
    scale2 = params["g2"] * jax.lax.rsqrt(var2 + BN_EPS)
    ss2 = jnp.stack([scale2, params["be2"] - mu2 * scale2], axis=0)      # (2, cout) f32

    # ---- pass 3: BN2 + ReLU (parallel over batch)
    y = pl.pallas_call(
        bn_relu_kernel,
        out_shape=jax.ShapeDtypeStruct((n, ho, wo, cout), jnp.float32),
        grid=(n,),
        in_specs=[pl.BlockSpec((1, ho, wo, cout), lambda i: (i, 0, 0, 0)),
                  pl.BlockSpec((2, cout), lambda i: (0, 0))],
        out_specs=pl.BlockSpec((1, ho, wo, cout), lambda i: (i, 0, 0, 0)),
        compiler_params=par,
    )(h2, ss2)

    return jnp.transpose(y, (0, 3, 1, 2))                               # NHWC -> NCHW


if __name__ == "__main__":
    key = jax.random.PRNGKey(0)
    kx1, kx2, kp = jax.random.split(key, 3)

    # Up(in_channels=8, out_channels=4, bilinear=True):
    #   x1 (deep feature): (N, 4, 8, 8) -> upsampled to 16x16
    #   x2 (skip feature): (N, 4, 16, 16); concat -> 8 channels -> DoubleConv -> 4
    N, C_half, H1, W1 = 2, 4, 8, 8
    H2, W2 = 2 * H1, 2 * W1
    in_channels, out_channels = 2 * C_half, 4

    x1 = jax.random.normal(kx1, (N, C_half, H1, W1), jnp.float32)
    x2 = jax.random.normal(kx2, (N, C_half, H2, W2), jnp.float32)
    params = init_params(kp, in_channels, out_channels)

    y = jax.block_until_ready(jax.jit(up_forward)(x1, x2, params))
    assert y.shape == (N, out_channels, H2, W2), y.shape
    assert bool(jnp.all(jnp.isfinite(y)))
    print("KERNEL_OK")
</pallas_src>

<mosaic_0001>
module attributes {stable_mosaic.version = 11 : i64} {
  func.func @up_conv1_kernel(%arg0: i32, %arg1: memref<1x8x8x4xbf16, #tpu.memory_space<vmem>>, %arg2: memref<1x16x16x4xbf16, #tpu.memory_space<vmem>>, %arg3: memref<16x8xf32, #tpu.memory_space<vmem>>, %arg4: memref<16x8xf32, #tpu.memory_space<vmem>>, %arg5: memref<72x4xbf16, #tpu.memory_space<vmem>>, %arg6: memref<1x16x16x4xf32, #tpu.memory_space<vmem>>, %arg7: memref<1x2x4xf32, #tpu.memory_space<vmem>>) attributes {dimension_semantics = [#tpu.dimension_semantics<parallel>], iteration_bounds = array<i64: 2>, scalar_prefetch = 0 : i64, scratch_operands = 0 : i64, tpu.core_type = #tpu.core_type<tc>, window_params = [{transform_indices = @transform_0, window_bounds = array<i64: 1, 8, 8, 4>}, {transform_indices = @transform_1, window_bounds = array<i64: 1, 16, 16, 4>}, {pipeline_mode = #tpu.pipeline_mode<synchronous>, transform_indices = @transform_2, window_bounds = array<i64: 16, 8>}, {pipeline_mode = #tpu.pipeline_mode<synchronous>, transform_indices = @transform_3, window_bounds = array<i64: 16, 8>}, {pipeline_mode = #tpu.pipeline_mode<synchronous>, transform_indices = @transform_4, window_bounds = array<i64: 72, 4>}, {transform_indices = @transform_5, window_bounds = array<i64: 1, 16, 16, 4>}, {transform_indices = @transform_6, window_bounds = array<i64: 1, 2, 4>}]} {
    %c0 = arith.constant 0 : index
    %c0_0 = arith.constant 0 : index
    %c0_1 = arith.constant 0 : index
    %c0_2 = arith.constant 0 : index
    %0 = vector.load %arg1[%c0, %c0_0, %c0_1, %c0_2] : memref<1x8x8x4xbf16, #tpu.memory_space<vmem>>, vector<1x8x8x4xbf16>
    %1 = vector.shape_cast %0 : vector<1x8x8x4xbf16> to vector<8x8x4xbf16>
    %2 = arith.extf %1 : vector<8x8x4xbf16> to vector<8x8x4xf32>
    %c0_3 = arith.constant 0 : index
    %c0_4 = arith.constant 0 : index
    %3 = vector.load %arg3[%c0_3, %c0_4] : memref<16x8xf32, #tpu.memory_space<vmem>>, vector<16x8xf32>
    %4 = vector.shape_cast %2 : vector<8x8x4xf32> to vector<8x32xf32>
    %cst = arith.constant dense<0.000000e+00> : vector<16x32xf32>
    %5 = tpu.matmul %3, %4, %cst {dimension_numbers = #tpu.dot_dimension_numbers<[1], [0], [0], [1], [0, 0, 1, 1], [], []>} : vector<16x8xf32>, vector<8x32xf32>, vector<16x32xf32> -> vector<16x32xf32>
    %6 = vector.shape_cast %5 : vector<16x32xf32> to vector<16x8x4xf32>
    %c0_5 = arith.constant 0 : index
    %c0_6 = arith.constant 0 : index
    %7 = vector.load %arg4[%c0_5, %c0_6] : memref<16x8xf32, #tpu.memory_space<vmem>>, vector<16x8xf32>
    %8 = vector.shape_cast %7 : vector<16x8xf32> to vector<1x16x8xf32>
    %9 = vector.broadcast %8 : vector<1x16x8xf32> to vector<16x16x8xf32>
    "tpu.trace_start"() <{level = 10 : i32, message = "hvw,hwc->hvc"}> : () -> ()
    %cst_7 = arith.constant dense<0.000000e+00> : vector<16x16x4xf32>
    %10 = tpu.matmul %9, %6, %cst_7 {dimension_numbers = #tpu.dot_dimension_numbers<[2], [1], [1], [2], [0, 0, 0, 1, 1, 2], [0], [0]>} : vector<16x16x8xf32>, vector<16x8x4xf32>, vector<16x16x4xf32> -> vector<16x16x4xf32>
    "tpu.trace_stop"() : () -> ()
    %c0_8 = arith.constant 0 : index
    %c0_9 = arith.constant 0 : index
    %c0_10 = arith.constant 0 : index
    %c0_11 = arith.constant 0 : index
    %11 = vector.load %arg2[%c0_8, %c0_9, %c0_10, %c0_11] : memref<1x16x16x4xbf16, #tpu.memory_space<vmem>>, vector<1x16x16x4xbf16>
    %12 = vector.shape_cast %11 : vector<1x16x16x4xbf16> to vector<16x16x4xbf16>
    %13 = arith.extf %12 : vector<16x16x4xbf16> to vector<16x16x4xf32>
    %14 = tpu.concatenate %13, %10 in 2 : vector<16x16x4xf32>, vector<16x16x4xf32> -> vector<16x16x8xf32>
    %c0_i32 = arith.constant 0 : i32
    %15 = arith.sitofp %c0_i32 : i32 to f32
    %16 = vector.broadcast %15 : f32 to vector<1x16x8xf32>
    %17 = tpu.concatenate %16, %14 in 0 : vector<1x16x8xf32>, vector<16x16x8xf32> -> vector<17x16x8xf32>
    %18 = vector.broadcast %15 : f32 to vector<1x16x8xf32>
    %19 = tpu.concatenate %17, %18 in 0 : vector<17x16x8xf32>, vector<1x16x8xf32> -> vector<18x16x8xf32>
    %20 = vector.broadcast %15 : f32 to vector<18x1x8xf32>
    %21 = tpu.concatenate %20, %19 in 1 : vector<18x1x8xf32>, vector<18x16x8xf32> -> vector<18x17x8xf32>
    %22 = vector.broadcast %15 : f32 to vector<18x1x8xf32>
    %23 = tpu.concatenate %21, %22 in 1 : vector<18x17x8xf32>, vector<18x1x8xf32> -> vector<18x18x8xf32>
    %24 = vector.extract_strided_slice %23 {offsets = [0, 0, 0], sizes = [16, 16, 8], strides = [1, 1, 1]} : vector<18x18x8xf32> to vector<16x16x8xf32>
    %25 = vector.shape_cast %24 : vector<16x16x8xf32> to vector<256x8xf32>
    %26 = vector.extract_strided_slice %23 {offsets = [0, 1, 0], sizes = [16, 16, 8], strides = [1, 1, 1]} : vector<18x18x8xf32> to vector<16x16x8xf32>
    %27 = vector.shape_cast %26 : vector<16x16x8xf32> to vector<256x8xf32>
    %28 = vector.extract_strided_slice %23 {offsets = [0, 2, 0], sizes = [16, 16, 8], strides = [1, 1, 1]} : vector<18x18x8xf32> to vector<16x16x8xf32>
    %29 = vector.shape_cast %28 : vector<16x16x8xf32> to vector<256x8xf32>
    %30 = vector.extract_strided_slice %23 {offsets = [1, 0, 0], sizes = [16, 16, 8], strides = [1, 1, 1]} : vector<18x18x8xf32> to vector<16x16x8xf32>
    %31 = vector.shape_cast %30 : vector<16x16x8xf32> to vector<256x8xf32>
    %32 = vector.extract_strided_slice %23 {offsets = [1, 1, 0], sizes = [16, 16, 8], strides = [1, 1, 1]} : vector<18x18x8xf32> to vector<16x16x8xf32>
    %33 = vector.shape_cast %32 : vector<16x16x8xf32> to vector<256x8xf32>
    %34 = vector.extract_strided_slice %23 {offsets = [1, 2, 0], sizes = [16, 16, 8], strides = [1, 1, 1]} : vector<18x18x8xf32> to vector<16x16x8xf32>
    %35 = vector.shape_cast %34 : vector<16x16x8xf32> to vector<256x8xf32>
    %36 = vector.extract_strided_slice %23 {offsets = [2, 0, 0], sizes = [16, 16, 8], strides = [1, 1, 1]} : vector<18x18x8xf32> to vector<16x16x8xf32>
    %37 = vector.shape_cast %36 : vector<16x16x8xf32> to vector<256x8xf32>
    %38 = vector.extract_strided_slice %23 {offsets = [2, 1, 0], sizes = [16, 16, 8], strides = [1, 1, 1]} : vector<18x18x8xf32> to vector<16x16x8xf32>
    %39 = vector.shape_cast %38 : vector<16x16x8xf32> to vector<256x8xf32>
    %40 = vector.extract_strided_slice %23 {offsets = [2, 2, 0], sizes = [16, 16, 8], strides = [1, 1, 1]} : vector<18x18x8xf32> to vector<16x16x8xf32>
    %41 = vector.shape_cast %40 : vector<16x16x8xf32> to vector<256x8xf32>
    %42 = tpu.concatenate %25, %27, %29, %31, %33, %35, %37, %39, %41 in 1 : vector<256x8xf32>, vector<256x8xf32>, vector<256x8xf32>, vector<256x8xf32>, vector<256x8xf32>, vector<256x8xf32>, vector<256x8xf32>, vector<256x8xf32>, vector<256x8xf32> -> vector<256x72xf32>
    %43 = arith.truncf %42 : vector<256x72xf32> to vector<256x72xbf16>
    %c0_12 = arith.constant 0 : index
    %c0_13 = arith.constant 0 : index
    %44 = vector.load %arg5[%c0_12, %c0_13] : memref<72x4xbf16, #tpu.memory_space<vmem>>, vector<72x4xbf16>
    %cst_14 = arith.constant dense<0.000000e+00> : vector<256x4xf32>
    %45 = tpu.matmul %43, %44, %cst_14 {dimension_numbers = #tpu.dot_dimension_numbers<[1], [0], [0], [1], [0, 0, 1, 1], [], []>} : vector<256x72xbf16>, vector<72x4xbf16>, vector<256x4xf32> -> vector<256x4xf32>
    %46 = vector.shape_cast %45 : vector<256x4xf32> to vector<16x16x4xf32>
    %c0_15 = arith.constant 0 : index
    %c0_16 = arith.constant 0 : index
    %c0_17 = arith.constant 0 : index
    %c0_18 = arith.constant 0 : index
    %47 = vector.load %arg6[%c0_15, %c0_16, %c0_17, %c0_18] : memref<1x16x16x4xf32, #tpu.memory_space<vmem>>, vector<1x16x16x4xf32>
    %48 = vector.shape_cast %47 : vector<1x16x16x4xf32> to vector<16x16x4xf32>
    %49 = vector.shape_cast %46 : vector<16x16x4xf32> to vector<1x16x16x4xf32>
    tpu.vector_store %arg6[%c0_15, %c0_16, %c0_17, %c0_18], %49 {strides = array<i32>} : memref<1x16x16x4xf32, #tpu.memory_space<vmem>>, vector<1x16x16x4xf32>,
    %cst_19 = arith.constant dense<0.000000e+00> : vector<4xf32>
    %50 = vector.multi_reduction <add>, %45, %cst_19 [0] : vector<256x4xf32> to vector<4xf32>
    %51 = vector.shape_cast %50 : vector<4xf32> to vector<1x4xf32>
    %52 = arith.mulf %45, %45 : vector<256x4xf32>
    %cst_20 = arith.constant dense<0.000000e+00> : vector<4xf32>
    %53 = vector.multi_reduction <add>, %52, %cst_20 [0] : vector<256x4xf32> to vector<4xf32>
    %54 = vector.shape_cast %53 : vector<4xf32> to vector<1x4xf32>
    %55 = tpu.concatenate %51, %54 in 0 : vector<1x4xf32>, vector<1x4xf32> -> vector<2x4xf32>
    %c0_21 = arith.constant 0 : index
    %c0_22 = arith.constant 0 : index
    %c0_23 = arith.constant 0 : index
    %56 = vector.load %arg7[%c0_21, %c0_22, %c0_23] : memref<1x2x4xf32, #tpu.memory_space<vmem>>, vector<1x2x4xf32>
    %57 = vector.shape_cast %56 : vector<1x2x4xf32> to vector<2x4xf32>
    %58 = vector.shape_cast %55 : vector<2x4xf32> to vector<1x2x4xf32>
    tpu.vector_store %arg7[%c0_21, %c0_22, %c0_23], %58 {strides = array<i32>} : memref<1x2x4xf32, #tpu.memory_space<vmem>>, vector<1x2x4xf32>,
    return
  }
  func.func @transform_0(%arg0: i32) -> (i32, i32, i32, i32) {
    %c0_i32 = arith.constant 0 : i32
    %c0_i32_0 = arith.constant 0 : i32
    %c0_i32_1 = arith.constant 0 : i32
    %c0_i32_2 = arith.constant 0 : i32
    return %arg0, %c0_i32, %c0_i32_0, %c0_i32_1 : i32, i32, i32, i32
  }
  func.func @transform_1(%arg0: i32) -> (i32, i32, i32, i32) {
    %c0_i32 = arith.constant 0 : i32
    %c0_i32_0 = arith.constant 0 : i32
    %c0_i32_1 = arith.constant 0 : i32
    %c0_i32_2 = arith.constant 0 : i32
    return %arg0, %c0_i32, %c0_i32_0, %c0_i32_1 : i32, i32, i32, i32
  }
  func.func @transform_2(%arg0: i32) -> (i32, i32) {
    %c0_i32 = arith.constant 0 : i32
    %c0_i32_0 = arith.constant 0 : i32
    %c0_i32_1 = arith.constant 0 : i32
    return %c0_i32, %c0_i32_0 : i32, i32
  }
  func.func @transform_3(%arg0: i32) -> (i32, i32) {
    %c0_i32 = arith.constant 0 : i32
    %c0_i32_0 = arith.constant 0 : i32
    %c0_i32_1 = arith.constant 0 : i32
    return %c0_i32, %c0_i32_0 : i32, i32
  }
  func.func @transform_4(%arg0: i32) -> (i32, i32) {
    %c0_i32 = arith.constant 0 : i32
    %c0_i32_0 = arith.constant 0 : i32
    %c0_i32_1 = arith.constant 0 : i32
    return %c0_i32, %c0_i32_0 : i32, i32
  }
  func.func @transform_5(%arg0: i32) -> (i32, i32, i32, i32) {
    %c0_i32 = arith.constant 0 : i32
    %c0_i32_0 = arith.constant 0 : i32
    %c0_i32_1 = arith.constant 0 : i32
    %c0_i32_2 = arith.constant 0 : i32
    return %arg0, %c0_i32, %c0_i32_0, %c0_i32_1 : i32, i32, i32, i32
  }
  func.func @transform_6(%arg0: i32) -> (i32, i32, i32) {
    %c0_i32 = arith.constant 0 : i32
    %c0_i32_0 = arith.constant 0 : i32
    %c0_i32_1 = arith.constant 0 : i32
    return %arg0, %c0_i32, %c0_i32_0 : i32, i32, i32
  }
}

module attributes {stable_mosaic.version = 11 : i64} {
  func.func @bn_relu_kernel(%arg0: i32, %arg1: memref<1x16x16x4xf32, #tpu.memory_space<vmem>>, %arg2: memref<2x4xf32, #tpu.memory_space<vmem>>, %arg3: memref<1x16x16x4xf32, #tpu.memory_space<vmem>>) attributes {dimension_semantics = [#tpu.dimension_semantics<parallel>], iteration_bounds = array<i64: 2>, scalar_prefetch = 0 : i64, scratch_operands = 0 : i64, tpu.core_type = #tpu.core_type<tc>, window_params = [{transform_indices = @transform_0, window_bounds = array<i64: 1, 16, 16, 4>}, {pipeline_mode = #tpu.pipeline_mode<synchronous>, transform_indices = @transform_1, window_bounds = array<i64: 2, 4>}, {transform_indices = @transform_2, window_bounds = array<i64: 1, 16, 16, 4>}]} {
    %c0 = arith.constant 0 : index
    %c0_0 = arith.constant 0 : index
    %0 = vector.load %arg2[%c0, %c0_0] : memref<2x4xf32, #tpu.memory_space<vmem>>, vector<1x4xf32>
    %1 = vector.shape_cast %0 : vector<1x4xf32> to vector<1x1x4xf32>
    %c1 = arith.constant 1 : index
    %c0_1 = arith.constant 0 : index
    %2 = vector.load %arg2[%c1, %c0_1] : memref<2x4xf32, #tpu.memory_space<vmem>>, vector<1x4xf32>
    %3 = vector.shape_cast %2 : vector<1x4xf32> to vector<1x1x4xf32>
    %c0_2 = arith.constant 0 : index
    %c0_3 = arith.constant 0 : index
    %c0_4 = arith.constant 0 : index
    %c0_5 = arith.constant 0 : index
    %4 = vector.load %arg1[%c0_2, %c0_3, %c0_4, %c0_5] : memref<1x16x16x4xf32, #tpu.memory_space<vmem>>, vector<1x16x16x4xf32>
    %5 = vector.shape_cast %4 : vector<1x16x16x4xf32> to vector<16x16x4xf32>
    %6 = vector.broadcast %1 : vector<1x1x4xf32> to vector<16x16x4xf32>
    %7 = arith.mulf %5, %6 : vector<16x16x4xf32>
    %8 = vector.broadcast %3 : vector<1x1x4xf32> to vector<16x16x4xf32>
    %9 = arith.addf %7, %8 : vector<16x16x4xf32>
    %cst = arith.constant 0.000000e+00 : f32
    %10 = vector.broadcast %cst : f32 to vector<16x16x4xf32>
    %11 = arith.maximumf %9, %10 : vector<16x16x4xf32>
    %c0_6 = arith.constant 0 : index
    %c0_7 = arith.constant 0 : index
    %c0_8 = arith.constant 0 : index
    %c0_9 = arith.constant 0 : index
    %12 = vector.load %arg3[%c0_6, %c0_7, %c0_8, %c0_9] : memref<1x16x16x4xf32, #tpu.memory_space<vmem>>, vector<1x16x16x4xf32>
    %13 = vector.shape_cast %12 : vector<1x16x16x4xf32> to vector<16x16x4xf32>
    %14 = vector.shape_cast %11 : vector<16x16x4xf32> to vector<1x16x16x4xf32>
    tpu.vector_store %arg3[%c0_6, %c0_7, %c0_8, %c0_9], %14 {strides = array<i32>} : memref<1x16x16x4xf32, #tpu.memory_space<vmem>>, vector<1x16x16x4xf32>,
    return
  }
  func.func @transform_0(%arg0: i32) -> (i32, i32, i32, i32) {
    %c0_i32 = arith.constant 0 : i32
    %c0_i32_0 = arith.constant 0 : i32
    %c0_i32_1 = arith.constant 0 : i32
    %c0_i32_2 = arith.constant 0 : i32
    return %arg0, %c0_i32, %c0_i32_0, %c0_i32_1 : i32, i32, i32, i32
  }
  func.func @transform_1(%arg0: i32) -> (i32, i32) {
    %c0_i32 = arith.constant 0 : i32
    %c0_i32_0 = arith.constant 0 : i32
    %c0_i32_1 = arith.constant 0 : i32
    return %c0_i32, %c0_i32_0 : i32, i32
  }
  func.func @transform_2(%arg0: i32) -> (i32, i32, i32, i32) {
    %c0_i32 = arith.constant 0 : i32
    %c0_i32_0 = arith.constant 0 : i32
    %c0_i32_1 = arith.constant 0 : i32
    %c0_i32_2 = arith.constant 0 : i32
    return %arg0, %c0_i32, %c0_i32_0, %c0_i32_1 : i32, i32, i32, i32
  }
}

module attributes {stable_mosaic.version = 11 : i64} {
  func.func @bn_conv2_kernel(%arg0: i32, %arg1: memref<1x16x16x4xf32, #tpu.memory_space<vmem>>, %arg2: memref<2x4xf32, #tpu.memory_space<vmem>>, %arg3: memref<36x4xbf16, #tpu.memory_space<vmem>>, %arg4: memref<1x16x16x4xf32, #tpu.memory_space<vmem>>, %arg5: memref<1x2x4xf32, #tpu.memory_space<vmem>>) attributes {dimension_semantics = [#tpu.dimension_semantics<parallel>], iteration_bounds = array<i64: 2>, scalar_prefetch = 0 : i64, scratch_operands = 0 : i64, tpu.core_type = #tpu.core_type<tc>, window_params = [{transform_indices = @transform_0, window_bounds = array<i64: 1, 16, 16, 4>}, {pipeline_mode = #tpu.pipeline_mode<synchronous>, transform_indices = @transform_1, window_bounds = array<i64: 2, 4>}, {pipeline_mode = #tpu.pipeline_mode<synchronous>, transform_indices = @transform_2, window_bounds = array<i64: 36, 4>}, {transform_indices = @transform_3, window_bounds = array<i64: 1, 16, 16, 4>}, {transform_indices = @transform_4, window_bounds = array<i64: 1, 2, 4>}]} {
    %c0 = arith.constant 0 : index
    %c0_0 = arith.constant 0 : index
    %0 = vector.load %arg2[%c0, %c0_0] : memref<2x4xf32, #tpu.memory_space<vmem>>, vector<1x4xf32>
    %1 = vector.shape_cast %0 : vector<1x4xf32> to vector<1x1x4xf32>
    %c1 = arith.constant 1 : index
    %c0_1 = arith.constant 0 : index
    %2 = vector.load %arg2[%c1, %c0_1] : memref<2x4xf32, #tpu.memory_space<vmem>>, vector<1x4xf32>
    %3 = vector.shape_cast %2 : vector<1x4xf32> to vector<1x1x4xf32>
    %c0_2 = arith.constant 0 : index
    %c0_3 = arith.constant 0 : index
    %c0_4 = arith.constant 0 : index
    %c0_5 = arith.constant 0 : index
    %4 = vector.load %arg1[%c0_2, %c0_3, %c0_4, %c0_5] : memref<1x16x16x4xf32, #tpu.memory_space<vmem>>, vector<1x16x16x4xf32>
    %5 = vector.shape_cast %4 : vector<1x16x16x4xf32> to vector<16x16x4xf32>
    %6 = vector.broadcast %1 : vector<1x1x4xf32> to vector<16x16x4xf32>
    %7 = arith.mulf %5, %6 : vector<16x16x4xf32>
    %8 = vector.broadcast %3 : vector<1x1x4xf32> to vector<16x16x4xf32>
    %9 = arith.addf %7, %8 : vector<16x16x4xf32>
    %cst = arith.constant 0.000000e+00 : f32
    %10 = vector.broadcast %cst : f32 to vector<16x16x4xf32>
    %11 = arith.maximumf %9, %10 : vector<16x16x4xf32>
    %c0_i32 = arith.constant 0 : i32
    %12 = arith.sitofp %c0_i32 : i32 to f32
    %13 = vector.broadcast %12 : f32 to vector<1x16x4xf32>
    %14 = tpu.concatenate %13, %11 in 0 : vector<1x16x4xf32>, vector<16x16x4xf32> -> vector<17x16x4xf32>
    %15 = vector.broadcast %12 : f32 to vector<1x16x4xf32>
    %16 = tpu.concatenate %14, %15 in 0 : vector<17x16x4xf32>, vector<1x16x4xf32> -> vector<18x16x4xf32>
    %17 = vector.broadcast %12 : f32 to vector<18x1x4xf32>
    %18 = tpu.concatenate %17, %16 in 1 : vector<18x1x4xf32>, vector<18x16x4xf32> -> vector<18x17x4xf32>
    %19 = vector.broadcast %12 : f32 to vector<18x1x4xf32>
    %20 = tpu.concatenate %18, %19 in 1 : vector<18x17x4xf32>, vector<18x1x4xf32> -> vector<18x18x4xf32>
    %21 = vector.extract_strided_slice %20 {offsets = [0, 0, 0], sizes = [16, 16, 4], strides = [1, 1, 1]} : vector<18x18x4xf32> to vector<16x16x4xf32>
    %22 = vector.shape_cast %21 : vector<16x16x4xf32> to vector<256x4xf32>
    %23 = vector.extract_strided_slice %20 {offsets = [0, 1, 0], sizes = [16, 16, 4], strides = [1, 1, 1]} : vector<18x18x4xf32> to vector<16x16x4xf32>
    %24 = vector.shape_cast %23 : vector<16x16x4xf32> to vector<256x4xf32>
    %25 = vector.extract_strided_slice %20 {offsets = [0, 2, 0], sizes = [16, 16, 4], strides = [1, 1, 1]} : vector<18x18x4xf32> to vector<16x16x4xf32>
    %26 = vector.shape_cast %25 : vector<16x16x4xf32> to vector<256x4xf32>
    %27 = vector.extract_strided_slice %20 {offsets = [1, 0, 0], sizes = [16, 16, 4], strides = [1, 1, 1]} : vector<18x18x4xf32> to vector<16x16x4xf32>
    %28 = vector.shape_cast %27 : vector<16x16x4xf32> to vector<256x4xf32>
    %29 = vector.extract_strided_slice %20 {offsets = [1, 1, 0], sizes = [16, 16, 4], strides = [1, 1, 1]} : vector<18x18x4xf32> to vector<16x16x4xf32>
    %30 = vector.shape_cast %29 : vector<16x16x4xf32> to vector<256x4xf32>
    %31 = vector.extract_strided_slice %20 {offsets = [1, 2, 0], sizes = [16, 16, 4], strides = [1, 1, 1]} : vector<18x18x4xf32> to vector<16x16x4xf32>
    %32 = vector.shape_cast %31 : vector<16x16x4xf32> to vector<256x4xf32>
    %33 = vector.extract_strided_slice %20 {offsets = [2, 0, 0], sizes = [16, 16, 4], strides = [1, 1, 1]} : vector<18x18x4xf32> to vector<16x16x4xf32>
    %34 = vector.shape_cast %33 : vector<16x16x4xf32> to vector<256x4xf32>
    %35 = vector.extract_strided_slice %20 {offsets = [2, 1, 0], sizes = [16, 16, 4], strides = [1, 1, 1]} : vector<18x18x4xf32> to vector<16x16x4xf32>
    %36 = vector.shape_cast %35 : vector<16x16x4xf32> to vector<256x4xf32>
    %37 = vector.extract_strided_slice %20 {offsets = [2, 2, 0], sizes = [16, 16, 4], strides = [1, 1, 1]} : vector<18x18x4xf32> to vector<16x16x4xf32>
    %38 = vector.shape_cast %37 : vector<16x16x4xf32> to vector<256x4xf32>
    %39 = tpu.concatenate %22, %24, %26, %28, %30, %32, %34, %36, %38 in 1 : vector<256x4xf32>, vector<256x4xf32>, vector<256x4xf32>, vector<256x4xf32>, vector<256x4xf32>, vector<256x4xf32>, vector<256x4xf32>, vector<256x4xf32>, vector<256x4xf32> -> vector<256x36xf32>
    %40 = arith.truncf %39 : vector<256x36xf32> to vector<256x36xbf16>
    %c0_6 = arith.constant 0 : index
    %c0_7 = arith.constant 0 : index
    %41 = vector.load %arg3[%c0_6, %c0_7] : memref<36x4xbf16, #tpu.memory_space<vmem>>, vector<36x4xbf16>
    %cst_8 = arith.constant dense<0.000000e+00> : vector<256x4xf32>
    %42 = tpu.matmul %40, %41, %cst_8 {dimension_numbers = #tpu.dot_dimension_numbers<[1], [0], [0], [1], [0, 0, 1, 1], [], []>} : vector<256x36xbf16>, vector<36x4xbf16>, vector<256x4xf32> -> vector<256x4xf32>
    %43 = vector.shape_cast %42 : vector<256x4xf32> to vector<16x16x4xf32>
    %c0_9 = arith.constant 0 : index
    %c0_10 = arith.constant 0 : index
    %c0_11 = arith.constant 0 : index
    %c0_12 = arith.constant 0 : index
    %44 = vector.load %arg4[%c0_9, %c0_10, %c0_11, %c0_12] : memref<1x16x16x4xf32, #tpu.memory_space<vmem>>, vector<1x16x16x4xf32>
    %45 = vector.shape_cast %44 : vector<1x16x16x4xf32> to vector<16x16x4xf32>
    %46 = vector.shape_cast %43 : vector<16x16x4xf32> to vector<1x16x16x4xf32>
    tpu.vector_store %arg4[%c0_9, %c0_10, %c0_11, %c0_12], %46 {strides = array<i32>} : memref<1x16x16x4xf32, #tpu.memory_space<vmem>>, vector<1x16x16x4xf32>,
    %cst_13 = arith.constant dense<0.000000e+00> : vector<4xf32>
    %47 = vector.multi_reduction <add>, %42, %cst_13 [0] : vector<256x4xf32> to vector<4xf32>
    %48 = vector.shape_cast %47 : vector<4xf32> to vector<1x4xf32>
    %49 = arith.mulf %42, %42 : vector<256x4xf32>
    %cst_14 = arith.constant dense<0.000000e+00> : vector<4xf32>
    %50 = vector.multi_reduction <add>, %49, %cst_14 [0] : vector<256x4xf32> to vector<4xf32>
    %51 = vector.shape_cast %50 : vector<4xf32> to vector<1x4xf32>
    %52 = tpu.concatenate %48, %51 in 0 : vector<1x4xf32>, vector<1x4xf32> -> vector<2x4xf32>
    %c0_15 = arith.constant 0 : index
    %c0_16 = arith.constant 0 : index
    %c0_17 = arith.constant 0 : index
    %53 = vector.load %arg5[%c0_15, %c0_16, %c0_17] : memref<1x2x4xf32, #tpu.memory_space<vmem>>, vector<1x2x4xf32>
    %54 = vector.shape_cast %53 : vector<1x2x4xf32> to vector<2x4xf32>
    %55 = vector.shape_cast %52 : vector<2x4xf32> to vector<1x2x4xf32>
    tpu.vector_store %arg5[%c0_15, %c0_16, %c0_17], %55 {strides = array<i32>} : memref<1x2x4xf32, #tpu.memory_space<vmem>>, vector<1x2x4xf32>,
    return
  }
  func.func @transform_0(%arg0: i32) -> (i32, i32, i32, i32) {
    %c0_i32 = arith.constant 0 : i32
    %c0_i32_0 = arith.constant 0 : i32
    %c0_i32_1 = arith.constant 0 : i32
    %c0_i32_2 = arith.constant 0 : i32
    return %arg0, %c0_i32, %c0_i32_0, %c0_i32_1 : i32, i32, i32, i32
  }
  func.func @transform_1(%arg0: i32) -> (i32, i32) {
    %c0_i32 = arith.constant 0 : i32
    %c0_i32_0 = arith.constant 0 : i32
    %c0_i32_1 = arith.constant 0 : i32
    return %c0_i32, %c0_i32_0 : i32, i32
  }
  func.func @transform_2(%arg0: i32) -> (i32, i32) {
    %c0_i32 = arith.constant 0 : i32
    %c0_i32_0 = arith.constant 0 : i32
    %c0_i32_1 = arith.constant 0 : i32
    return %c0_i32, %c0_i32_0 : i32, i32
  }
  func.func @transform_3(%arg0: i32) -> (i32, i32, i32, i32) {
    %c0_i32 = arith.constant 0 : i32
    %c0_i32_0 = arith.constant 0 : i32
    %c0_i32_1 = arith.constant 0 : i32
    %c0_i32_2 = arith.constant 0 : i32
    return %arg0, %c0_i32, %c0_i32_0, %c0_i32_1 : i32, i32, i32, i32
  }
  func.func @transform_4(%arg0: i32) -> (i32, i32, i32) {
    %c0_i32 = arith.constant 0 : i32
    %c0_i32_0 = arith.constant 0 : i32
    %c0_i32_1 = arith.constant 0 : i32
    return %arg0, %c0_i32, %c0_i32_0 : i32, i32, i32
  }
}

</mosaic_0001>

<bundles_post_ra>
// kernel: up_forward.5
= control target key start
LH: loop header
LB: loop body
LE: loop exit
PB: predicated region body
PF: predicated region fallthrough
CT: control target
= control target key end

     0   :  { %s416_s9 = smov 0   ;;  %s607_s0 = inlined_call_operand.vmem [shape: f32[2,16,16,4], index: 0, kind: input, shape index: {}]   ;;  %s608_s1 = inlined_call_operand.vmem [shape: f32[2,4], index: 1, kind: input, shape index: {}]   ;;  %s609_s2 = inlined_call_operand.vmem [shape: f32[2,16,16,4], index: 2, kind: output, shape index: {}]  }
   0x1 LB: > { %s370_s10 = sadd.s32 4294967295, %s399_s9   ;;  %p374_p0 = scmp.ge.s32.totalorder %s399_s9, 1  ;;  %s399_s9 = sphi %s416_s9, %s12_s9  }
   0x2   : > { %p112_p1 = scmp.lt.s32.totalorder %s399_s9, 3 }
   0x4   : > { %p113_p2 = pnand %p374_p0, %p112_p1 }
   0x5   : > { %p134_p3 = scmp.lt.s32.totalorder (!%p113_p2), %s370_s10, 1  ;;  %v427_v0 = vld [vmem:[%s608_s1] ss:$0 sm:$0xff] (!%p113_p2)  ;;  %v437_v1 = vld [vmem:[%s608_s1 + $0x1] ss:$0 sm:$0xff] (!%p113_p2)  ;;  %vm282_vm0 = vcmask (!%p113_p2), 31744  }
   0x6   : > { %116 = sbr.rel (%p113_p2) target bundleno = 46 (0x2e), region = 28 }
   0xd   : > { %s611_s10 = smov (!%p134_p3, %s370_s10), 1 }
   0xe   : > { %s383_s11 = sshll.u32 %s611_s10, 8 }
   0xf   : > { %s432_s16 = scalar_lea.vmem %s607_s0, %s383_s11  ;;  %s460_s21 = scalar_lea.vmem %s609_s2, %s383_s11 }
  0x10   : > { %v146_v2 = vld [vmem:[%s432_s16] sm:$0xff]  ;;  %v147_v3 = vld [vmem:[%s432_s16 + $0x8] sm:$0xff]  ;;  %v148_v4 = vld [vmem:[%s432_s16 + $0x10] sm:$0xff] }
  0x11   : > { %v182_v5 = vmul.f32 %v427_v0, %v146_v2  ;;  %v183_v6 = vmul.f32 %v427_v0, %v147_v3  ;;  %v184_v7 = vmul.f32 %v427_v0, %v148_v4  ;;  %v149_v8 = vld [vmem:[%s432_s16 + $0x18] sm:$0xff]  ;;  %v150_v9 = vld [vmem:[%s432_s16 + $0x20] sm:$0xff]  ;;  %v151_v10 = vld [vmem:[%s432_s16 + $0x28] sm:$0xff] }
  0x12   : > { %v185_v11 = vmul.f32 %v427_v0, %v149_v8  ;;  %v186_v12 = vmul.f32 %v427_v0, %v150_v9  ;;  %v187_v13 = vmul.f32 %v427_v0, %v151_v10  ;;  %v152_v14 = vld [vmem:[%s432_s16 + $0x30] sm:$0xff]  ;;  %v153_v15 = vld [vmem:[%s432_s16 + $0x38] sm:$0xff]  ;;  %v154_v24 = vld [vmem:[%s432_s16 + $0x40] sm:$0xff] }
  0x13   : > { %v218_v16 = vadd.f32 %v437_v1, %v182_v5  ;;  %v219_v17 = vadd.f32 %v437_v1, %v183_v6  ;;  %v220_v18 = vadd.f32 %v437_v1, %v184_v7  ;;  %v188_v19 = vmul.f32 %v427_v0, %v152_v14  ;;  %v155_v25 = vld [vmem:[%s432_s16 + $0x48] sm:$0xff]  ;;  %v156_v26 = vld [vmem:[%s432_s16 + $0x50] sm:$0xff]  ;;  %v157_v31 = vld [vmem:[%s432_s16 + $0x58] sm:$0xff] }
  0x14   : > { %v221_v20 = vadd.f32 %v437_v1, %v185_v11  ;;  %v222_v21 = vadd.f32 %v437_v1, %v186_v12  ;;  %v223_v22 = vadd.f32 %v437_v1, %v187_v13  ;;  %v189_v23 = vmul.f32 %v427_v0, %v153_v15  ;;  %v158_v32 = vld [vmem:[%s432_s16 + $0x60] sm:$0xff]  ;;  %v159_v33 = vld [vmem:[%s432_s16 + $0x68] sm:$0xff]  ;;  %v160_v38 = vld [vmem:[%s432_s16 + $0x70] sm:$0xff] }
  0x15   : > { %v250_v27 = vmax.f32 %v218_v16, 0.0  ;;  %v251_v28 = vmax.f32 %v219_v17, 0.0  ;;  %v252_v29 = vmax.f32 %v220_v18, 0.0  ;;  %v224_v30 = vadd.f32 %v437_v1, %v188_v19  ;;  %v161_v43 = vld [vmem:[%s432_s16 + $0x78] sm:$0xff]  ;;  %v162_v56 = vld [vmem:[%s432_s16 + $0x80] sm:$0xff]  ;;  %v163_v57 = vld [vmem:[%s432_s16 + $0x88] sm:$0xff] }
  0x16   : > { %v253_v34 = vmax.f32 %v221_v20, 0.0  ;;  %v254_v35 = vmax.f32 %v222_v21, 0.0  ;;  %v255_v36 = vmax.f32 %v223_v22, 0.0  ;;  %v225_v37 = vadd.f32 %v437_v1, %v189_v23  ;;  %v164_v58 = vld [vmem:[%s432_s16 + $0x90] sm:$0xff]  ;;  %v165_v63 = vld [vmem:[%s432_s16 + $0x98] sm:$0xff]  ;;  %v166_v2 = vld [vmem:[%s432_s16 + $0xa0] sm:$0xff] }
  0x17   : > { %283 = vst.msk [vmem:[%s460_s21] sm:$0xff] %vm282_vm0, %v250_v27  ;;  %284 = vst.msk [vmem:[%s460_s21 + $0x8] sm:$0xff] %vm282_vm0, %v251_v28  ;;  %v256_v39 = vmax.f32 %v224_v30, 0.0  ;;  %v190_v40 = vmul.f32 %v427_v0, %v154_v24  ;;  %v191_v41 = vmul.f32 %v427_v0, %v155_v25  ;;  %v192_v42 = vmul.f32 %v427_v0, %v156_v26  ;;  %v167_v3 = vld [vmem:[%s432_s16 + $0xa8] sm:$0xff]  ;;  %v168_v8 = vld [vmem:[%s432_s16 + $0xb0] sm:$0xff] }
  0x18   : > { %285 = vst.msk [vmem:[%s460_s21 + $0x10] sm:$0xff] %vm282_vm0, %v252_v29  ;;  %286 = vst.msk [vmem:[%s460_s21 + $0x18] sm:$0xff] %vm282_vm0, %v253_v34  ;;  %v257_v44 = vmax.f32 %v225_v37, 0.0  ;;  %v193_v45 = vmul.f32 %v427_v0, %v157_v31  ;;  %v194_v46 = vmul.f32 %v427_v0, %v158_v32  ;;  %v195_v47 = vmul.f32 %v427_v0, %v159_v33  ;;  %v169_v13 = vld [vmem:[%s432_s16 + $0xb8] sm:$0xff]  ;;  %v170_v26 = vld [vmem:[%s432_s16 + $0xc0] sm:$0xff] }
  0x19   : > { %287 = vst.msk [vmem:[%s460_s21 + $0x20] sm:$0xff] %vm282_vm0, %v254_v35  ;;  %288 = vst.msk [vmem:[%s460_s21 + $0x28] sm:$0xff] %vm282_vm0, %v255_v36  ;;  %v226_v48 = vadd.f32 %v437_v1, %v190_v40  ;;  %v227_v49 = vadd.f32 %v437_v1, %v191_v41  ;;  %v228_v50 = vadd.f32 %v437_v1, %v192_v42  ;;  %v171_v27 = vld [vmem:[%s432_s16 + $0xc8] sm:$0xff]  ;;  %v172_v28 = vld [vmem:[%s432_s16 + $0xd0] sm:$0xff] }
  0x1a   : > { %289 = vst.msk [vmem:[%s460_s21 + $0x30] sm:$0xff] %vm282_vm0, %v256_v39  ;;  %v196_v51 = vmul.f32 %v427_v0, %v160_v38  ;;  %290 = vst.msk [vmem:[%s460_s21 + $0x38] sm:$0xff] %vm282_vm0, %v257_v44  ;;  %v229_v52 = vadd.f32 %v437_v1, %v193_v45  ;;  %v230_v53 = vadd.f32 %v437_v1, %v194_v46  ;;  %v173_v33 = vld [vmem:[%s432_s16 + $0xd8] sm:$0xff]  ;;  %v174_v34 = vld [vmem:[%s432_s16 + $0xe0] sm:$0xff] }
  0x1b   : > { %v231_v54 = vadd.f32 %v437_v1, %v195_v47  ;;  %v197_v55 = vmul.f32 %v427_v0, %v161_v43  ;;  %v258_v59 = vmax.f32 %v226_v48, 0.0  ;;  %v259_v60 = vmax.f32 %v227_v49, 0.0  ;;  %v175_v35 = vld [vmem:[%s432_s16 + $0xe8] sm:$0xff]  ;;  %v176_v40 = vld [vmem:[%s432_s16 + $0xf0] sm:$0xff]  ;;  %v177_v45 = vld [vmem:[%s432_s16 + $0xf8] sm:$0xff] }
  0x1c   : > { %v260_v61 = vmax.f32 %v228_v50, 0.0  ;;  %v232_v62 = vadd.f32 %v437_v1, %v196_v51  ;;  %v261_v4 = vmax.f32 %v229_v52, 0.0  ;;  %v262_v5 = vmax.f32 %v230_v53, 0.0 }
  0x1d   : > { %v263_v6 = vmax.f32 %v231_v54, 0.0  ;;  %v233_v7 = vadd.f32 %v437_v1, %v197_v55  ;;  %291 = vst.msk [vmem:[%s460_s21 + $0x40] sm:$0xff] %vm282_vm0, %v258_v59  ;;  %292 = vst.msk [vmem:[%s460_s21 + $0x48] sm:$0xff] %vm282_vm0, %v259_v60  ;;  %v198_v10 = vmul.f32 %v427_v0, %v162_v56  ;;  %v199_v11 = vmul.f32 %v427_v0, %v163_v57 }
  0x1e   : > { %293 = vst.msk [vmem:[%s460_s21 + $0x50] sm:$0xff] %vm282_vm0, %v260_v61  ;;  %v264_v9 = vmax.f32 %v232_v62, 0.0  ;;  %v200_v12 = vmul.f32 %v427_v0, %v164_v58  ;;  %294 = vst.msk [vmem:[%s460_s21 + $0x58] sm:$0xff] %vm282_vm0, %v261_v4  ;;  %v201_v15 = vmul.f32 %v427_v0, %v165_v63  ;;  %v202_v16 = vmul.f32 %v427_v0, %v166_v2 }
  0x1f   : > { %295 = vst.msk [vmem:[%s460_s21 + $0x60] sm:$0xff] %vm282_vm0, %v262_v5  ;;  %296 = vst.msk [vmem:[%s460_s21 + $0x68] sm:$0xff] %vm282_vm0, %v263_v6  ;;  %v265_v14 = vmax.f32 %v233_v7, 0.0  ;;  %v203_v17 = vmul.f32 %v427_v0, %v167_v3  ;;  %v234_v18 = vadd.f32 %v437_v1, %v198_v10  ;;  %v235_v19 = vadd.f32 %v437_v1, %v199_v11 }
  0x20   : > { %297 = vst.msk [vmem:[%s460_s21 + $0x70] sm:$0xff] %vm282_vm0, %v264_v9  ;;  %v236_v20 = vadd.f32 %v437_v1, %v200_v12  ;;  %v204_v21 = vmul.f32 %v427_v0, %v168_v8  ;;  %v237_v22 = vadd.f32 %v437_v1, %v201_v15  ;;  %v238_v23 = vadd.f32 %v437_v1, %v202_v16 }
  0x21   : > { %298 = vst.msk [vmem:[%s460_s21 + $0x78] sm:$0xff] %vm282_vm0, %v265_v14  ;;  %v239_v24 = vadd.f32 %v437_v1, %v203_v17  ;;  %v205_v25 = vmul.f32 %v427_v0, %v169_v13  ;;  %v266_v29 = vmax.f32 %v234_v18, 0.0  ;;  %v267_v30 = vmax.f32 %v235_v19, 0.0 }
  0x22   : > { %v268_v31 = vmax.f32 %v236_v20, 0.0  ;;  %v240_v32 = vadd.f32 %v437_v1, %v204_v21  ;;  %v269_v36 = vmax.f32 %v237_v22, 0.0  ;;  %v270_v37 = vmax.f32 %v238_v23, 0.0 }
  0x23   : > { %v271_v38 = vmax.f32 %v239_v24, 0.0  ;;  %v241_v39 = vadd.f32 %v437_v1, %v205_v25  ;;  %299 = vst.msk [vmem:[%s460_s21 + $0x80] sm:$0xff] %vm282_vm0, %v266_v29  ;;  %300 = vst.msk [vmem:[%s460_s21 + $0x88] sm:$0xff] %vm282_vm0, %v267_v30  ;;  %v206_v42 = vmul.f32 %v427_v0, %v170_v26  ;;  %v207_v43 = vmul.f32 %v427_v0, %v171_v27 }
  0x24   : > { %301 = vst.msk [vmem:[%s460_s21 + $0x90] sm:$0xff] %vm282_vm0, %v268_v31  ;;  %v272_v41 = vmax.f32 %v240_v32, 0.0  ;;  %v208_v44 = vmul.f32 %v427_v0, %v172_v28  ;;  %302 = vst.msk [vmem:[%s460_s21 + $0x98] sm:$0xff] %vm282_vm0, %v269_v36  ;;  %v209_v47 = vmul.f32 %v427_v0, %v173_v33  ;;  %v210_v48 = vmul.f32 %v427_v0, %v174_v34 }
  0x25   : > { %303 = vst.msk [vmem:[%s460_s21 + $0xa0] sm:$0xff] %vm282_vm0, %v270_v37  ;;  %304 = vst.msk [vmem:[%s460_s21 + $0xa8] sm:$0xff] %vm282_vm0, %v271_v38  ;;  %v273_v46 = vmax.f32 %v241_v39, 0.0  ;;  %v211_v49 = vmul.f32 %v427_v0, %v175_v35  ;;  %v242_v50 = vadd.f32 %v437_v1, %v206_v42  ;;  %v243_v51 = vadd.f32 %v437_v1, %v207_v43 }
  0x26   : > { %305 = vst.msk [vmem:[%s460_s21 + $0xb0] sm:$0xff] %vm282_vm0, %v272_v41  ;;  %v244_v52 = vadd.f32 %v437_v1, %v208_v44  ;;  %v212_v53 = vmul.f32 %v427_v0, %v176_v40  ;;  %v245_v54 = vadd.f32 %v437_v1, %v209_v47  ;;  %v246_v55 = vadd.f32 %v437_v1, %v210_v48 }
  0x27   : > { %306 = vst.msk [vmem:[%s460_s21 + $0xb8] sm:$0xff] %vm282_vm0, %v273_v46  ;;  %v247_v56 = vadd.f32 %v437_v1, %v211_v49  ;;  %v213_v57 = vmul.f32 %v427_v0, %v177_v45  ;;  %v274_v58 = vmax.f32 %v242_v50, 0.0  ;;  %v275_v59 = vmax.f32 %v243_v51, 0.0 }
  0x28   : > { %v276_v60 = vmax.f32 %v244_v52, 0.0  ;;  %v248_v61 = vadd.f32 %v437_v1, %v212_v53  ;;  %v277_v62 = vmax.f32 %v245_v54, 0.0  ;;  %v278_v63 = vmax.f32 %v246_v55, 0.0 }
  0x29   : > { %v279_v2 = vmax.f32 %v247_v56, 0.0  ;;  %v249_v3 = vadd.f32 %v437_v1, %v213_v57  ;;  %307 = vst.msk [vmem:[%s460_s21 + $0xc0] sm:$0xff] %vm282_vm0, %v274_v58  ;;  %308 = vst.msk [vmem:[%s460_s21 + $0xc8] sm:$0xff] %vm282_vm0, %v275_v59 }
  0x2a   : > { %309 = vst.msk [vmem:[%s460_s21 + $0xd0] sm:$0xff] %vm282_vm0, %v276_v60  ;;  %v280_v4 = vmax.f32 %v248_v61, 0.0  ;;  %310 = vst.msk [vmem:[%s460_s21 + $0xd8] sm:$0xff] %vm282_vm0, %v277_v62 }
  0x2b   : > { %311 = vst.msk [vmem:[%s460_s21 + $0xe0] sm:$0xff] %vm282_vm0, %v278_v63  ;;  %312 = vst.msk [vmem:[%s460_s21 + $0xe8] sm:$0xff] %vm282_vm0, %v279_v2  ;;  %v281_v0 = vmax.f32 %v249_v3, 0.0 }
  0x2c   : > { %313 = vst.msk [vmem:[%s460_s21 + $0xf0] sm:$0xff] %vm282_vm0, %v280_v4 }
  0x2d   : > { %314 = vst.msk [vmem:[%s460_s21 + $0xf8] sm:$0xff] %vm282_vm0, %v281_v0 }
  0x2e PF: > { %s12_s9 = sadd.s32 1, %s399_s9  }
  0x2f   : > { %p9_p4 = scmp.ge.s32.totalorder %s12_s9, 4  }
  0x31   :  { %11 = sbr.rel (!%p9_p4) target bundleno = 1 (0x1), region = 58 }

// kernel: up_forward.3
= control target key start
LH: loop header
LB: loop body
LE: loop exit
PB: predicated region body
PF: predicated region fallthrough
CT: control target
= control target key end

     0   :  { %s5481_s21 = smov 0   ;;  %s7146_s0 = inlined_call_operand.vmem [shape: bf16[2,8,8,4], index: 0, kind: input, shape index: {}]   ;;  %s7147_s1 = inlined_call_operand.vmem [shape: bf16[2,16,16,4], index: 1, kind: input, shape index: {}]   ;;  %s7148_s2 = inlined_call_operand.vmem [shape: f32[16,8], index: 2, kind: input, shape index: {}, may-alias: {2,3}]   ;;  %s7149_s3 = inlined_call_operand.vmem [shape: f32[16,8], index: 3, kind: input, shape index: {}, may-alias: {2,3}]   ;;  %s7150_s4 = inlined_call_operand.vmem [shape: bf16[72,4], index: 4, kind: input, shape index: {}]   ;;  %s7151_s5 = inlined_call_operand.vmem [shape: f32[2,16,16,4], index: 5, kind: output, shape index: {0}]   ;;  %s7152_s6 = inlined_call_operand.vmem [shape: f32[2,2,4], index: 6, kind: output, shape index: {1}]  }
   0x1 LB: > { %s4280_s22 = sadd.s32 4294967295, %s5422_s21   ;;  %p4284_p0 = scmp.ge.s32.totalorder %s5422_s21, 1  ;;  %s5422_s21 = sphi %s5481_s21, %s17_s21  }
   0x2   : > { %p225_p1 = scmp.lt.s32.totalorder %s5422_s21, 3 }
   0x4   : > { %p226_p2 = pnand %p4284_p0, %p225_p1 }
   0x6   : > { %229 = sbr.rel (%p226_p2) target bundleno = 1458 (0x5b2), region = 40 }
   0xd   : > { %p264_p3 = scmp.lt.s32.totalorder %s4280_s22, 1  ;;  %v307_v0 = vlaneseq  ;;  %v5424_v1 = vmov 1983009808   ;;  %v5425_v3 = vmov 1934713408   ;;  %s5426_s27 = smov 4  }
   0xe   : > { %v305_v2 = vunpack.c.l.s4 %v5424_v1  ;;  %v369_v4 = vunpack.c.l.s4 %v5425_v3  ;;  %s5427_s28 = smov 12   ;;  %vm468_vm0 = vcmask 64512   ;;  %v300_v59 = vld [vmem:[%s7148_s2] sm:$0xff]  ;;  %s5428_s7 = smov 8   ;;  %vm466_vm1 = vcmask 31744  }
   0xf   : > { %s7227_s22 = smov (!%p264_p3, %s4280_s22), 1  ;;  %v308_v5 = vshrl.u32 %v307_v0, 7  ;;  %4524 = vmatprep.mubr.msk.f32.mxu0 %vm468_vm0, %v300_v59  ;;  %s5429_s8 = smov 16   ;;  %vm470_vm2 = vcmask 97280   ;;  %vm472_vm3 = vcmask 130048   ;;  %vm474_vm4 = vcmask 162816  }
  0x10   : > { %v306_v6 = vunpack.c.0.s8 %v305_v2  ;;  %v370_v7 = vunpack.c.0.s8 %v369_v4  ;;  %s4349_s23 = sshll.u32 %s7227_s22, 5  ;;  %s5430_s9 = smov 20   ;;  %vm476_vm5 = vcmask 195584   ;;  %vm478_vm6 = vcmask 228352  }
  0x11   : > { %s268_s26 = scalar_lea.vmem %s7146_s0, %s4349_s23  ;;  %s5431_s10 = smov 24   ;;  %vm2342_vm7 = vcmask 1040384   ;;  %vm2508_vm8 = vcmask 1046528   ;;  %vm2589_vm9 = vcmask 1045504   ;;  %vm3812_vm10 = vcmask 1043456  }
  0x12   : > { %v4353_v8 = vld [vmem:[%s268_s26] sm:$0xff]   ;;  %v4432_v9 = vld [vmem:[%s268_s26 + $0x8] sm:$0xff]   ;;  %v4433_v10 = vld [vmem:[%s268_s26 + $0x10] sm:$0xff]   ;;  %v5495_v11 = vsub.s32 %v306_v6, %v308_v5  ;;  %v5497_v12 = vsub.s32 %v370_v7, %v308_v5  ;;  %s5432_s11 = smov 28   ;;  %s5433_s14 = smov 120   ;;  %vm3546_vm11 = vcmask 261120  }
  0x13   : > { %v4354_v13 = vunpack.c.l.bf16 %v4353_v8  ;;  %v4355_v14 = vunpack.c.h.bf16 %v4353_v8  ;;  %v4358_v15 = vunpack.c.l.bf16 %v4432_v9  ;;  %v4359_v16 = vunpack.c.h.bf16 %v4432_v9  ;;  %v4434_v17 = vld [vmem:[%s268_s26 + $0x18] sm:$0xff]   ;;  %s5434_s15 = smov 124   ;;  %s5435_s16 = smov 112  }
  0x14   : > { %v4362_v18 = vunpack.c.l.bf16 %v4433_v10  ;;  %v4363_v19 = vunpack.c.h.bf16 %v4433_v10  ;;  %v4366_v20 = vunpack.c.l.bf16 %v4434_v17  ;;  %v4367_v21 = vunpack.c.h.bf16 %v4434_v17  ;;  %s5436_s17 = smov 116   ;;  %s5437_s18 = smov 104  }
  0x15   : > { %v302_v22 = vcombine.low %v4354_v13, %v4358_v15  ;;  %v318_v23 = vcombine.low %v4355_v14, %v4359_v16  ;;  %v303_v24 = vcombine.high %v4354_v13, %v4358_v15  ;;  %v319_v25 = vcombine.high %v4355_v14, %v4359_v16  ;;  %v301_v15 = vld [vmem:[%s7148_s2 + $0x8] sm:$0xff]  ;;  %s5438_s19 = smov 108   ;;  %s5439_s24 = smov 100  }
  0x16   : > { %v334_v26 = vcombine.low %v4362_v18, %v4366_v20  ;;  %v350_v27 = vcombine.low %v4363_v19, %v4367_v21  ;;  %v335_v28 = vcombine.high %v4362_v18, %v4366_v20  ;;  %v351_v29 = vcombine.high %v4363_v19, %v4367_v21  ;;  %v5544_v18 = vld [vmem:[%s7149_s3] sm:$0xff]  ;;  %s5442_s29 = smov 56   ;;  %s4350_s30 = sshll.u32 %s7227_s22, 7 }
  0x17   : > { %v310_v30 = vrot.slane %v302_v22, %v5495_v11  ;;  %v326_v31 = vrot.slane %v318_v23, %v5495_v11  ;;  %v317_v32 = vrot.slane %v303_v24, %v5495_v11  ;;  %v333_v33 = vrot.slane %v319_v25, %v5495_v11  ;;  %4539 = vmatprep.mubr.msk.f32.mxu1 %vm468_vm0, %v5544_v18  ;;  %s5714_s12 = scalar_lea.vmem %s7147_s1, %s4350_s30  ;;  %s5444_s13 = smov 32  }
  0x18   : > { %v342_v34 = vrot.slane %v334_v26, %v5495_v11  ;;  %v358_v35 = vrot.slane %v350_v27, %v5495_v11  ;;  %v349_v36 = vrot.slane %v335_v28, %v5495_v11  ;;  %v365_v37 = vrot.slane %v351_v29, %v5495_v11 }
  0x19   : > { %v366_v38 = vcombine.low %v310_v30, %v326_v31  ;;  %v367_v39 = vcombine.high %v310_v30, %v326_v31  ;;  %v382_v40 = vcombine.low %v317_v32, %v333_v33  ;;  %v383_v46 = vcombine.high %v317_v32, %v333_v33 }
  0x1a   : > { %v398_v41 = vcombine.low %v342_v34, %v358_v35  ;;  %v399_v42 = vcombine.high %v342_v34, %v358_v35  ;;  %v414_v43 = vcombine.low %v349_v36, %v365_v37  ;;  %v415_v47 = vcombine.high %v349_v36, %v365_v37 }
  0x1b   : > { %v374_v44 = vrot.slane %v366_v38, %v5497_v12  ;;  %v381_v45 = vrot.slane %v367_v39, %v5497_v12  ;;  %v390_v50 = vrot.slane %v382_v40, %v5497_v12  ;;  %v397_v55 = vrot.slane %v383_v46, %v5497_v12 }
  0x1c   : > { %v406_v48 = vrot.slane %v398_v41, %v5497_v12  ;;  %v413_v49 = vrot.slane %v399_v42, %v5497_v12  ;;  %v422_v51 = vrot.slane %v414_v43, %v5497_v12  ;;  %v429_v58 = vrot.slane %v415_v47, %v5497_v12 }
  0x1d   : > { %v5440_v19 = vmov 0.0   ;;  %vm3579_vm12 = vcmask 326656   ;;  %vm3612_vm13 = vcmask 392192   ;;  %vm3645_vm14 = vcmask 457728  }
  0x1e   : > { %v431_v52 = vcombine.high %v374_v44, %v406_v48  ;;  %v430_v53 = vcombine.low %v374_v44, %v406_v48  ;;  %v433_v54 = vcombine.high %v381_v45, %v413_v49  ;;  %v432_v56 = vcombine.low %v381_v45, %v413_v49 }
  0x1f   : > { %v434_v57 = vcombine.low %v390_v50, %v422_v51  ;;  %v435_v60 = vcombine.high %v390_v50, %v422_v51  ;;  %v436_v61 = vcombine.low %v397_v55, %v429_v58  ;;  %v437_v62 = vcombine.high %v397_v55, %v429_v58 }
  0x20   : > { %439 = vrot.lane.b32.xlu0 %v431_v52, %s5426_s27  ;;  %447 = vrot.lane.b32.xlu1 %v433_v54, %s5427_s28  ;;  %v5558_v20 = vrot.slane %v5440_v19, 7  ;;  %s5441_s28 = smov 48   ;;  %vm3678_vm15 = vcmask 523264  }
  0x22   : > { %v5562_v21 = vsel %vm2342_vm7, 0.0, %v5558_v20  ;;  %v2459_v22 = vsel %vm2342_vm7, %v5558_v20, 0.0  ;;  %v2510_v23 = vrot.slane %v5558_v20, 1  ;;  %v2591_v24 = vrot.slane %v5558_v20, 2 }
  0x23   : > { %v2509_v25 = vrot.slane %v5562_v21, 1  ;;  %v2512_v26 = vrot.slane %v2459_v22, 1  ;;  %v2590_v27 = vrot.slane %v5562_v21, 2  ;;  %v2593_v28 = vrot.slane %v2459_v22, 2 }
  0x24   : > { %443 = vrot.lane.b32.xlu0 %v432_v56, %s5428_s7  ;;  %451 = vrot.lane.b32.xlu1 %v434_v57, %s5429_s8 }
  0x25   : > { %v2511_v29 = vsel %vm2508_vm8, %v2509_v25, %v2510_v23  ;;  %v2513_v30 = vsel %vm2508_vm8, %v2510_v23, %v2512_v26  ;;  %v2592_v31 = vsel %vm2589_vm9, %v2590_v27, %v2591_v24  ;;  %v2594_v32 = vsel %vm2589_vm9, %v2591_v24, %v2593_v28  ;;  %v5606_v24 = vld [vmem:[%s7149_s3 + $0x8] sm:$0xff] }
  0x26   : > { %v5574_v33 = vpack.i.bf16 %v2513_v30, %v2511_v29  ;;  %v5576_v34 = vpack.i.bf16 %v2594_v32, %v2592_v31 }
  0x28   : > { %455 = vrot.lane.b32.xlu0 %v435_v60, %s5430_s9  ;;  %459 = vrot.lane.b32.xlu1 %v436_v61, %s5431_s10  ;;  %7174 = vst [vmem:[#allocation2_spill] sm:$0xff] %v5576_v34 }
  0x2c   : > { %463 = vrot.lane.b32.xlu0 %v437_v62, %s5432_s11 }
  0x92   : > { %v440_v63 = vpop.permute.xlu0 %439  ;;  %v448_v0 = vpop.permute.xlu1 %447 }
  0x93   : > { %v467_v1 = vsel %vm466_vm1, %v430_v53, %v440_v63 }
  0x96   : > { %v444_v2 = vpop.permute.xlu0 %443  ;;  %v452_v3 = vpop.permute.xlu1 %451 }
  0x97   : > { %v469_v4 = vsel %vm468_vm0, %v467_v1, %v444_v2 }
  0x98   : > { %v471_v5 = vsel %vm470_vm2, %v469_v4, %v448_v0  ;;  %vm3763_vm2 = vcmask 588800  }
  0x99   : > { %v473_v6 = vsel %vm472_vm3, %v471_v5, %v452_v3 }
  0x9a   : > { %v456_v7 = vpop.permute.xlu0 %455  ;;  %v460_v9 = vpop.permute.xlu1 %459 }
  0x9b   : > { %v475_v8 = vsel %vm474_vm4, %v473_v6, %v456_v7 }
  0x9c   : > { %v477_v10 = vsel %vm476_vm5, %v475_v8, %v460_v9 }
  0x9e   : > { %v464_v13 = vpop.permute.xlu0 %463 }
  0x9f   : > { %v479_v14 = vsel %vm478_vm6, %v477_v10, %v464_v13 }
  0xa0   : > { %4522 = vmatprep.subr.mxu0 %v479_v14 }
  0xa1   : > { %4523 = vmatpush3.msra.mxu0 %v479_v14 }
  0xa2   : > { %4525 = vmatmul.mubr.msk.f32.vlgmr.msra.gmra.mrb[0].mxu0 %vm468_vm0, %v301_v15 }
  0xa3   : > { %4529 = vmatprep.mubr.msk.f32.mxu0 %vm468_vm0, %v5544_v18 }
 0x175   : > { %v5531_v16 = vpop.f32.mrb[0].mxu0 }
 0x176   : > { %v5533_v17 = vpop.f32.mrb[1].mxu0 }
 0x177   : > { %569 = vrot.lane.b32.xlu0 %v5533_v17, %s5433_s14  ;;  %563 = vrot.lane.b32.xlu1 %v5533_v17, %s5434_s15 }
 0x17b   : > { %581 = vrot.lane.b32.xlu0 %v5533_v17, %s5435_s16  ;;  %575 = vrot.lane.b32.xlu1 %v5533_v17, %s5436_s17 }
 0x17f   : > { %593 = vrot.lane.b32.xlu0 %v5533_v17, %s5437_s18  ;;  %587 = vrot.lane.b32.xlu1 %v5533_v17, %s5438_s19 }
 0x183   : > { %565 = vrot.lane.b32.xlu0 %v5531_v16, %s5434_s15  ;;  %599 = vrot.lane.b32.xlu1 %v5533_v17, %s5439_s24 }
 0x187   : > { %577 = vrot.lane.b32.xlu0 %v5531_v16, %s5436_s17  ;;  %571 = vrot.lane.b32.xlu1 %v5531_v16, %s5433_s14  ;;  %s5445_s14 = smov 40  }
 0x18b   : > { %589 = vrot.lane.b32.xlu0 %v5531_v16, %s5438_s19  ;;  %583 = vrot.lane.b32.xlu1 %v5531_v16, %s5435_s16 }
 0x18f   : > { %601 = vrot.lane.b32.xlu0 %v5531_v16, %s5439_s24  ;;  %595 = vrot.lane.b32.xlu1 %v5531_v16, %s5437_s18 }
 0x193   : > { %4692 = vrot.lane.b32.xlu1 %v5574_v33, %s5428_s7 }
 0x197   : > { %4697 = vrot.lane.b32.xlu1 %v5576_v34, %s5429_s8 }
 0x1e9   : > { %v570_v35 = vpop.permute.xlu0 %569  ;;  %v564_v36 = vpop.permute.xlu1 %563 }
 0x1ea   : > { %v605_v42 = vcombine.low %v5533_v17, %v570_v35  ;;  %v606_v52 = vcombine.high %v5533_v17, %v570_v35 }
 0x1ec   : > { %v613_v49 = vrot.slane %v605_v42, %v5495_v11  ;;  %v620_v63 = vrot.slane %v606_v52, %v5495_v11 }
 0x1ed   : > { %v582_v37 = vpop.permute.xlu0 %581  ;;  %v576_v38 = vpop.permute.xlu1 %575 }
 0x1ee   : > { %v621_v39 = vcombine.low %v564_v36, %v576_v38  ;;  %v622_v45 = vcombine.high %v564_v36, %v576_v38 }
 0x1f0   : > { %v629_v43 = vrot.slane %v621_v39, %v5495_v11  ;;  %v636_v57 = vrot.slane %v622_v45, %v5495_v11 }
 0x1f1   : > { %v594_v40 = vpop.permute.xlu0 %593  ;;  %v588_v41 = vpop.permute.xlu1 %587 }
 0x1f2   : > { %v637_v44 = vcombine.low %v582_v37, %v594_v40  ;;  %v638_v46 = vcombine.high %v582_v37, %v594_v40  ;;  %v669_v53 = vcombine.low %v613_v49, %v629_v43  ;;  %v670_v62 = vcombine.high %v613_v49, %v629_v43 }
 0x1f3   : > { %v685_v6 = vcombine.low %v620_v63, %v636_v57  ;;  %v686_v15 = vcombine.high %v620_v63, %v636_v57 }
 0x1f4   : > { %v645_v54 = vrot.slane %v637_v44, %v5495_v11  ;;  %v652_v58 = vrot.slane %v638_v46, %v5495_v11  ;;  %v677_v4 = vrot.slane %v669_v53, %v5497_v12  ;;  %v684_v14 = vrot.slane %v670_v62, %v5497_v12 }
 0x1f5   : > { %v5584_v47 = vpop.permute.xlu0 %565  ;;  %v600_v48 = vpop.permute.xlu1 %599  ;;  %v693_v28 = vrot.slane %v685_v6, %v5497_v12  ;;  %v700_v38 = vrot.slane %v686_v15, %v5497_v12 }
 0x1f6   : > { %v653_v50 = vcombine.low %v588_v41, %v600_v48  ;;  %v654_v51 = vcombine.high %v588_v41, %v600_v48 }
 0x1f8   : > { %v661_v55 = vrot.slane %v653_v50, %v5495_v11  ;;  %v668_v56 = vrot.slane %v654_v51, %v5495_v11 }
 0x1f9   : > { %v578_v59 = vpop.permute.xlu0 %577  ;;  %v572_v60 = vpop.permute.xlu1 %571 }
 0x1fa   : > { %v701_v61 = vcombine.low %v645_v54, %v661_v55  ;;  %v717_v0 = vcombine.low %v652_v58, %v668_v56  ;;  %v702_v1 = vcombine.high %v645_v54, %v661_v55  ;;  %v757_v2 = vcombine.low %v5584_v47, %v578_v59 }
 0x1fb   : > { %v741_v3 = vcombine.low %v5531_v16, %v572_v60  ;;  %v718_v7 = vcombine.high %v652_v58, %v668_v56  ;;  %v758_v36 = vcombine.high %v5584_v47, %v578_v59  ;;  %v742_v39 = vcombine.high %v5531_v16, %v572_v60 }
 0x1fc   : > { %v709_v5 = vrot.slane %v701_v61, %v5497_v12  ;;  %v716_v10 = vrot.slane %v702_v1, %v5497_v12  ;;  %v725_v17 = vrot.slane %v717_v0, %v5497_v12  ;;  %v765_v19 = vrot.slane %v757_v2, %v5495_v11 }
 0x1fd   : > { %v590_v8 = vpop.permute.xlu0 %589  ;;  %v584_v9 = vpop.permute.xlu1 %583  ;;  %v749_v22 = vrot.slane %v741_v3, %v5495_v11  ;;  %v732_v29 = vrot.slane %v718_v7, %v5497_v12  ;;  %v772_v16 = vrot.slane %v758_v36, %v5495_v11  ;;  %v756_v49 = vrot.slane %v742_v39, %v5495_v11 }
 0x1fe   : > { %v733_v13 = vcombine.low %v677_v4, %v709_v5  ;;  %v735_v23 = vcombine.low %v684_v14, %v716_v10  ;;  %v734_v27 = vcombine.high %v677_v4, %v709_v5  ;;  %v737_v37 = vcombine.low %v693_v28, %v725_v17 }
 0x1ff   : > { %v805_v40 = vcombine.low %v749_v22, %v765_v19  ;;  %v736_v43 = vcombine.high %v684_v14, %v716_v10  ;;  %v739_v47 = vcombine.low %v700_v38, %v732_v29  ;;  %v806_v52 = vcombine.high %v749_v22, %v765_v19 }
 0x200   : > { %4527 = vmatprep.subr.mxu0 %v733_v13  ;;  %4537 = vmatprep.subr.mxu1 %v735_v23  ;;  %v738_v53 = vcombine.high %v693_v28, %v725_v17  ;;  %v821_v56 = vcombine.low %v756_v49, %v772_v16  ;;  %v740_v57 = vcombine.high %v700_v38, %v732_v29 }
 0x201   : > { %v602_v25 = vpop.permute.xlu0 %601  ;;  %4528 = vmatpush3.msra.mxu0 %v733_v13  ;;  %v596_v26 = vpop.permute.xlu1 %595  ;;  %4538 = vmatpush3.msra.mxu1 %v735_v23  ;;  %v813_v50 = vrot.slane %v805_v40, %v5497_v12  ;;  %v820_v58 = vrot.slane %v806_v52, %v5497_v12  ;;  %v822_v62 = vcombine.high %v756_v49, %v772_v16 }
 0x202   : > { %v789_v30 = vcombine.low %v590_v8, %v602_v25  ;;  %v790_v31 = vcombine.high %v590_v8, %v602_v25  ;;  %v773_v32 = vcombine.low %v584_v9, %v596_v26  ;;  %v774_v35 = vcombine.high %v584_v9, %v596_v26  ;;  %4530 = vmatmul.mubr.msk.f32.vlgmr.msra.gmra.mrb[2].mxu0 %vm468_vm0, %v5606_v24 }
 0x203   : > { %4532 = vmatprep.subr.mxu0 %v734_v27  ;;  %4540 = vmatmul.mubr.msk.f32.vlgmr.msra.gmra.mrb[0].mxu1 %vm468_vm0, %v5606_v24  ;;  %v829_v63 = vrot.slane %v821_v56, %v5497_v12  ;;  %v836_v3 = vrot.slane %v822_v62, %v5497_v12  ;;  %v4701_v7 = vpack.i.bf16 %v5558_v20, %v5562_v21  ;;  %v4369_v62 = vld [vmem:[%s5714_s12] sm:$0xff]  }
 0x204   : > { %v797_v41 = vrot.slane %v789_v30, %v5495_v11  ;;  %v781_v42 = vrot.slane %v773_v32, %v5495_v11  ;;  %4547 = vmatprep.subr.mxu1 %v737_v37  ;;  %v804_v44 = vrot.slane %v790_v31, %v5495_v11  ;;  %v788_v45 = vrot.slane %v774_v35, %v5495_v11 }
 0x205   : > { %4533 = vmatpush3.msra.mxu0 %v734_v27  ;;  %4548 = vmatpush3.msra.mxu1 %v737_v37 }
 0x206   : > { %v837_v46 = vcombine.low %v781_v42, %v797_v41  ;;  %v838_v48 = vcombine.high %v781_v42, %v797_v41  ;;  %4542 = vmatprep.subr.mxu0 %v736_v43  ;;  %4557 = vmatprep.subr.mxu1 %v739_v47  ;;  %v853_v54 = vcombine.low %v788_v45, %v804_v44 }
 0x207   : > { %4534 = vmatprep.mubr.msk.f32.mxu0 %vm468_vm0, %v5544_v18  ;;  %4549 = vmatprep.mubr.msk.f32.mxu1 %vm468_vm0, %v5544_v18  ;;  %v854_v59 = vcombine.high %v788_v45, %v804_v44 }
 0x208   : > { %v845_v51 = vrot.slane %v837_v46, %v5497_v12  ;;  %4535 = vmatmul.mubr.msk.f32.vlgmr.msra.gmra.mrb[4].mxu0 %vm468_vm0, %v5606_v24  ;;  %4550 = vmatmul.mubr.msk.f32.vlgmr.msra.gmra.mrb[2].mxu1 %vm468_vm0, %v5606_v24  ;;  %v852_v55 = vrot.slane %v838_v48, %v5497_v12  ;;  %v861_v60 = vrot.slane %v853_v54, %v5497_v12 }
 0x209   : > { %4543 = vmatpush3.msra.mxu0 %v736_v43  ;;  %4558 = vmatpush3.msra.mxu1 %v739_v47  ;;  %v868_v2 = vrot.slane %v854_v59, %v5497_v12 }
 0x20a   : > { %v869_v11 = vcombine.low %v813_v50, %v845_v51  ;;  %4552 = vmatprep.subr.mxu0 %v738_v53  ;;  %4544 = vmatprep.mubr.msk.f32.mxu0 %vm468_vm0, %v5544_v18  ;;  %v871_v61 = vcombine.low %v820_v58, %v852_v55  ;;  %v870_v0 = vcombine.high %v813_v50, %v845_v51 }
 0x20b   : > { %4559 = vmatprep.mubr.msk.f32.mxu1 %vm468_vm0, %v5544_v18  ;;  %v873_v1 = vcombine.low %v829_v63, %v861_v60  ;;  %v872_v4 = vcombine.high %v820_v58, %v852_v55  ;;  %v875_v5 = vcombine.low %v836_v3, %v868_v2  ;;  %v874_v12 = vcombine.high %v829_v63, %v861_v60  ;;  %v5709_v60 = vpop.permute.xlu1 %4692 }
 0x20c   : > { %4545 = vmatmul.mubr.msk.f32.vlgmr.msra.gmra.mrb[6].mxu0 %vm468_vm0, %v5606_v24  ;;  %4567 = vmatprep.subr.mxu1 %v869_v11  ;;  %v876_v6 = vcombine.high %v836_v3, %v868_v2  ;;  %v4370_v63 = vunpack.c.l.bf16 %v4369_v62  ;;  %v4436_v2 = vld [vmem:[%s5714_s12 + $0x10] sm:$0xff]  }
 0x20d   : > { %4553 = vmatpush3.msra.mxu0 %v738_v53  ;;  %4560 = vmatmul.mubr.msk.f32.vlgmr.msra.gmra.mrb[4].mxu1 %vm468_vm0, %v5606_v24 }
 0x20e   : > { %4562 = vmatprep.subr.mxu0 %v740_v57  ;;  %4554 = vmatprep.mubr.msk.f32.mxu0 %vm468_vm0, %v5544_v18 }
 0x20f   : > { %4568 = vmatpush3.msra.mxu1 %v869_v11  ;;  %4569 = vmatprep.mubr.msk.f32.mxu1 %vm468_vm0, %v5544_v18 }
 0x210   : > { %4555 = vmatmul.mubr.msk.f32.vlgmr.msra.gmra.mrb[8].mxu0 %vm468_vm0, %v5606_v24  ;;  %4577 = vmatprep.subr.mxu1 %v871_v61 }
 0x211   : > { %4563 = vmatpush3.msra.mxu0 %v740_v57  ;;  %4570 = vmatmul.mubr.msk.f32.vlgmr.msra.gmra.mrb[6].mxu1 %vm468_vm0, %v5606_v24 }
 0x212   : > { %4572 = vmatprep.subr.mxu0 %v870_v0  ;;  %4578 = vmatpush3.msra.mxu1 %v871_v61  ;;  %v5716_v61 = vpop.permute.xlu1 %4697 }
 0x213   : > { %4587 = vmatprep.subr.mxu1 %v873_v1  ;;  %4564 = vmatprep.mubr.msk.f32.mxu0 %vm468_vm0, %v5544_v18 }
 0x214   : > { %4579 = vmatprep.mubr.msk.f32.mxu1 %vm468_vm0, %v5544_v18  ;;  %4565 = vmatmul.mubr.msk.f32.vlgmr.msra.gmra.mrb[10].mxu0 %vm468_vm0, %v5606_v24 }
 0x215   : > { %4573 = vmatpush3.msra.mxu0 %v870_v0  ;;  %4580 = vmatmul.mubr.msk.f32.vlgmr.msra.gmra.mrb[8].mxu1 %vm468_vm0, %v5606_v24  ;;  %v4371_v0 = vunpack.c.h.bf16 %v4369_v62 }
 0x216   : > { %4588 = vmatpush3.msra.mxu1 %v873_v1  ;;  %4582 = vmatprep.subr.mxu0 %v872_v4 }
 0x217   : > { %4597 = vmatprep.subr.mxu1 %v875_v5  ;;  %4574 = vmatprep.mubr.msk.f32.mxu0 %vm468_vm0, %v5544_v18 }
 0x218   : > { %4589 = vmatprep.mubr.msk.f32.mxu1 %vm468_vm0, %v5544_v18  ;;  %4575 = vmatmul.mubr.msk.f32.vlgmr.msra.gmra.mrb[12].mxu0 %vm468_vm0, %v5606_v24 }
 0x219   : > { %4583 = vmatpush3.msra.mxu0 %v872_v4  ;;  %4590 = vmatmul.mubr.msk.f32.vlgmr.msra.gmra.mrb[10].mxu1 %vm468_vm0, %v5606_v24 }
 0x21a   : > { %4598 = vmatpush3.msra.mxu1 %v875_v5  ;;  %4592 = vmatprep.subr.mxu0 %v874_v12 }
 0x21b   : > { %4584 = vmatprep.mubr.msk.f32.mxu0 %vm468_vm0, %v5544_v18  ;;  %4599 = vmatprep.mubr.msk.f32.mxu1 %vm468_vm0, %v5544_v18 }
 0x21c   : > { %4585 = vmatmul.mubr.msk.f32.vlgmr.msra.gmra.mrb[14].mxu0 %vm468_vm0, %v5606_v24  ;;  %4702 = vrot.lane.b32.xlu0 %v4701_v7, %s5441_s28 }
 0x21d   : > { %4593 = vmatpush3.msra.mxu0 %v874_v12  ;;  %4594 = vmatprep.mubr.msk.f32.mxu0 %vm468_vm0, %v5544_v18  ;;  %v4438_v12 = vld [vmem:[%s5714_s12 + $0x20] sm:$0xff]  }
 0x21e   : > { %4602 = vmatprep.subr.mxu0 %v876_v6  ;;  %4600 = vmatmul.mubr.msk.f32.vlgmr.msra.gmra.mrb[12].mxu1 %vm468_vm0, %v5606_v24 }
 0x220   : > { %4595 = vmatmul.mubr.msk.f32.vlgmr.msra.gmra.mrb[16].mxu0 %vm468_vm0, %v5606_v24  ;;  %4707 = vrot.lane.b32.xlu0 %v5574_v33, %s5442_s29 }
 0x221   : > { %4603 = vmatpush3.msra.mxu0 %v876_v6  ;;  %4604 = vmatprep.mubr.msk.f32.mxu0 %vm468_vm0, %v5544_v18 }
 0x224   : > { %4605 = vmatmul.mubr.msk.f32.vlgmr.msra.gmra.mrb[18].mxu0 %vm468_vm0, %v5606_v24 }
 0x28e   : > { %v5720_v5 = vpop.permute.xlu0 %4702 }
 0x28f   : > { %7175 = vst [vmem:[#allocation3_spill] sm:$0xff] %v5720_v5 }
 0x2d5   : > { %v4531_v8 = vpop.f32.mrb[2].mxu0 }
 0x2d6   : > { %v951_v9 = vpop.f32.mrb[3].mxu0  ;;  %v4541_v13 = vpop.f32.mrb[0].mxu1 }
 0x2d7   : > { %v4711_v10 = vpack.i.bf16 %v4531_v8, %v951_v9  ;;  %v1101_v14 = vpop.f32.mrb[1].mxu1  ;;  %v4378_v8 = vunpack.c.l.bf16 %v4436_v2  ;;  %v4379_v9 = vunpack.c.h.bf16 %v4436_v2 }
 0x2d8   : > { %v4716_v18 = vpack.i.bf16 %v4541_v13, %v1101_v14 }
 0x2d9   : > { %4712 = vrot.lane.b32.xlu1 %v4711_v10, %s5426_s27 }
 0x2db   : > { %v4536_v15 = vpop.f32.mrb[4].mxu0  ;;  %v4551_v17 = vpop.f32.mrb[2].mxu1 }
 0x2dc   : > { %v1026_v19 = vpop.f32.mrb[5].mxu0  ;;  %v1251_v22 = vpop.f32.mrb[3].mxu1 }
 0x2dd   : > { %4717 = vrot.lane.b32.xlu1 %v4716_v18, %s5426_s27  ;;  %v4721_v23 = vpack.i.bf16 %v4536_v15, %v1026_v19  ;;  %v4726_v24 = vpack.i.bf16 %v4551_v17, %v1251_v22  ;;  %v4386_v17 = vunpack.c.l.bf16 %v4438_v12 }
 0x2df   : > { %4722 = vrot.lane.b32.xlu0 %v4721_v23, %s5426_s27  ;;  %v4546_v25 = vpop.f32.mrb[6].mxu0 }
 0x2e0   : > { %v4561_v33 = vpop.f32.mrb[4].mxu1  ;;  %v1176_v26 = vpop.f32.mrb[7].mxu0 }
 0x2e1   : > { %4727 = vrot.lane.b32.xlu1 %v4726_v24, %s5426_s27  ;;  %v1401_v27 = vpop.f32.mrb[5].mxu1  ;;  %v4731_v28 = vpack.i.bf16 %v4546_v25, %v1176_v26  ;;  %v4387_v24 = vunpack.c.h.bf16 %v4438_v12 }
 0x2e2   : > { %v4736_v29 = vpack.i.bf16 %v4561_v33, %v1401_v27 }
 0x2e3   : > { %4732 = vrot.lane.b32.xlu0 %v4731_v28, %s5426_s27  ;;  %v4556_v30 = vpop.f32.mrb[8].mxu0  ;;  %v5737_v28 = vpop.permute.xlu0 %4707 }
 0x2e4   : > { %v1326_v31 = vpop.f32.mrb[9].mxu0  ;;  %v4571_v32 = vpop.f32.mrb[6].mxu1  ;;  %7176 = vst [vmem:[#allocation4_spill] sm:$0xff] %v5737_v28 }
 0x2e5   : > { %4737 = vrot.lane.b32.xlu1 %v4736_v29, %s5426_s27  ;;  %v4741_v35 = vpack.i.bf16 %v4556_v30, %v1326_v31  ;;  %v1551_v36 = vpop.f32.mrb[7].mxu1 }
 0x2e6   : > { %v4746_v37 = vpack.i.bf16 %v4571_v32, %v1551_v36 }
 0x2e7   : > { %4742 = vrot.lane.b32.xlu0 %v4741_v35, %s5426_s27  ;;  %v4566_v38 = vpop.f32.mrb[10].mxu0 }
 0x2e8   : > { %v1476_v39 = vpop.f32.mrb[11].mxu0  ;;  %v4581_v40 = vpop.f32.mrb[8].mxu1 }
 0x2e9   : > { %4747 = vrot.lane.b32.xlu1 %v4746_v37, %s5426_s27  ;;  %v4751_v41 = vpack.i.bf16 %v4566_v38, %v1476_v39  ;;  %v1701_v42 = vpop.f32.mrb[9].mxu1 }
 0x2ea   : > { %v4756_v43 = vpack.i.bf16 %v4581_v40, %v1701_v42 }
 0x2eb   : > { %4752 = vrot.lane.b32.xlu0 %v4751_v41, %s5426_s27  ;;  %v4576_v44 = vpop.f32.mrb[12].mxu0 }
 0x2ec   : > { %v1626_v45 = vpop.f32.mrb[13].mxu0  ;;  %v4591_v46 = vpop.f32.mrb[10].mxu1 }
 0x2ed   : > { %v4761_v47 = vpack.i.bf16 %v4576_v44, %v1626_v45  ;;  %4757 = vrot.lane.b32.xlu1 %v4756_v43, %s5426_s27  ;;  %v1851_v16 = vpop.f32.mrb[11].mxu1  ;;  %v4435_v44 = vld [vmem:[%s5714_s12 + $0x8] sm:$0xff]  }
 0x2ee   : > { %v4766_v48 = vpack.i.bf16 %v4591_v46, %v1851_v16 }
 0x2ef   : > { %4762 = vrot.lane.b32.xlu0 %v4761_v47, %s5426_s27  ;;  %v4586_v49 = vpop.f32.mrb[14].mxu0 }
 0x2f0   : > { %v1776_v50 = vpop.f32.mrb[15].mxu0 }
 0x2f1   : > { %v4771_v51 = vpack.i.bf16 %v4586_v49, %v1776_v50  ;;  %4767 = vrot.lane.b32.xlu1 %v4766_v48, %s5426_s27  ;;  %v4601_v52 = vpop.f32.mrb[12].mxu1 }
 0x2f2   : > { %v2001_v53 = vpop.f32.mrb[13].mxu1 }
 0x2f3   : > { %4772 = vrot.lane.b32.xlu0 %v4771_v51, %s5426_s27  ;;  %v4596_v54 = vpop.f32.mrb[16].mxu0  ;;  %v4776_v11 = vpack.i.bf16 %v4601_v52, %v2001_v53  ;;  %v4374_v51 = vunpack.c.l.bf16 %v4435_v44  ;;  %v4375_v52 = vunpack.c.h.bf16 %v4435_v44  ;;  %v5411_v44 = vld [vmem:[%s7150_s4] sm:$0xff]  }
 0x2f4   : > { %v1926_v55 = vpop.f32.mrb[17].mxu0  ;;  %4607 = vmatprep.subr.bf16.mxu0 %v5411_v44  ;;  %4649 = vmatprep.subr.bf16.mxu1 %v5411_v44 }
 0x2f5   : > { %v4781_v56 = vpack.i.bf16 %v4596_v54, %v1926_v55  ;;  %4777 = vrot.lane.b32.xlu1 %v4776_v11, %s5426_s27  ;;  %4608 = vmatpush3.bf16.msra.mxu0 %v5411_v44 }
 0x2f6   : > { %4654 = vmatpush3.bf16.msra.mxu1 %v5411_v44 }
 0x2f7   : > { %4782 = vrot.lane.b32.xlu0 %v4781_v56, %s5426_s27  ;;  %v4606_v57 = vpop.f32.mrb[18].mxu0 }
 0x2f8   : > { %v2076_v58 = vpop.f32.mrb[19].mxu0 }
 0x2f9   : > { %v4786_v59 = vpack.i.bf16 %v4606_v57, %v2076_v58 }
 0x2fb   : > { %4787 = vrot.lane.b32.xlu0 %v4786_v59, %s5426_s27  ;;  %s5443_s27 = smov 64  }
 0x34b   : > { %v4713_v1 = vpop.permute.xlu1 %4712 }
 0x34c   : > { %v4715_v3 = vunpack.i.h.bf16 %v4713_v1  ;;  %v4714_v4 = vunpack.i.l.bf16 %v4713_v1 }
 0x34e   : > { %v2278_v6 = vsel %vm466_vm1, %v4371_v0, %v4715_v3  ;;  %v2277_v7 = vsel %vm466_vm1, %v4370_v63, %v4714_v4 }
 0x34f   : > { %v2346_v10 = vrot.slane %v2278_v6, 7  ;;  %v2345_v13 = vrot.slane %v2277_v7, 7  ;;  %v4718_v14 = vpop.permute.xlu1 %4717 }
 0x350   : > { %v4720_v18 = vunpack.i.h.bf16 %v4718_v14  ;;  %v4719_v15 = vunpack.i.l.bf16 %v4718_v14 }
 0x351   : > { %v2460_v19 = vsel %vm2342_vm7, %v2346_v10, 0.0  ;;  %v5727_v22 = vsel %vm2342_vm7, %v2345_v13, %v2346_v10  ;;  %v5730_v23 = vsel %vm2342_vm7, 0.0, %v2345_v13  ;;  %v4723_v53 = vpop.permute.xlu0 %4722 }
 0x352   : > { %v2282_v25 = vsel %vm466_vm1, %v4379_v9, %v4720_v18  ;;  %v2281_v33 = vsel %vm466_vm1, %v4378_v8, %v4719_v15  ;;  %v4791_v26 = vpack.i.bf16 %v5727_v22, %v5730_v23  ;;  %v2514_v27 = vrot.slane %v5730_v23, 1 }
 0x353   : > { %v2352_v29 = vrot.slane %v2282_v25, 7  ;;  %v2351_v30 = vrot.slane %v2281_v33, 7  ;;  %v2515_v31 = vrot.slane %v5727_v22, 1  ;;  %v2517_v32 = vrot.slane %v2460_v19, 1  ;;  %v4728_v35 = vpop.permute.xlu1 %4727 }
 0x354   : > { %4792 = vrot.lane.b32.xlu1 %v4791_v26, %s5431_s10  ;;  %v4730_v36 = vunpack.i.h.bf16 %v4728_v35  ;;  %v4729_v37 = vunpack.i.l.bf16 %v4728_v35  ;;  %v2595_v38 = vrot.slane %v5730_v23, 2  ;;  %v2596_v39 = vrot.slane %v5727_v22, 2 }
 0x355   : > { %v2462_v40 = vsel %vm2342_vm7, %v2352_v29, 0.0  ;;  %v2516_v41 = vsel %vm2508_vm8, %v2514_v27, %v2515_v31  ;;  %v2518_v42 = vsel %vm2508_vm8, %v2515_v31, %v2517_v32  ;;  %v5747_v43 = vsel %vm2342_vm7, %v2351_v30, %v2352_v29 }
 0x356   : > { %v4806_v45 = vpack.i.bf16 %v2518_v42, %v2516_v41  ;;  %v5751_v46 = vsel %vm2342_vm7, 0.0, %v2351_v30  ;;  %v2525_v47 = vrot.slane %v5747_v43, 1  ;;  %v2527_v16 = vrot.slane %v2462_v40, 1 }
 0x357   : > { %v4796_v48 = vpack.i.bf16 %v5747_v43, %v5751_v46  ;;  %v2524_v49 = vrot.slane %v5751_v46, 1  ;;  %v2286_v11 = vsel %vm466_vm1, %v4387_v24, %v4730_v36  ;;  %v2285_v55 = vsel %vm466_vm1, %v4386_v17, %v4729_v37  ;;  %v4738_v41 = vpop.permute.xlu1 %4737 }
 0x358   : > { %4807 = vrot.lane.b32.xlu0 %v4806_v45, %s5428_s7  ;;  %v2528_v50 = vsel %vm2508_vm8, %v2525_v47, %v2527_v16  ;;  %v2598_v56 = vrot.slane %v2460_v19, 2  ;;  %v2597_v58 = vsel %vm2589_vm9, %v2595_v38, %v2596_v39  ;;  %v2605_v59 = vrot.slane %v5751_v46, 2  ;;  %v4733_v16 = vpop.permute.xlu0 %4732 }
 0x359   : > { %4797 = vrot.lane.b32.xlu1 %v4796_v48, %s5431_s10  ;;  %v2526_v54 = vsel %vm2508_vm8, %v2524_v49, %v2525_v47  ;;  %v2606_v62 = vrot.slane %v5747_v43, 2  ;;  %v2608_v0 = vrot.slane %v2462_v40, 2  ;;  %v4725_v1 = vunpack.i.h.bf16 %v4723_v53  ;;  %v4437_v47 = vld [vmem:[%s5714_s12 + $0x18] sm:$0xff]  }
 0x35a   : > { %v4811_v57 = vpack.i.bf16 %v2528_v50, %v2526_v54  ;;  %v2599_v63 = vsel %vm2589_vm9, %v2596_v39, %v2598_v56  ;;  %v4724_v2 = vunpack.i.l.bf16 %v4723_v53  ;;  %v2358_v12 = vrot.slane %v2286_v11, 7  ;;  %v4440_v39 = vld [vmem:[%s5714_s12 + $0x30] sm:$0xff]  }
 0x35b   : > { %v2280_v3 = vsel %vm466_vm1, %v4375_v52, %v4725_v1  ;;  %v2357_v6 = vrot.slane %v2285_v55, 7  ;;  %v4816_v7 = vpack.i.bf16 %v2599_v63, %v2597_v58  ;;  %v2607_v8 = vsel %vm2589_vm9, %v2605_v59, %v2606_v62  ;;  %v5413_v59 = vld [vmem:[%s7150_s4 + $0x10] sm:$0xff]  }
 0x35c   : > { %4812 = vrot.lane.b32.xlu0 %v4811_v57, %s5428_s7  ;;  %v2279_v4 = vsel %vm466_vm1, %v4374_v51, %v4724_v2  ;;  %v2609_v9 = vsel %vm2589_vm9, %v2606_v62, %v2608_v0  ;;  %v2349_v10 = vrot.slane %v2280_v3, 7  ;;  %v2464_v42 = vsel %vm2342_vm7, %v2358_v12, 0.0 }
 0x35d   : > { %4802 = vrot.lane.b32.xlu1 %v4796_v48, %s5441_s28  ;;  %v2348_v13 = vrot.slane %v2279_v4, 7  ;;  %v4821_v14 = vpack.i.bf16 %v2609_v9, %v2607_v8  ;;  %v5776_v18 = vsel %vm2342_vm7, %v2357_v6, %v2358_v12  ;;  %v5779_v15 = vsel %vm2342_vm7, 0.0, %v2357_v6  ;;  %v5412_v48 = vld [vmem:[%s7150_s4 + $0x8] sm:$0xff]  }
 0x35e   : > { %7177 = vst [vmem:[#allocation5_spill] sm:$0xff] %v5776_v18  ;;  %7178 = vst [vmem:[#allocation6_spill] sm:$0xff] %v5779_v15  ;;  %v2461_v17 = vsel %vm2342_vm7, %v2349_v10, 0.0  ;;  %v4861_v25 = vpack.i.bf16 %v5776_v18, %v5779_v15  ;;  %v4395_v50 = vunpack.c.h.bf16 %v4440_v39  ;;  %v4740_v51 = vunpack.i.h.bf16 %v4738_v41  ;;  %4609 = vmatprep.subr.bf16.mxu0 %v5412_v48  ;;  %4650 = vmatprep.subr.bf16.mxu1 %v5412_v48 }
 0x35f   : > { %v5783_v19 = vsel %vm2342_vm7, %v2348_v13, %v2349_v10  ;;  %v5786_v24 = vsel %vm2342_vm7, 0.0, %v2348_v13  ;;  %v2522_v27 = vrot.slane %v2461_v17, 1  ;;  %v2603_v35 = vrot.slane %v2461_v17, 2  ;;  %4610 = vmatpush3.bf16.msra.mxu0 %v5412_v48  ;;  %4655 = vmatpush3.bf16.msra.mxu1 %v5412_v48 }
 0x360   : > { %4817 = vrot.lane.b32.xlu0 %v4816_v7, %s5429_s8  ;;  %v2519_v33 = vrot.slane %v5786_v24, 1  ;;  %v2520_v26 = vrot.slane %v5783_v19, 1  ;;  %v2600_v31 = vrot.slane %v5786_v24, 2  ;;  %v2601_v32 = vrot.slane %v5783_v19, 2  ;;  %4611 = vmatprep.subr.bf16.mxu0 %v5413_v59 }
 0x361   : > { %4837 = vrot.lane.b32.xlu1 %v4811_v57, %s5442_s29  ;;  %v4856_v49 = vpack.i.bf16 %v5783_v19, %v5786_v24  ;;  %v4739_v52 = vunpack.i.l.bf16 %v4738_v41  ;;  %v2534_v53 = vrot.slane %v5779_v15, 1  ;;  %v2535_v54 = vrot.slane %v5776_v18, 1  ;;  %4651 = vmatprep.subr.bf16.mxu1 %v5413_v59 }
 0x362   : > { %v2521_v29 = vsel %vm2508_vm8, %v2519_v33, %v2520_v26  ;;  %v2523_v30 = vsel %vm2508_vm8, %v2520_v26, %v2522_v27  ;;  %v2602_v37 = vsel %vm2589_vm9, %v2600_v31, %v2601_v32  ;;  %v2604_v38 = vsel %vm2589_vm9, %v2601_v32, %v2603_v35 }
 0x363   : > { %v5802_v36 = vpack.i.bf16 %v2523_v30, %v2521_v29  ;;  %v5810_v40 = vpack.i.bf16 %v2604_v38, %v2602_v37  ;;  %v2537_v11 = vrot.slane %v2464_v42, 1  ;;  %v4382_v55 = vunpack.c.l.bf16 %v4437_v47  ;;  %4612 = vmatpush3.bf16.msra.mxu0 %v5413_v59  ;;  %4656 = vmatpush3.bf16.msra.mxu1 %v5413_v59  ;;  %v4743_v59 = vpop.permute.xlu0 %4742 }
 0x364   : > { %4822 = vrot.lane.b32.xlu0 %v4821_v14, %s5429_s8  ;;  %v4383_v56 = vunpack.c.h.bf16 %v4437_v47  ;;  %v4734_v58 = vunpack.i.l.bf16 %v4733_v16  ;;  %v2290_v62 = vsel %vm466_vm1, %v4395_v50, %v4740_v51  ;;  %v2615_v63 = vrot.slane %v5779_v15, 2 }
 0x365   : > { %4842 = vrot.lane.b32.xlu1 %v4821_v14, %s5443_s27  ;;  %v2616_v0 = vrot.slane %v5776_v18, 2  ;;  %v2536_v2 = vsel %vm2508_vm8, %v2534_v53, %v2535_v54  ;;  %v2538_v3 = vsel %vm2508_vm8, %v2535_v54, %v2537_v11  ;;  %v2618_v4 = vrot.slane %v2464_v42, 2  ;;  %v4439_v54 = vld [vmem:[%s5714_s12 + $0x28] sm:$0xff]   ;;  %v4442_v11 = vld [vmem:[%s5714_s12 + $0x40] sm:$0xff]  }
 0x366   : > { %v2283_v6 = vsel %vm466_vm1, %v4382_v55, %v4734_v58  ;;  %v2364_v8 = vrot.slane %v2290_v62, 7  ;;  %v4881_v10 = vpack.i.bf16 %v2538_v3, %v2536_v2  ;;  %v4748_v62 = vpop.permute.xlu1 %4747  ;;  %v4403_v2 = vunpack.c.h.bf16 %v4442_v11 }
 0x367   : > { %v2617_v13 = vsel %vm2589_vm9, %v2615_v63, %v2616_v0  ;;  %v4390_v63 = vunpack.c.l.bf16 %v4439_v54 }
 0x368   : > { %4827 = vrot.lane.b32.xlu0 %v4806_v45, %s5444_s13  ;;  %v4394_v45 = vunpack.c.l.bf16 %v4440_v39 }
 0x369   : > { %4862 = vrot.lane.b32.xlu1 %v4861_v25, %s5431_s10 }
 0x36a   : > { %v2289_v1 = vsel %vm466_vm1, %v4394_v45, %v4739_v52 }
 0x36b   : > { %v2363_v9 = vrot.slane %v2289_v1, 7  ;;  %v4402_v1 = vunpack.c.l.bf16 %v4442_v11 }
 0x36c   : > { %4832 = vrot.lane.b32.xlu0 %v4816_v7, %s5445_s14  ;;  %v5414_v7 = vld [vmem:[%s7150_s4 + $0x18] sm:$0xff]  }
 0x36d   : > { %4872 = vrot.lane.b32.xlu1 %v4861_v25, %s5441_s28  ;;  %v2354_v25 = vrot.slane %v2283_v6, 7  ;;  %4613 = vmatprep.subr.bf16.mxu0 %v5414_v7  ;;  %v5852_v26 = vsel %vm2342_vm7, %v2363_v9, %v2364_v8  ;;  %v5855_v27 = vsel %vm2342_vm7, 0.0, %v2363_v9  ;;  %v4750_v6 = vunpack.i.h.bf16 %v4748_v62 }
 0x36e   : > { %4652 = vmatprep.subr.bf16.mxu1 %v5414_v7  ;;  %4614 = vmatpush3.bf16.msra.mxu0 %v5414_v7  ;;  %v4941_v32 = vpack.i.bf16 %v5852_v26, %v5855_v27  ;;  %v2544_v50 = vrot.slane %v5855_v27, 1  ;;  %v2545_v51 = vrot.slane %v5852_v26, 1  ;;  %v4749_v9 = vunpack.i.l.bf16 %v4748_v62 }
 0x36f   : > { %v5862_v31 = vsel %vm2342_vm7, 0.0, %v2354_v25  ;;  %4657 = vmatpush3.bf16.msra.mxu1 %v5414_v7 }
 0x370   : > { %4847 = vrot.lane.b32.xlu0 %v4811_v57, %s5444_s13  ;;  %v4735_v57 = vunpack.i.h.bf16 %v4733_v16  ;;  %7180 = vst [vmem:[#allocation8_spill] sm:$0xff] %v5862_v31  ;;  %v2529_v35 = vrot.slane %v5862_v31, 1  ;;  %v2610_v42 = vrot.slane %v5862_v31, 2  ;;  %v2546_v53 = vsel %vm2508_vm8, %v2544_v50, %v2545_v51 }
 0x371   : > { %4877 = vrot.lane.b32.xlu1 %v5802_v36, %s5428_s7 }
 0x372   : > { %v2284_v12 = vsel %vm466_vm1, %v4383_v56, %v4735_v57  ;;  %v2625_v56 = vrot.slane %v5855_v27, 2  ;;  %v2626_v57 = vrot.slane %v5852_v26, 2 }
 0x373   : > { %v2355_v17 = vrot.slane %v2284_v12, 7  ;;  %v4744_v12 = vunpack.i.l.bf16 %v4743_v59 }
 0x374   : > { %4852 = vrot.lane.b32.xlu0 %v4821_v14, %s5445_s14  ;;  %v2619_v14 = vsel %vm2589_vm9, %v2616_v0, %v2618_v4  ;;  %v4391_v0 = vunpack.c.h.bf16 %v4439_v54  ;;  %v4745_v4 = vunpack.i.h.bf16 %v4743_v59  ;;  %v2627_v7 = vsel %vm2589_vm9, %v2625_v56, %v2626_v57 }
 0x375   : > { %4887 = vrot.lane.b32.xlu1 %v5810_v40, %s5429_s8  ;;  %v4891_v33 = vpack.i.bf16 %v2619_v14, %v2617_v13  ;;  %v2463_v29 = vsel %vm2342_vm7, %v2355_v17, 0.0  ;;  %v5859_v30 = vsel %vm2342_vm7, %v2354_v25, %v2355_v17  ;;  %v2287_v14 = vsel %vm466_vm1, %v4390_v63, %v4744_v12 }
 0x376   : > { %7179 = vst [vmem:[#allocation7_spill] sm:$0xff] %v5859_v30  ;;  %v2530_v37 = vrot.slane %v5859_v30, 1  ;;  %v2532_v38 = vrot.slane %v2463_v29, 1  ;;  %v2611_v44 = vrot.slane %v5859_v30, 2  ;;  %v2613_v45 = vrot.slane %v2463_v29, 2 }
 0x377   : > { %v2288_v13 = vsel %vm466_vm1, %v4391_v0, %v4745_v4  ;;  %v2294_v17 = vsel %vm466_vm1, %v4403_v2, %v4750_v6  ;;  %v2293_v25 = vsel %vm466_vm1, %v4402_v1, %v4749_v9  ;;  %v2360_v29 = vrot.slane %v2287_v14, 7  ;;  %v4758_v0 = vpop.permute.xlu1 %4757 }
 0x378   : > { %4857 = vrot.lane.b32.xlu0 %v4856_v49, %s5431_s10  ;;  %v2531_v39 = vsel %vm2508_vm8, %v2529_v35, %v2530_v37  ;;  %v2533_v41 = vsel %vm2508_vm8, %v2530_v37, %v2532_v38  ;;  %v2614_v16 = vsel %vm2589_vm9, %v2611_v44, %v2613_v45  ;;  %v2369_v35 = vrot.slane %v2293_v25, 7  ;;  %v5415_v37 = vld [vmem:[%s7150_s4 + $0x20] ss:$0 sps:$4 sm:$0xff]  }
 0x379   : > { %4897 = vrot.lane.b32.xlu1 %v5802_v36, %s5444_s13  ;;  %v4956_v47 = vpack.i.bf16 %v2533_v41, %v2531_v39  ;;  %v5921_v41 = vsel %vm2342_vm7, 0.0, %v2360_v29  ;;  %4659 = vmatprep.subr.msk.bf16.mxu0 %vm3812_vm10, %v5415_v37  ;;  %v3814_v45 = vsel %vm3812_vm10, %v5415_v37, 0 }
 0x37a   : > { %7182 = vst [vmem:[#allocation10_spill] sm:$0xff] %v5921_v41  ;;  %4660 = vmatprep.subr.msk.bf16.mxu1 %vm3812_vm10, %v5415_v37  ;;  %4616 = vmatpush3.bf16.msra.mxu0 %v3814_v45 }
 0x37b   : > { %4658 = vmatpush3.bf16.msra.mxu1 %v3814_v45 }
 0x37c   : > { %4867 = vrot.lane.b32.xlu0 %v4856_v49, %s5441_s28  ;;  %v4936_v49 = vpack.i.bf16 %v5859_v30, %v5862_v31 }
 0x37d   : > { %4902 = vrot.lane.b32.xlu1 %v5810_v40, %s5445_s14 }
 0x380   : > { %4882 = vrot.lane.b32.xlu0 %v4881_v10, %s5428_s7 }
 0x381   : > { %4917 = vrot.lane.b32.xlu1 %v4881_v10, %s5442_s29 }
 0x384   : > { %4892 = vrot.lane.b32.xlu0 %v4891_v33, %s5429_s8 }
 0x385   : > { %4922 = vrot.lane.b32.xlu1 %v4891_v33, %s5443_s27 }
 0x388   : > { %4907 = vrot.lane.b32.xlu0 %v5802_v36, %s5442_s29  ;;  %v2612_v36 = vsel %vm2589_vm9, %v2610_v42, %v2611_v44  ;;  %v5927_v44 = vsel %vm2342_vm7, 0.0, %v2369_v35 }
 0x389   : > { %4942 = vrot.lane.b32.xlu1 %v4941_v32, %s5431_s10  ;;  %v4966_v48 = vpack.i.bf16 %v2614_v16, %v2612_v36  ;;  %7184 = vst [vmem:[#allocation12_spill] sm:$0xff] %v5927_v44  ;;  %v2539_v36 = vrot.slane %v5921_v41, 1  ;;  %v2554_v56 = vrot.slane %v5927_v44, 1  ;;  %v2635_v4 = vrot.slane %v5927_v44, 2 }
 0x38c   : > { %4912 = vrot.lane.b32.xlu0 %v5810_v40, %s5443_s27  ;;  %v2466_v40 = vsel %vm2342_vm7, %v2364_v8, 0.0 }
 0x38d   : > { %4952 = vrot.lane.b32.xlu1 %v4941_v32, %s5441_s28  ;;  %v2547_v52 = vrot.slane %v2466_v40, 1  ;;  %v2628_v58 = vrot.slane %v2466_v40, 2  ;;  %v2370_v32 = vrot.slane %v2294_v17, 7 }
 0x38f   : > { %v2548_v55 = vsel %vm2508_vm8, %v2545_v51, %v2547_v52  ;;  %v2629_v8 = vsel %vm2589_vm9, %v2626_v57, %v2628_v58  ;;  %v5924_v42 = vsel %vm2342_vm7, %v2369_v35, %v2370_v32  ;;  %v2620_v51 = vrot.slane %v5921_v41, 2 }
 0x390   : > { %4927 = vrot.lane.b32.xlu0 %v4881_v10, %s5444_s13  ;;  %v4961_v3 = vpack.i.bf16 %v2548_v55, %v2546_v53  ;;  %v4971_v10 = vpack.i.bf16 %v2629_v8, %v2627_v7  ;;  %7183 = vst [vmem:[#allocation11_spill] sm:$0xff] %v5924_v42  ;;  %v5031_v50 = vpack.i.bf16 %v5924_v42, %v5927_v44  ;;  %v2468_v53 = vsel %vm2342_vm7, %v2370_v32, 0.0  ;;  %v4441_v8 = vld [vmem:[%s5714_s12 + $0x38] sm:$0xff]   ;;  %v4444_v32 = vld [vmem:[%s5714_s12 + $0x50] sm:$0xff]  }
 0x391   : > { %4957 = vrot.lane.b32.xlu1 %v4956_v47, %s5428_s7  ;;  %v2555_v57 = vrot.slane %v5924_v42, 1  ;;  %v2557_v63 = vrot.slane %v2468_v53, 1  ;;  %v2636_v12 = vrot.slane %v5924_v42, 2  ;;  %v2638_v6 = vrot.slane %v2468_v53, 2 }
 0x392   : > { %v4399_v17 = vunpack.c.h.bf16 %v4441_v8  ;;  %v4410_v45 = vunpack.c.l.bf16 %v4444_v32 }
 0x393   : > { %v2556_v2 = vsel %vm2508_vm8, %v2554_v56, %v2555_v57  ;;  %v2639_v14 = vsel %vm2589_vm9, %v2636_v12, %v2638_v6 }
 0x394   : > { %4932 = vrot.lane.b32.xlu0 %v4891_v33, %s5445_s14  ;;  %v2361_v33 = vrot.slane %v2288_v13, 7  ;;  %v2637_v13 = vsel %vm2589_vm9, %v2635_v4, %v2636_v12 }
 0x395   : > { %4967 = vrot.lane.b32.xlu1 %v4966_v48, %s5429_s8  ;;  %v5051_v35 = vpack.i.bf16 %v2639_v14, %v2637_v13 }
 0x396   : > { %v2465_v38 = vsel %vm2342_vm7, %v2361_v33, 0.0  ;;  %v5918_v39 = vsel %vm2342_vm7, %v2360_v29, %v2361_v33  ;;  %v4398_v33 = vunpack.c.l.bf16 %v4441_v8 }
 0x397   : > { %7181 = vst [vmem:[#allocation9_spill] sm:$0xff] %v5918_v39  ;;  %v2540_v16 = vrot.slane %v5918_v39, 1  ;;  %v2542_v40 = vrot.slane %v2465_v38, 1  ;;  %v2621_v52 = vrot.slane %v5918_v39, 2 }
 0x398   : > { %4937 = vrot.lane.b32.xlu0 %v4936_v49, %s5431_s10 }
 0x399   : > { %4977 = vrot.lane.b32.xlu1 %v4956_v47, %s5444_s13  ;;  %v2541_v54 = vsel %vm2508_vm8, %v2539_v36, %v2540_v16  ;;  %v2543_v11 = vsel %vm2508_vm8, %v2540_v16, %v2542_v40  ;;  %v2622_v59 = vsel %vm2589_vm9, %v2620_v51, %v2621_v52  ;;  %v4411_v16 = vunpack.c.h.bf16 %v4444_v32 }
 0x39a   : > { %v5036_v58 = vpack.i.bf16 %v2543_v11, %v2541_v54  ;;  %v4760_v40 = vunpack.i.h.bf16 %v4758_v0 }
 0x39c   : > { %4947 = vrot.lane.b32.xlu0 %v4936_v49, %s5441_s28  ;;  %v4753_v49 = vpop.permute.xlu0 %4752 }
 0x39d   : > { %4982 = vrot.lane.b32.xlu1 %v4966_v48, %s5445_s14  ;;  %v4755_v25 = vunpack.i.h.bf16 %v4753_v49  ;;  %v4754_v29 = vunpack.i.l.bf16 %v4753_v49 }
 0x39f   : > { %v2291_v36 = vsel %vm466_vm1, %v4398_v33, %v4754_v29 }
 0x3a0   : > { %4962 = vrot.lane.b32.xlu0 %v4961_v3, %s5428_s7  ;;  %v5944_v55 = vpop.permute.xlu0 %4762  ;;  %v2366_v51 = vrot.slane %v2291_v36, 7 }
 0x3a1   : > { %4997 = vrot.lane.b32.xlu1 %v4961_v3, %s5442_s29 }
 0x3a4   : > { %4972 = vrot.lane.b32.xlu0 %v4971_v10, %s5429_s8  ;;  %v5957_v7 = vpop.permute.xlu0 %4772 }
 0x3a5   : > { %5002 = vrot.lane.b32.xlu1 %v4971_v10, %s5443_s27 }
 0x3a8   : > { %4987 = vrot.lane.b32.xlu0 %v4956_v47, %s5442_s29  ;;  %v5016_v47 = vpack.i.bf16 %v5918_v39, %v5921_v41  ;;  %v5968_v37 = vpop.permute.xlu0 %4782 }
 0x3a9   : > { %5007 = vrot.lane.b32.xlu1 %v4961_v3, %s5444_s13  ;;  %v2558_v3 = vsel %vm2508_vm8, %v2555_v57, %v2557_v63  ;;  %v5989_v57 = vsel %vm2342_vm7, 0.0, %v2366_v51 }
 0x3aa   : > { %v5041_v9 = vpack.i.bf16 %v2558_v3, %v2556_v2  ;;  %7186 = vst [vmem:[#allocation14_spill] sm:$0xff] %v5989_v57  ;;  %v2630_v33 = vrot.slane %v5989_v57, 2 }
 0x3ac   : > { %4992 = vrot.lane.b32.xlu0 %v4966_v48, %s5443_s27  ;;  %v2623_v48 = vrot.slane %v2465_v38, 2  ;;  %v2292_v38 = vsel %vm466_vm1, %v4399_v17, %v4755_v25 }
 0x3ad   : > { %5012 = vrot.lane.b32.xlu1 %v4971_v10, %s5445_s14  ;;  %v5961_v10 = vpop.permute.xlu1 %4767  ;;  %v2367_v49 = vrot.slane %v2292_v38, 7 }
 0x3ae   : > { %v2624_v62 = vsel %vm2589_vm9, %v2621_v52, %v2623_v48  ;;  %v5977_v52 = vpop.permute.xlu0 %4787  ;;  %v2298_v48 = vsel %vm466_vm1, %v4411_v16, %v4760_v40 }
 0x3af   : > { %v5046_v1 = vpack.i.bf16 %v2624_v62, %v2622_v59  ;;  %v2467_v11 = vsel %vm2342_vm7, %v2367_v49, 0.0  ;;  %v5986_v56 = vsel %vm2342_vm7, %v2366_v51, %v2367_v49  ;;  %v2376_v59 = vrot.slane %v2298_v48, 7  ;;  %v4443_v49 = vld [vmem:[%s5714_s12 + $0x48] sm:$0xff]  }
 0x3b0   : > { %5017 = vrot.lane.b32.xlu0 %v5016_v47, %s5431_s10  ;;  %7185 = vst [vmem:[#allocation13_spill] sm:$0xff] %v5986_v56  ;;  %v2552_v63 = vrot.slane %v2467_v11, 1  ;;  %v5101_v2 = vpack.i.bf16 %v5986_v56, %v5989_v57  ;;  %v2550_v12 = vrot.slane %v5986_v56, 1  ;;  %v2633_v8 = vrot.slane %v2467_v11, 2  ;;  %v4446_v11 = vld [vmem:[%s5714_s12 + $0x60] sm:$0xff]  }
 0x3b1   : > { %5032 = vrot.lane.b32.xlu1 %v5031_v50, %s5431_s10  ;;  %v2470_v13 = vsel %vm2342_vm7, %v2376_v59, 0.0  ;;  %v2631_v29 = vrot.slane %v5986_v56, 2  ;;  %v4418_v5 = vunpack.c.l.bf16 %v4446_v11 }
 0x3b2   : > { %v2553_v25 = vsel %vm2508_vm8, %v2550_v12, %v2552_v63  ;;  %v2567_v38 = vrot.slane %v2470_v13, 1  ;;  %v2648_v51 = vrot.slane %v2470_v13, 2  ;;  %v4406_v13 = vunpack.c.l.bf16 %v4443_v49 }
 0x3b3   : > { %v2632_v40 = vsel %vm2589_vm9, %v2630_v33, %v2631_v29 }
 0x3b4   : > { %5022 = vrot.lane.b32.xlu0 %v5016_v47, %s5441_s28  ;;  %v5972_v47 = vpop.permute.xlu1 %4777 }
 0x3b5   : > { %5037 = vrot.lane.b32.xlu1 %v5036_v58, %s5428_s7 }
 0x3b8   : > { %5027 = vrot.lane.b32.xlu0 %v5031_v50, %s5441_s28  ;;  %v4759_v50 = vunpack.i.l.bf16 %v4758_v0 }
 0x3b9   : > { %5047 = vrot.lane.b32.xlu1 %v5046_v1, %s5429_s8 }
 0x3ba   : > { %v2297_v53 = vsel %vm466_vm1, %v4410_v45, %v4759_v50  ;;  %v2634_v50 = vsel %vm2589_vm9, %v2631_v29, %v2633_v8  ;;  %v4765_v8 = vunpack.i.h.bf16 %v5944_v55 }
 0x3bc   : > { %5042 = vrot.lane.b32.xlu0 %v5041_v9, %s5428_s7 }
 0x3bd   : > { %5057 = vrot.lane.b32.xlu1 %v5036_v58, %s5444_s13 }
 0x3c0   : > { %5052 = vrot.lane.b32.xlu0 %v5051_v35, %s5429_s8 }
 0x3c1   : > { %5062 = vrot.lane.b32.xlu1 %v5046_v1, %s5445_s14 }
 0x3c4   : > { %5067 = vrot.lane.b32.xlu0 %v5036_v58, %s5442_s29  ;;  %v2375_v58 = vrot.slane %v2297_v53, 7 }
 0x3c5   : > { %5087 = vrot.lane.b32.xlu1 %v5041_v9, %s5444_s13 }
 0x3c6   : > { %v5982_v54 = vpop.permute.xlu1 %4792  ;;  %v6000_v3 = vsel %vm2342_vm7, %v2375_v58, %v2376_v59  ;;  %v6003_v4 = vsel %vm2342_vm7, 0.0, %v2375_v58  ;;  %v6042_v58 = vpack.i.bf16 %v2634_v50, %v2632_v40  ;;  %v4695_v50 = vunpack.i.h.bf16 %v5709_v60 }
 0x3c7   : > { %7187 = vst [vmem:[#allocation15_spill] sm:$0xff] %v6000_v3  ;;  %7188 = vst [vmem:[#allocation16_spill] sm:$0xff] %v6003_v4  ;;  %v5111_v17 = vpack.i.bf16 %v6000_v3, %v6003_v4  ;;  %v2565_v16 = vrot.slane %v6000_v3, 1  ;;  %v2645_v53 = vrot.slane %v6003_v4, 2 }
 0x3c8   : > { %5072 = vrot.lane.b32.xlu0 %v5046_v1, %s5443_s27  ;;  %v2549_v1 = vrot.slane %v5989_v57, 1 }
 0x3c9   : > { %5092 = vrot.lane.b32.xlu1 %v5051_v35, %s5445_s14 }
 0x3ca   : > { %v5993_v62 = vpop.permute.xlu0 %4807 }
 0x3cb   : > { %v5995_v0 = vpop.permute.xlu1 %4797  ;;  %v4809_v44 = vunpack.i.l.bf16 %v5993_v62 }
 0x3cc   : > { %5077 = vrot.lane.b32.xlu0 %v5041_v9, %s5442_s29  ;;  %v2551_v9 = vsel %vm2508_vm8, %v2549_v1, %v2550_v12  ;;  %v2646_v1 = vrot.slane %v6000_v3, 2  ;;  %v4407_v12 = vunpack.c.h.bf16 %v4443_v49  ;;  %v4694_v49 = vunpack.i.l.bf16 %v5709_v60 }
 0x3cd   : > { %5102 = vrot.lane.b32.xlu1 %v5101_v2, %s5441_s28  ;;  %v6026_v36 = vpack.i.bf16 %v2553_v25, %v2551_v9  ;;  %v4764_v9 = vunpack.i.l.bf16 %v5944_v55  ;;  %v4419_v25 = vunpack.c.h.bf16 %v4446_v11  ;;  %v4700_v55 = vunpack.i.h.bf16 %v5716_v61 }
 0x3ce   : > { %v6009_v6 = vpop.permute.xlu0 %4812  ;;  %v2649_v40 = vsel %vm2589_vm9, %v2646_v1, %v2648_v51  ;;  %v4774_v11 = vunpack.i.l.bf16 %v5957_v7 }
 0x3cf   : > { %v6012_v14 = vpop.permute.xlu1 %4802 }
 0x3d0   : > { %5082 = vrot.lane.b32.xlu0 %v5051_v35, %s5443_s27  ;;  %v2564_v35 = vrot.slane %v6003_v4, 1  ;;  %v4779_v4 = vunpack.i.l.bf16 %v5972_v47 }
 0x3d1   : > { %5112 = vrot.lane.b32.xlu1 %v5111_v17, %s5431_s10 }
 0x3d2   : > { %v6022_v32 = vpop.permute.xlu0 %4817  ;;  %v2566_v63 = vsel %vm2508_vm8, %v2564_v35, %v2565_v16  ;;  %v4445_v35 = vld [vmem:[%s5714_s12 + $0x58] sm:$0xff]  }
 0x3d3   : > { %v6024_v45 = vpop.permute.xlu1 %4837  ;;  %v4415_v51 = vunpack.c.h.bf16 %v4445_v35 }
 0x3d4   : > { %5097 = vrot.lane.b32.xlu0 %v5101_v2, %s5431_s10  ;;  %v2568_v2 = vsel %vm2508_vm8, %v2565_v16, %v2567_v38  ;;  %v4770_v38 = vunpack.i.h.bf16 %v5961_v10 }
 0x3d5   : > { %5117 = vrot.lane.b32.xlu1 %v6026_v36, %s5428_s7  ;;  %v6054_v29 = vpack.i.bf16 %v2568_v2, %v2566_v63  ;;  %v4699_v63 = vunpack.i.l.bf16 %v5716_v61  ;;  %v2296_v2 = vsel %vm466_vm1, %v4407_v12, %v4765_v8  ;;  %v4769_v61 = vunpack.i.l.bf16 %v5961_v10  ;;  %v4448_v10 = vld [vmem:[%s5714_s12 + $0x70] sm:$0xff]  }
 0x3d6   : > { %v6036_v48 = vpop.permute.xlu0 %4822  ;;  %v2302_v57 = vsel %vm466_vm1, %v4419_v25, %v4770_v38  ;;  %v3451_v8 = vsel %vm468_vm0, %v5558_v20, %v4695_v50  ;;  %v6089_v25 = vld [vmem:[%s5714_s12 + $0x68] sm:$0xff]  }
 0x3d7   : > { %v6040_v59 = vpop.permute.xlu1 %4842  ;;  %v2382_v38 = vrot.slane %v2302_v57, 7  ;;  %v4426_v57 = vunpack.c.l.bf16 %v4448_v10 }
 0x3d8   : > { %5107 = vrot.lane.b32.xlu0 %v5111_v17, %s5441_s28  ;;  %v2647_v17 = vsel %vm2589_vm9, %v2645_v53, %v2646_v1  ;;  %v2295_v53 = vsel %vm466_vm1, %v4406_v13, %v4764_v9  ;;  %v4775_v1 = vunpack.i.h.bf16 %v5957_v7  ;;  %v3450_v13 = vsel %vm468_vm0, %v5562_v21, %v4694_v49 }
 0x3d9   : > { %5127 = vrot.lane.b32.xlu1 %v6042_v58, %s5429_s8  ;;  %v6075_v28 = vpack.i.bf16 %v2649_v40, %v2647_v17  ;;  %v2373_v9 = vrot.slane %v2296_v2, 7  ;;  %v2372_v56 = vrot.slane %v2295_v53, 7  ;;  %v4414_v17 = vunpack.c.l.bf16 %v4445_v35 }
 0x3da   : > { %v6052_v33 = vpop.permute.xlu0 %4827  ;;  %v6095_v20 = vsel %vm466_vm1, %v4415_v51, %v4775_v1  ;;  %v6100_v40 = vsel %vm472_vm3, %v3450_v13, %v4699_v63  ;;  %v6103_v35 = vsel %vm472_vm3, %v3451_v8, %v4700_v55  ;;  %v2301_v7 = vsel %vm466_vm1, %v4418_v5, %v4769_v61  ;;  %v6114_v51 = vld [vmem:[%s5714_s12 + $0x78] sm:$0xff]  }
 0x3db   : > { %v6058_v16 = vpop.permute.xlu1 %4862  ;;  %v6109_v49 = vsel %vm2342_vm7, %v2373_v9, 0.0  ;;  %v4423_v53 = vunpack.c.h.bf16 %v6089_v25  ;;  %v6119_v55 = vsel %vm2342_vm7, %v2372_v56, %v2373_v9  ;;  %v6123_v63 = vsel %vm466_vm1, %v4414_v17, %v4774_v11 }
 0x3dc   : > { %7189 = vst [vmem:[#allocation17_spill] sm:$0xff] %v6058_v16  ;;  %5122 = vrot.lane.b32.xlu0 %v6054_v29, %s5428_s7  ;;  %7190 = vst [vmem:[#allocation18_spill] sm:$0xff] %v6119_v55  ;;  %v4427_v1 = vunpack.c.h.bf16 %v4448_v10  ;;  %v6128_v61 = vsel %vm2342_vm7, 0.0, %v2372_v56  ;;  %v6131_v8 = vsel %vm2342_vm7, %v2382_v38, 0.0  ;;  %v2381_v13 = vrot.slane %v2301_v7, 7 }
 0x3dd   : > { %5147 = vrot.lane.b32.xlu1 %v6026_v36, %s5442_s29  ;;  %7191 = vst [vmem:[#allocation19_spill] sm:$0xff] %v6128_v61  ;;  %v2562_v9 = vrot.slane %v6109_v49, 1  ;;  %v4785_v2 = vunpack.i.h.bf16 %v5968_v37  ;;  %v2643_v10 = vrot.slane %v6109_v49, 2  ;;  %v4780_v56 = vunpack.i.h.bf16 %v5972_v47 }
 0x3de   : > { %v6073_v60 = vpop.permute.xlu0 %4832  ;;  %v7193_v7 = vrot.slane %v6095_v20, 7  ;;  %v2577_v17 = vrot.slane %v6131_v8, 1  ;;  %v2559_v49 = vrot.slane %v6128_v61, 1  ;;  %v2560_v5 = vrot.slane %v6119_v55, 1 }
 0x3df   : > { %v6079_v12 = vpop.permute.xlu1 %4872  ;;  %v2658_v34 = vrot.slane %v6131_v8, 2  ;;  %v6158_v47 = vsel %vm2342_vm7, %v2381_v13, %v2382_v38  ;;  %v5181_v15 = vpack.i.bf16 %v6119_v55, %v6128_v61  ;;  %v6171_v8 = vsel %vm466_vm1, %v4427_v1, %v4780_v56 }
 0x3e0   : > { %5132 = vrot.lane.b32.xlu0 %v6075_v28, %s5429_s8  ;;  %v6149_v3 = vsel %vm2342_vm7, %v7193_v7, 0.0  ;;  %7194 = vst [vmem:[#allocation21_spill] sm:$0xff] %v6158_v47  ;;  %v6164_v7 = vsel %vm466_vm1, %v4423_v53, %v4785_v2  ;;  %v6174_v38 = vsel %vm466_vm1, %v4426_v57, %v4779_v4  ;;  %v2640_v2 = vrot.slane %v6128_v61, 2 }
 0x3e1   : > { %5152 = vrot.lane.b32.xlu1 %v6042_v58, %s5443_s27  ;;  %v2641_v53 = vrot.slane %v6119_v55, 2  ;;  %v2561_v1 = vsel %vm2508_vm8, %v2559_v49, %v2560_v5  ;;  %v2563_v56 = vsel %vm2508_vm8, %v2560_v5, %v2562_v9  ;;  %v4820_v4 = vunpack.i.h.bf16 %v6022_v32 }
 0x3e2   : > { %v6097_v21 = vpop.permute.xlu0 %4847  ;;  %v4819_v57 = vunpack.i.l.bf16 %v6022_v32  ;;  %v6194_v49 = vpack.i.bf16 %v2563_v56, %v2561_v1  ;;  %v2575_v5 = vrot.slane %v6158_v47, 1  ;;  %v2656_v32 = vrot.slane %v6158_v47, 2 }
 0x3e3   : > { %v6106_v50 = vpop.permute.xlu1 %4877  ;;  %v2642_v31 = vsel %vm2589_vm9, %v2640_v2, %v2641_v53 }
 0x3e4   : > { %5137 = vrot.lane.b32.xlu0 %v6026_v36, %s5444_s13 }
 0x3e5   : > { %5167 = vrot.lane.b32.xlu1 %v6054_v29, %s5444_s13 }
 0x3e6   : > { %v6133_v36 = vpop.permute.xlu0 %4852 }
 0x3e7   : > { %7192 = vst [vmem:[#allocation20_spill] sm:$0xff] %v6133_v36  ;;  %v6138_v11 = vpop.permute.xlu1 %4887 }
 0x3e8   : > { %5142 = vrot.lane.b32.xlu0 %v6042_v58, %s5445_s14  ;;  %v6161_v58 = vsel %vm2342_vm7, 0.0, %v2381_v13  ;;  %v4810_v13 = vunpack.i.h.bf16 %v5993_v62 }
 0x3e9   : > { %5172 = vrot.lane.b32.xlu1 %v6075_v28, %s5445_s14  ;;  %7195 = vst [vmem:[#allocation22_spill] sm:$0xff] %v6161_v58  ;;  %v5191_v39 = vpack.i.bf16 %v6158_v47, %v6161_v58  ;;  %v2574_v62 = vrot.slane %v6161_v58, 1  ;;  %v2655_v9 = vrot.slane %v6161_v58, 2 }
 0x3ea   : > { %v4858_v41 = vpop.permute.xlu0 %4857  ;;  %v3453_v16 = vsel %vm468_vm0, %v5727_v22, %v4810_v13 }
 0x3eb   : > { %v4898_v42 = vpop.permute.xlu1 %4897  ;;  %v4860_v61 = vunpack.i.h.bf16 %v4858_v41  ;;  %v4859_v55 = vunpack.i.l.bf16 %v4858_v41  ;;  %v3452_v41 = vsel %vm468_vm0, %v5730_v23, %v4809_v44  ;;  %v3485_v56 = vsel %vm472_vm3, %v3453_v16, %v4820_v4 }
 0x3ec   : > { %5157 = vrot.lane.b32.xlu0 %v6054_v29, %s5442_s29  ;;  %v3484_v1 = vsel %vm472_vm3, %v3452_v41, %v4819_v57  ;;  %v4900_v30 = vunpack.i.h.bf16 %v4898_v42  ;;  %v4899_v58 = vunpack.i.l.bf16 %v4898_v42  ;;  %v2578_v16 = vsel %vm2508_vm8, %v2575_v5, %v2577_v17 }
 0x3ed   : > { %5182 = vrot.lane.b32.xlu1 %v5181_v15, %s5441_s28  ;;  %v3516_v47 = vsel %vm476_vm5, %v3484_v1, %v4859_v55  ;;  %v3517_v22 = vsel %vm476_vm5, %v3485_v56, %v4860_v61  ;;  %v2657_v2 = vsel %vm2589_vm9, %v2655_v9, %v2656_v32  ;;  %v4835_v9 = vunpack.i.h.bf16 %v6073_v60 }
 0x3ee   : > { %v6187_v29 = vpop.permute.xlu0 %4867  ;;  %v3549_v55 = vsel %vm3546_vm11, %v3516_v47, %v4899_v58  ;;  %v4794_v47 = vunpack.i.l.bf16 %v5982_v54  ;;  %v4804_v58 = vunpack.i.l.bf16 %v6012_v14 }
 0x3ef   : > { %v4903_v18 = vpop.permute.xlu1 %4902  ;;  %v4869_v1 = vunpack.i.l.bf16 %v6187_v29 }
 0x3f0   : > { %5162 = vrot.lane.b32.xlu0 %v6075_v28, %s5443_s27  ;;  %v2644_v28 = vsel %vm2589_vm9, %v2641_v53, %v2643_v10  ;;  %v4905_v13 = vunpack.i.h.bf16 %v4903_v18  ;;  %v4904_v23 = vunpack.i.l.bf16 %v4903_v18  ;;  %v2576_v10 = vsel %vm2508_vm8, %v2574_v62, %v2575_v5 }
 0x3f1   : > { %5192 = vrot.lane.b32.xlu1 %v5191_v39, %s5431_s10  ;;  %v6219_v42 = vpack.i.bf16 %v2644_v28, %v2642_v31  ;;  %v3550_v18 = vsel %vm3546_vm11, %v3517_v22, %v4900_v30  ;;  %v6231_v57 = vpack.i.bf16 %v2578_v16, %v2576_v10  ;;  %v4795_v31 = vunpack.i.h.bf16 %v5982_v54 }
 0x3f2   : > { %v6208_v36 = vpop.permute.xlu0 %4882  ;;  %v3582_v53 = vsel %vm3579_vm12, %v3549_v55, %v4904_v23  ;;  %v3583_v17 = vsel %vm3579_vm12, %v3550_v18, %v4905_v13  ;;  %v4805_v30 = vunpack.i.h.bf16 %v6012_v14  ;;  %v4829_v62 = vunpack.i.l.bf16 %v6052_v33 }
 0x3f3   : > { %v6212_v44 = vpop.permute.xlu1 %4917  ;;  %v3615_v54 = vsel %vm3612_vm13, %v3582_v53, %v4804_v58  ;;  %v4839_v28 = vunpack.i.l.bf16 %v6024_v45  ;;  %v3514_v22 = vsel %vm476_vm5, %v6100_v40, %v4794_v47  ;;  %v4845_v40 = vunpack.i.h.bf16 %v6040_v59 }
 0x3f4   : > { %5177 = vrot.lane.b32.xlu0 %v5181_v15, %s5431_s10  ;;  %v2659_v15 = vsel %vm2589_vm9, %v2656_v32, %v2658_v34  ;;  %v4830_v34 = vunpack.i.h.bf16 %v6052_v33  ;;  %v4834_v32 = vunpack.i.l.bf16 %v6073_v60  ;;  %v3616_v41 = vsel %vm3612_vm13, %v3583_v17, %v4805_v30 }
 0x3f5   : > { %5197 = vrot.lane.b32.xlu1 %v6194_v49, %s5428_s7  ;;  %v6242_v5 = vpack.i.bf16 %v2659_v15, %v2657_v2  ;;  %v4870_v33 = vunpack.i.h.bf16 %v6187_v29  ;;  %v3515_v60 = vsel %vm476_vm5, %v6103_v35, %v4795_v31  ;;  %v3547_v10 = vsel %vm3546_vm11, %v3514_v22, %v4829_v62 }
 0x3f6   : > { %v6223_v61 = vpop.permute.xlu0 %4892  ;;  %v3648_v16 = vsel %vm3645_vm14, %v3615_v54, %v4839_v28  ;;  %v4844_v35 = vunpack.i.l.bf16 %v6040_v59  ;;  %v3580_v55 = vsel %vm3579_vm12, %v3547_v10, %v4834_v32  ;;  %v2388_v62 = vrot.slane %v6171_v8, 7 }
 0x3f7   : > { %v6229_v4 = vpop.permute.xlu1 %4922  ;;  %v3613_v15 = vsel %vm3612_vm13, %v3580_v55, %v4869_v1  ;;  %v2385_v54 = vrot.slane %v6164_v7, 7  ;;  %v7196_v28 = vunpack.i.l.bf16 %v5968_v37 }
 0x3f8   : > { %5187 = vrot.lane.b32.xlu0 %v5191_v39, %s5441_s28  ;;  %v4840_v39 = vunpack.i.h.bf16 %v6024_v45  ;;  %v3548_v45 = vsel %vm3546_vm11, %v3515_v60, %v4830_v34  ;;  %v3681_v59 = vsel %vm3678_vm15, %v3648_v16, %v4844_v35  ;;  %v2572_v60 = vrot.slane %v6149_v3, 1 }
 0x3f9   : > { %5207 = vrot.lane.b32.xlu1 %v6219_v42, %s5429_s8  ;;  %v3581_v18 = vsel %vm3579_vm12, %v3548_v45, %v4835_v9  ;;  %v2653_v45 = vrot.slane %v6149_v3, 2  ;;  %v7201_v16 = vunpack.i.h.bf16 %v5977_v52  ;;  %v6333_v3 = vsel %vm2342_vm7, %v2385_v54, 0.0 }
 0x3fa   : > { %v4908_v14 = vpop.permute.xlu0 %4907  ;;  %v3649_v29 = vsel %vm3645_vm14, %v3616_v41, %v4840_v39  ;;  %v3614_v53 = vsel %vm3612_vm13, %v3581_v18, %v4870_v33  ;;  %v2387_v41 = vrot.slane %v6174_v38, 7  ;;  %v7197_v33 = vunpack.c.l.bf16 %v6089_v25 }
 0x3fb   : > { %v6252_v56 = vpop.permute.xlu1 %4942  ;;  %v4910_v13 = vunpack.i.h.bf16 %v4908_v14  ;;  %v4909_v23 = vunpack.i.l.bf16 %v4908_v14  ;;  %v3682_v34 = vsel %vm3678_vm15, %v3649_v29, %v4845_v40  ;;  %v4430_v25 = vunpack.c.l.bf16 %v6114_v51 }
 0x3fc   : > { %5202 = vrot.lane.b32.xlu0 %v6231_v57, %s5428_s7  ;;  %v6294_v8 = vsel %vm466_vm1, %v7197_v33, %v7196_v28  ;;  %v3712_v22 = vpack.c.bf16 %v3682_v34, %v3681_v59  ;;  %v7202_v29 = vunpack.c.h.bf16 %v6114_v51  ;;  %v4789_v40 = vunpack.i.l.bf16 %v5977_v52 }
 0x3fd   : > { %5227 = vrot.lane.b32.xlu1 %v6194_v49, %s5442_s29  ;;  %v3646_v30 = vsel %vm3645_vm14, %v3613_v15, %v4909_v23  ;;  %v3647_v58 = vsel %vm3645_vm14, %v3614_v53, %v4910_v13  ;;  %v7198_v13 = vrot.slane %v6095_v20, 7  ;;  %v7199_v23 = vrot.slane %v6123_v63, 7 }
 0x3fe   : > { %v4913_v2 = vpop.permute.xlu0 %4912  ;;  %v6317_v20 = vsel %vm2342_vm7, %v2388_v62, 0.0  ;;  %v6324_v63 = vsel %vm466_vm1, %v7202_v29, %v7201_v16  ;;  %v6337_v35 = vsel %vm2342_vm7, %v2387_v41, %v2388_v62  ;;  %v6342_v55 = vsel %vm2342_vm7, 0.0, %v2387_v41 }
 0x3ff   : > { %v4915_v17 = vunpack.i.h.bf16 %v4913_v2  ;;  %v4914_v31 = vunpack.i.l.bf16 %v4913_v2  ;;  %v6272_v47 = vpop.permute.xlu1 %4952  ;;  %v6304_v38 = vsel %vm2342_vm7, %v7199_v23, %v7198_v13  ;;  %v7200_v10 = vmov %v7199_v23 }
 0x400   : > { %5212 = vrot.lane.b32.xlu0 %v6242_v5, %s5429_s8  ;;  %v6309_v37 = vsel %vm2342_vm7, 0.0, %v7200_v10  ;;  %v2570_v2 = vrot.slane %v6304_v38, 1  ;;  %v2587_v15 = vrot.slane %v6317_v20, 1  ;;  %v6364_v62 = vpack.i.bf16 %v6337_v35, %v6342_v55 }
 0x401   : > { %v3679_v9 = vsel %vm3678_vm15, %v3646_v30, %v4914_v31  ;;  %v3680_v32 = vsel %vm3678_vm15, %v3647_v58, %v4915_v17  ;;  %5232 = vrot.lane.b32.xlu1 %v6219_v42, %s5443_s27  ;;  %v2569_v18 = vrot.slane %v6309_v37, 1  ;;  %v2650_v17 = vrot.slane %v6309_v37, 2 }
 0x402   : > { %v3711_v14 = vpack.c.bf16 %v3680_v32, %v3679_v9  ;;  %v6287_v39 = vpop.permute.xlu0 %4927  ;;  %v2651_v31 = vrot.slane %v6304_v38, 2  ;;  %v2668_v30 = vrot.slane %v6317_v20, 2  ;;  %v6356_v58 = vsel %vm466_vm1, %v4430_v25, %v4789_v40 }
 0x403   : > { %v6296_v1 = vpop.permute.xlu1 %4957  ;;  %v5261_v59 = vpack.i.bf16 %v6304_v38, %v6309_v37  ;;  %v2571_v9 = vsel %vm2508_vm8, %v2569_v18, %v2570_v2  ;;  %v2573_v32 = vsel %vm2508_vm8, %v2570_v2, %v2572_v60  ;;  %v2584_v41 = vrot.slane %v6342_v55, 1 }
 0x404   : > { %5217 = vrot.lane.b32.xlu0 %v6194_v49, %s5444_s13  ;;  %4617 = vmatprep.mubr.msk.bf16.mxu0 %vm3763_vm2, %v3711_v14  ;;  %v2384_v49 = vrot.slane %v6294_v8, 7  ;;  %v2585_v14 = vrot.slane %v6337_v35, 1  ;;  %v4815_v28 = vunpack.i.h.bf16 %v6009_v6  ;;  %v4814_v33 = vunpack.i.l.bf16 %v6009_v6 }
 0x405   : > { %5247 = vrot.lane.b32.xlu1 %v6231_v57, %s5444_s13  ;;  %4618 = vmatmul.mubr.msk.bf16.vlgmr.msra.gmra.mrb[20].mxu0 %vm3763_vm2, %v3712_v22  ;;  %v2652_v22 = vsel %vm2589_vm9, %v2650_v17, %v2651_v31  ;;  %v2654_v13 = vsel %vm2589_vm9, %v2651_v31, %v2653_v45  ;;  %v4825_v23 = vunpack.i.h.bf16 %v6036_v48  ;;  %v4824_v10 = vunpack.i.l.bf16 %v6036_v48 }
 0x406   : > { %v6339_v51 = vpop.permute.xlu0 %4932  ;;  %v4880_v60 = vunpack.i.h.bf16 %v6106_v50  ;;  %v4879_v25 = vunpack.i.l.bf16 %v6106_v50  ;;  %v4890_v16 = vunpack.i.h.bf16 %v6138_v11  ;;  %v4889_v6 = vunpack.i.l.bf16 %v6138_v11 }
 0x407   : > { %v6344_v52 = vpop.permute.xlu1 %4967  ;;  %v2666_v45 = vrot.slane %v6337_v35, 2  ;;  %v6387_v48 = vpack.i.bf16 %v2573_v32, %v2571_v9  ;;  %v2586_v17 = vsel %vm2508_vm8, %v2584_v41, %v2585_v14  ;;  %v3457_v50 = vsel %vm468_vm0, %v5747_v43, %v4815_v28 }
 0x408   : > { %5222 = vrot.lane.b32.xlu0 %v6219_v42, %s5445_s14  ;;  %v3456_v31 = vsel %vm468_vm0, %v5751_v46, %v4814_v33  ;;  %v6396_v11 = vpack.i.bf16 %v2654_v13, %v2652_v22  ;;  %v2588_v53 = vsel %vm2508_vm8, %v2585_v14, %v2587_v15  ;;  %v3489_v9 = vsel %vm472_vm3, %v3457_v50, %v4825_v23 }
 0x409   : > { %5252 = vrot.lane.b32.xlu1 %v6242_v5, %s5445_s14  ;;  %v3455_v32 = vsel %vm468_vm0, %v5783_v19, %v4880_v60  ;;  %v3454_v43 = vsel %vm468_vm0, %v5786_v24, %v4879_v25  ;;  %v4800_v24 = vunpack.i.h.bf16 %v5995_v0  ;;  %v4799_v23 = vunpack.i.l.bf16 %v5995_v0 }
 0x40a   : > { %v4938_v34 = vpop.permute.xlu0 %4937  ;;  %v3486_v46 = vsel %vm472_vm3, %v3454_v43, %v4889_v6  ;;  %v4875_v25 = vunpack.i.h.bf16 %v6079_v12 }
 0x40b   : > { %v4978_v42 = vpop.permute.xlu1 %4977  ;;  %v4940_v40 = vunpack.i.h.bf16 %v4938_v34  ;;  %v4939_v18 = vunpack.i.l.bf16 %v4938_v34  ;;  %v3488_v34 = vsel %vm472_vm3, %v3456_v31, %v4824_v10  ;;  %v3518_v6 = vsel %vm476_vm5, %v3486_v46, %v4799_v23 }
 0x40c   : > { %5237 = vrot.lane.b32.xlu0 %v6231_v57, %s5442_s29  ;;  %v2665_v57 = vrot.slane %v6342_v55, 2  ;;  %v4980_v41 = vunpack.i.h.bf16 %v4978_v42  ;;  %v4979_v28 = vunpack.i.l.bf16 %v4978_v42  ;;  %v4874_v42 = vunpack.i.l.bf16 %v6079_v12 }
 0x40d   : > { %5262 = vrot.lane.b32.xlu1 %v5261_v59, %s5441_s28  ;;  %v3520_v14 = vsel %vm476_vm5, %v3488_v34, %v4939_v18  ;;  %v3521_v33 = vsel %vm476_vm5, %v3489_v9, %v4940_v40  ;;  %v4850_v9 = vunpack.i.h.bf16 %v6097_v21 }
 0x40e   : > { %v6383_v29 = vpop.permute.xlu0 %4947  ;;  %v3553_v18 = vsel %vm3546_vm11, %v3520_v14, %v4979_v28  ;;  %v3554_v0 = vsel %vm3546_vm11, %v3521_v33, %v4980_v41  ;;  %v6445_v41 = vpack.i.bf16 %v2588_v53, %v2586_v17  ;;  %v4920_v14 = vunpack.i.h.bf16 %v6212_v44 }
 0x40f   : > { %v4983_v2 = vpop.permute.xlu1 %4982  ;;  %v4919_v33 = vunpack.i.l.bf16 %v6212_v44  ;;  %v4950_v53 = vunpack.i.h.bf16 %v6383_v29  ;;  %v4949_v17 = vunpack.i.l.bf16 %v6383_v29 }
 0x410   : > { %5242 = vrot.lane.b32.xlu0 %v6242_v5, %s5443_s27  ;;  %v3487_v5 = vsel %vm472_vm3, %v3455_v32, %v4890_v16  ;;  %v4985_v22 = vunpack.i.h.bf16 %v4983_v2  ;;  %v4984_v13 = vunpack.i.l.bf16 %v4983_v2  ;;  %v2667_v16 = vsel %vm2589_vm9, %v2665_v57, %v2666_v45 }
 0x411   : > { %5272 = vrot.lane.b32.xlu1 %v6364_v62, %s5431_s10  ;;  %v3519_v40 = vsel %vm476_vm5, %v3487_v5, %v4800_v24  ;;  %v4849_v57 = vunpack.i.l.bf16 %v6097_v21 }
 0x412   : > { %v4963_v15 = vpop.permute.xlu0 %4962  ;;  %v3587_v50 = vsel %vm3579_vm12, %v3554_v0, %v4985_v22  ;;  %v3552_v21 = vsel %vm3546_vm11, %v3519_v40, %v4850_v9  ;;  %v6494_v9 = vsel %vm2342_vm7, 0.0, %v2384_v49 }
 0x413   : > { %v6411_v19 = vpop.permute.xlu1 %4997  ;;  %v4965_v10 = vunpack.i.h.bf16 %v4963_v15  ;;  %v4964_v60 = vunpack.i.l.bf16 %v4963_v15  ;;  %v3620_v28 = vsel %vm3612_vm13, %v3587_v50, %v4875_v25 }
 0x414   : > { %5257 = vrot.lane.b32.xlu0 %v5261_v59, %s5431_s10  ;;  %v3586_v59 = vsel %vm3579_vm12, %v3553_v18, %v4984_v13  ;;  %v3653_v29 = vsel %vm3645_vm14, %v3620_v28, %v4920_v14  ;;  %v2663_v28 = vrot.slane %v6333_v3, 2 }
 0x415   : > { %5277 = vrot.lane.b32.xlu1 %v6387_v48, %s5428_s7  ;;  %v3465_v32 = vsel %vm468_vm0, %v5852_v26, %v4965_v10  ;;  %v3464_v43 = vsel %vm468_vm0, %v5855_v27, %v4964_v60  ;;  %v2669_v26 = vsel %vm2589_vm9, %v2666_v45, %v2668_v30  ;;  %v3551_v27 = vsel %vm3546_vm11, %v3518_v6, %v4849_v57  ;;  %v7203_v30 = vld [vmem:[#allocation20_spill] sm:$0xff] }
 0x416   : > { %v4973_v2 = vpop.permute.xlu0 %4972  ;;  %v4855_v45 = vunpack.i.h.bf16 %v7203_v30  ;;  %v4854_v22 = vunpack.i.l.bf16 %v7203_v30  ;;  %v6466_v23 = vpack.i.bf16 %v2669_v26, %v2667_v16  ;;  %v4925_v10 = vunpack.i.h.bf16 %v6229_v4 }
 0x417   : > { %v4975_v31 = vunpack.i.h.bf16 %v4973_v2  ;;  %v4974_v12 = vunpack.i.l.bf16 %v4973_v2  ;;  %v6427_v34 = vpop.permute.xlu1 %5002  ;;  %v4924_v60 = vunpack.i.l.bf16 %v6229_v4 }
 0x418   : > { %5267 = vrot.lane.b32.xlu0 %v6364_v62, %s5441_s28  ;;  %v3619_v62 = vsel %vm3612_vm13, %v3586_v59, %v4874_v42  ;;  %v3584_v25 = vsel %vm3579_vm12, %v3551_v27, %v4854_v22  ;;  %v3585_v42 = vsel %vm3579_vm12, %v3552_v21, %v4855_v45  ;;  %v2582_v21 = vrot.slane %v6333_v3, 1 }
 0x419   : > { %v6438_v46 = vsel %vm472_vm3, %v3464_v43, %v4974_v12  ;;  %v6441_v5 = vsel %vm472_vm3, %v3465_v32, %v4975_v31  ;;  %5287 = vrot.lane.b32.xlu1 %v6396_v11, %s5429_s8  ;;  %v3652_v44 = vsel %vm3645_vm14, %v3619_v62, %v4919_v33  ;;  %v3617_v40 = vsel %vm3612_vm13, %v3584_v25, %v4949_v17 }
 0x41a   : > { %v4988_v15 = vpop.permute.xlu0 %4987  ;;  %v3618_v18 = vsel %vm3612_vm13, %v3585_v42, %v4950_v53  ;;  %v3685_v4 = vsel %vm3678_vm15, %v3652_v44, %v4924_v60  ;;  %v3686_v31 = vsel %vm3678_vm15, %v3653_v29, %v4925_v10  ;;  %v6489_v12 = vsel %vm2342_vm7, %v2384_v49, %v2385_v54  ;;  %v7206_v42 = vld [vmem:[#allocation7_spill] sm:$0xff] }
 0x41b   : > { %v6458_v20 = vpop.permute.xlu1 %5007  ;;  %v4990_v13 = vunpack.i.h.bf16 %v4988_v15  ;;  %v4989_v24 = vunpack.i.l.bf16 %v4988_v15  ;;  %v2390_v43 = vrot.slane %v6356_v58, 7  ;;  %v7204_v54 = vrot.slane %v6324_v63, 7 }
 0x41c   : > { %5282 = vrot.lane.b32.xlu0 %v6445_v41, %s5428_s7  ;;  %v3714_v49 = vpack.c.bf16 %v3686_v31, %v3685_v4  ;;  %v2579_v58 = vrot.slane %v6494_v9, 1  ;;  %v2580_v62 = vrot.slane %v6489_v12, 1  ;;  %v2660_v15 = vrot.slane %v6494_v9, 2 }
 0x41d   : > { %5307 = vrot.lane.b32.xlu1 %v6387_v48, %s5442_s29  ;;  %v3650_v59 = vsel %vm3645_vm14, %v3617_v40, %v4989_v24  ;;  %v3651_v50 = vsel %vm3645_vm14, %v3618_v18, %v4990_v13  ;;  %v6506_v27 = vsel %vm2342_vm7, %v7204_v54, 0.0  ;;  %v2661_v14 = vrot.slane %v6489_v12, 2  ;;  %v7207_v40 = vld [vmem:[#allocation8_spill] sm:$0xff] }
 0x41e   : > { %v4993_v6 = vpop.permute.xlu0 %4992  ;;  %v2675_v33 = vrot.slane %v6506_v27, 1  ;;  %v4960_v17 = vunpack.i.h.bf16 %v6296_v1  ;;  %v4959_v3 = vunpack.i.l.bf16 %v6296_v1  ;;  %v5341_v45 = vpack.i.bf16 %v6489_v12, %v6494_v9 }
 0x41f   : > { %v4995_v0 = vunpack.i.h.bf16 %v4993_v6  ;;  %v4994_v16 = vunpack.i.l.bf16 %v4993_v6  ;;  %v6476_v2 = vpop.permute.xlu1 %5012  ;;  %v4970_v22 = vunpack.i.h.bf16 %v6344_v52  ;;  %v4969_v13 = vunpack.i.l.bf16 %v6344_v52 }
 0x420   : > { %5292 = vrot.lane.b32.xlu0 %v6466_v23, %s5429_s8  ;;  %v2581_v24 = vsel %vm2508_vm8, %v2579_v58, %v2580_v62  ;;  %v2583_v44 = vsel %vm2508_vm8, %v2580_v62, %v2582_v21  ;;  %v2662_v1 = vsel %vm2589_vm9, %v2660_v15, %v2661_v14  ;;  %v2664_v29 = vsel %vm2589_vm9, %v2661_v14, %v2663_v28 }
 0x421   : > { %v3683_v57 = vsel %vm3678_vm15, %v3650_v59, %v4994_v16  ;;  %v3684_v32 = vsel %vm3678_vm15, %v3651_v50, %v4995_v0  ;;  %5312 = vrot.lane.b32.xlu1 %v6396_v11, %s5443_s27  ;;  %v4885_v10 = vunpack.i.h.bf16 %v6208_v36  ;;  %v4884_v60 = vunpack.i.l.bf16 %v6208_v36  ;;  %v7208_v50 = vld [vmem:[#allocation17_spill] sm:$0xff] }
 0x422   : > { %v3713_v7 = vpack.c.bf16 %v3684_v32, %v3683_v57  ;;  %v6501_v26 = vpop.permute.xlu0 %5017  ;;  %v7205_v52 = vmov %v7204_v54  ;;  %v3459_v6 = vsel %vm468_vm0, %v7206_v42, %v4960_v17  ;;  %v3458_v18 = vsel %vm468_vm0, %v7207_v40, %v4959_v3  ;;  %v7210_v54 = vld [vmem:[#allocation6_spill] sm:$0xff]  ;;  %v7211_v40 = vld [vmem:[#allocation11_spill] sm:$0xff] }
 0x423   : > { %v6508_v8 = vpop.permute.xlu1 %5032  ;;  %v5346_v16 = vpack.i.bf16 %v2583_v44, %v2581_v24  ;;  %v3490_v59 = vsel %vm472_vm3, %v3458_v18, %v4969_v13  ;;  %v3491_v36 = vsel %vm472_vm3, %v3459_v6, %v4970_v22  ;;  %v6563_v63 = vpack.i.bf16 %v2664_v29, %v2662_v1 }
 0x424   : > { %5297 = vrot.lane.b32.xlu0 %v6387_v48, %s5444_s13  ;;  %4621 = vmatprep.mubr.msk.bf16.mxu0 %vm3763_vm2, %v3713_v7  ;;  %v6524_v48 = vsel %vm2342_vm7, 0.0, %v2390_v43  ;;  %v4865_v4 = vunpack.i.h.bf16 %v7208_v50  ;;  %v4864_v31 = vunpack.i.l.bf16 %v7208_v50  ;;  %v4895_v57 = vunpack.i.h.bf16 %v6223_v61 }
 0x425   : > { %5327 = vrot.lane.b32.xlu1 %v6445_v41, %s5444_s13  ;;  %4622 = vmatmul.mubr.msk.bf16.gmra.mrb[24].mxu0 %vm3763_vm2, %v3714_v49  ;;  %v4894_v32 = vunpack.i.l.bf16 %v6223_v61  ;;  %v3460_v49 = vsel %vm468_vm0, %v7210_v54, %v4884_v60  ;;  %v5020_v62 = vunpack.i.h.bf16 %v6501_v26  ;;  %v5019_v28 = vunpack.i.l.bf16 %v6501_v26 }
 0x426   : > { %v6526_v53 = vpop.permute.xlu0 %5022  ;;  %v3523_v58 = vsel %vm476_vm5, %v3491_v36, %v4865_v4  ;;  %v4930_v61 = vunpack.i.h.bf16 %v6287_v39  ;;  %v4929_v14 = vunpack.i.l.bf16 %v6287_v39  ;;  %v4955_v26 = vunpack.i.h.bf16 %v6272_v47 }
 0x427   : > { %v6530_v30 = vpop.permute.xlu1 %5037  ;;  %v3492_v22 = vsel %vm472_vm3, %v3460_v49, %v4894_v32  ;;  %v4954_v1 = vunpack.i.l.bf16 %v6272_v47 }
 0x428   : > { %5302 = vrot.lane.b32.xlu0 %v6396_v11, %s5445_s14  ;;  %v6551_v11 = vsel %vm2342_vm7, %v2390_v43, %v7205_v52  ;;  %v7209_v43 = vld [vmem:[#allocation5_spill] sm:$0xff]  ;;  %v3556_v39 = vsel %vm3546_vm11, %v3523_v58, %v4930_v61  ;;  %v3524_v60 = vsel %vm476_vm5, %v3492_v22, %v5019_v28  ;;  %v4934_v61 = vunpack.i.l.bf16 %v6339_v51 }
 0x429   : > { %5332 = vrot.lane.b32.xlu1 %v6466_v23, %s5445_s14  ;;  %v3461_v7 = vsel %vm468_vm0, %v7209_v43, %v4885_v10  ;;  %v5000_v43 = vunpack.i.h.bf16 %v6411_v19  ;;  %v2673_v22 = vrot.slane %v6551_v11, 1 }
 0x42a   : > { %v6546_v25 = vpop.permute.xlu0 %5027  ;;  %v3493_v13 = vsel %vm472_vm3, %v3461_v7, %v4895_v57  ;;  %v4999_v7 = vunpack.i.l.bf16 %v6411_v19 }
 0x42b   : > { %v6557_v0 = vpop.permute.xlu1 %5047 }
 0x42c   : > { %5317 = vrot.lane.b32.xlu0 %v6445_v41, %s5442_s29  ;;  %v3522_v41 = vsel %vm476_vm5, %v3490_v59, %v4864_v31  ;;  %v7212_v59 = vld [vmem:[#allocation12_spill] sm:$0xff] }
 0x42d   : > { %5342 = vrot.lane.b32.xlu1 %v5341_v45, %s5441_s28  ;;  %v3555_v29 = vsel %vm3546_vm11, %v3522_v41, %v4929_v14  ;;  %v5024_v41 = vunpack.i.l.bf16 %v6526_v53 }
 0x42e   : > { %v5043_v21 = vpop.permute.xlu0 %5042 }
 0x42f   : > { %v5058_v15 = vpop.permute.xlu1 %5057  ;;  %v5045_v17 = vunpack.i.h.bf16 %v5043_v21  ;;  %v5044_v3 = vunpack.i.l.bf16 %v5043_v21  ;;  %v5025_v21 = vunpack.i.h.bf16 %v6526_v53 }
 0x430   : > { %5322 = vrot.lane.b32.xlu0 %v6466_v23, %s5443_s27  ;;  %v5060_v24 = vunpack.i.h.bf16 %v5058_v15  ;;  %v5059_v44 = vunpack.i.l.bf16 %v5058_v15  ;;  %v3525_v23 = vsel %vm476_vm5, %v3493_v13, %v5020_v62  ;;  %v4935_v15 = vunpack.i.h.bf16 %v6339_v51 }
 0x431   : > { %5347 = vrot.lane.b32.xlu1 %v5346_v16, %s5428_s7  ;;  %v3469_v18 = vsel %vm468_vm0, %v7211_v40, %v5045_v17  ;;  %v3468_v36 = vsel %vm468_vm0, %v7212_v59, %v5044_v3  ;;  %v2672_v3 = vrot.slane %v6524_v48, 1  ;;  %v5005_v13 = vunpack.i.h.bf16 %v6427_v34  ;;  %s4351_s7 = sshll.u32 %s7227_s22, 8 }
 0x432   : > { %v5053_v10 = vpop.permute.xlu0 %5052  ;;  %v3557_v4 = vsel %vm3546_vm11, %v3524_v60, %v5059_v44  ;;  %v3558_v31 = vsel %vm3546_vm11, %v3525_v23, %v5060_v24  ;;  %v5004_v24 = vunpack.i.l.bf16 %v6427_v34  ;;  %v3588_v51 = vsel %vm3579_vm12, %v3555_v29, %v4934_v61 }
 0x433   : > { %v5055_v52 = vunpack.i.h.bf16 %v5053_v10  ;;  %v5054_v42 = vunpack.i.l.bf16 %v5053_v10  ;;  %v5063_v6 = vpop.permute.xlu1 %5062  ;;  %v3589_v44 = vsel %vm3579_vm12, %v3556_v39, %v4935_v15  ;;  %v2680_v39 = vrot.slane %v6506_v27, 2  ;;  %v7213_v15 = vld [vmem:[#allocation9_spill] sm:$0xff] }
 0x434   : > { %v5065_v50 = vunpack.i.h.bf16 %v5063_v6  ;;  %v5064_v47 = vunpack.i.l.bf16 %v5063_v6  ;;  %5337 = vrot.lane.b32.xlu0 %v5341_v45, %s5431_s10 }
 0x435   : > { %v6599_v57 = vsel %vm472_vm3, %v3468_v36, %v5054_v42  ;;  %v6602_v32 = vsel %vm472_vm3, %v3469_v18, %v5055_v52  ;;  %5352 = vrot.lane.b32.xlu1 %v6563_v63, %s5429_s8  ;;  %v5376_v36 = vpack.i.bf16 %v6551_v11, %v6524_v48 }
 0x436   : > { %v3590_v54 = vsel %vm3579_vm12, %v3557_v4, %v5064_v47  ;;  %v3591_v45 = vsel %vm3579_vm12, %v3558_v31, %v5065_v50  ;;  %v5068_v49 = vpop.permute.xlu0 %5067  ;;  %v2677_v50 = vrot.slane %v6524_v48, 2  ;;  %v2674_v31 = vsel %vm2508_vm8, %v2672_v3, %v2673_v22 }
 0x437   : > { %v3623_v58 = vsel %vm3612_vm13, %v3590_v54, %v4954_v1  ;;  %v3624_v62 = vsel %vm3612_vm13, %v3591_v45, %v4955_v26  ;;  %v6614_v28 = vpop.permute.xlu1 %5087  ;;  %v5070_v19 = vunpack.i.h.bf16 %v5068_v49  ;;  %v5069_v14 = vunpack.i.l.bf16 %v5068_v49 }
 0x438   : > { %5357 = vrot.lane.b32.xlu0 %v5346_v16, %s5444_s13  ;;  %v3656_v17 = vsel %vm3645_vm14, %v3623_v58, %v4999_v7  ;;  %v3657_v53 = vsel %vm3645_vm14, %v3624_v62, %v5000_v43  ;;  %v3621_v1 = vsel %vm3612_vm13, %v3588_v51, %v5024_v41  ;;  %v2676_v43 = vsel %vm2508_vm8, %v2673_v22, %v2675_v33  ;;  %v7215_v51 = vld [vmem:[#allocation2_spill] sm:$0xff] }
 0x439   : > { %5367 = vrot.lane.b32.xlu1 %v5346_v16, %s5442_s29  ;;  %v3622_v16 = vsel %vm3612_vm13, %v3589_v44, %v5025_v21  ;;  %v3654_v52 = vsel %vm3645_vm14, %v3621_v1, %v5069_v14  ;;  %v3689_v34 = vsel %vm3678_vm15, %v3656_v17, %v5004_v24  ;;  %v3690_v29 = vsel %vm3678_vm15, %v3657_v53, %v5005_v13 }
 0x43a   : > { %v5073_v26 = vpop.permute.xlu0 %5072  ;;  %v3655_v42 = vsel %vm3645_vm14, %v3622_v16, %v5070_v19  ;;  %v3716_v4 = vpack.c.bf16 %v3690_v29, %v3689_v34  ;;  %v2678_v7 = vrot.slane %v6551_v11, 2  ;;  %v5386_v48 = vpack.i.bf16 %v2676_v43, %v2674_v31  ;;  %v7214_v19 = vld [vmem:[#allocation10_spill] sm:$0xff] }
 0x43b   : > { %v5075_v10 = vunpack.i.h.bf16 %v5073_v26  ;;  %v5074_v60 = vunpack.i.l.bf16 %v5073_v26  ;;  %v6630_v23 = vpop.permute.xlu1 %5092  ;;  %v5040_v33 = vunpack.i.h.bf16 %v6530_v30  ;;  %v5039_v11 = vunpack.i.l.bf16 %v6530_v30 }
 0x43c   : > { %5362 = vrot.lane.b32.xlu0 %v6563_v63, %s5445_s14  ;;  %v2679_v45 = vsel %vm2589_vm9, %v2677_v50, %v2678_v7  ;;  %v2681_v27 = vsel %vm2589_vm9, %v2678_v7, %v2680_v39  ;;  %v5050_v49 = vunpack.i.h.bf16 %v6557_v0  ;;  %v5049_v21 = vunpack.i.l.bf16 %v6557_v0  ;;  %v7216_v7 = vld [vmem:[#allocation15_spill] sm:$0xff] }
 0x43d   : > { %v3687_v6 = vsel %vm3678_vm15, %v3654_v52, %v5074_v60  ;;  %v3688_v40 = vsel %vm3678_vm15, %v3655_v42, %v5075_v10  ;;  %5372 = vrot.lane.b32.xlu1 %v6563_v63, %s5443_s27  ;;  %v5391_v58 = vpack.i.bf16 %v2681_v27, %v2679_v45  ;;  %v3463_v61 = vsel %vm468_vm0, %v7213_v15, %v5040_v33 }
 0x43e   : > { %v3715_v18 = vpack.c.bf16 %v3688_v40, %v3687_v6  ;;  %v6643_v59 = vpop.permute.xlu0 %5077  ;;  %v3462_v14 = vsel %vm468_vm0, %v7214_v19, %v5039_v11  ;;  %v3495_v17 = vsel %vm472_vm3, %v3463_v61, %v5050_v49  ;;  %v4945_v0 = vunpack.i.h.bf16 %v6252_v56 }
 0x43f   : > { %v5103_v47 = vpop.permute.xlu1 %5102  ;;  %v3494_v30 = vsel %vm472_vm3, %v3462_v14, %v5049_v21  ;;  %v4944_v53 = vunpack.i.l.bf16 %v6252_v56  ;;  %v5010_v44 = vunpack.i.h.bf16 %v6458_v20  ;;  %v5009_v26 = vunpack.i.l.bf16 %v6458_v20 }
 0x440   : > { %5377 = vrot.lane.b32.xlu0 %v5376_v36, %s5431_s10  ;;  %4625 = vmatprep.mubr.msk.bf16.mxu0 %vm3763_vm2, %v3715_v18  ;;  %v3527_v24 = vsel %vm476_vm5, %v3495_v17, %v4945_v0  ;;  %v5105_v16 = vunpack.i.h.bf16 %v5103_v47  ;;  %v5104_v10 = vunpack.i.l.bf16 %v5103_v47  ;;  %v5015_v42 = vunpack.i.h.bf16 %v6476_v2 }
 0x441   : > { %5382 = vrot.lane.b32.xlu1 %v5376_v36, %s5441_s28  ;;  %4626 = vmatmul.mubr.msk.bf16.gmra.mrb[28].mxu0 %vm3763_vm2, %v3716_v4  ;;  %v3526_v13 = vsel %vm476_vm5, %v3494_v30, %v4944_v53  ;;  %v3560_v60 = vsel %vm3546_vm11, %v3527_v24, %v5010_v44  ;;  %v5014_v34 = vunpack.i.l.bf16 %v6476_v2  ;;  %v7217_v2 = vld [vmem:[#allocation16_spill] sm:$0xff]  ;;  %s7008_s28 = scalar_lea.vmem %s7151_s5, %s4351_s7 }
 0x442   : > { %v6657_v63 = vpop.permute.xlu0 %5082  ;;  %v3559_v56 = vsel %vm3546_vm11, %v3526_v13, %v5009_v26  ;;  %v3593_v20 = vsel %vm3579_vm12, %v3560_v60, %v5015_v42  ;;  %v5079_v42 = vunpack.i.l.bf16 %v6643_v59 }
 0x443   : > { %v6659_v54 = vpop.permute.xlu1 %5112  ;;  %v3592_v18 = vsel %vm3579_vm12, %v3559_v56, %v5014_v34  ;;  %v3626_v47 = vsel %vm3612_vm13, %v3593_v20, %v5105_v16  ;;  %v5085_v34 = vunpack.i.h.bf16 %v6657_v63 }
 0x444   : > { %5387 = vrot.lane.b32.xlu0 %v5386_v48, %s5444_s13  ;;  %v3625_v50 = vsel %vm3612_vm13, %v3592_v18, %v5104_v10  ;;  %v5029_v10 = vunpack.i.l.bf16 %v6546_v25 }
 0x445   : > { %5397 = vrot.lane.b32.xlu1 %v5386_v48, %s5442_s29  ;;  %s4291_s29 = sshll.u32 %s7227_s22, 1 }
 0x446   : > { %v5098_v41 = vpop.permute.xlu0 %5097  ;;  %s282_s11 = scalar_lea.vmem %s7152_s6, %s4291_s29 }
 0x447   : > { %v6669_v62 = vpop.permute.xlu1 %5117  ;;  %v5100_v14 = vunpack.i.h.bf16 %v5098_v41  ;;  %v5099_v30 = vunpack.i.l.bf16 %v5098_v41  ;;  %v5030_v41 = vunpack.i.h.bf16 %v6546_v25 }
 0x448   : > { %5392 = vrot.lane.b32.xlu0 %v5391_v58, %s5445_s14 }
 0x449   : > { %5402 = vrot.lane.b32.xlu1 %v5391_v58, %s5443_s27  ;;  %v3529_v44 = vsel %vm476_vm5, %v6441_v5, %v5100_v14 }
 0x44a   : > { %v6681_v3 = vpop.permute.xlu0 %5107 }
 0x44b   : > { %v6683_v22 = vpop.permute.xlu1 %5127 }
 0x44c   : > { %5407 = vrot.lane.b32.xlu0 %v7215_v51, %s5443_s27  ;;  %v3528_v51 = vsel %vm476_vm5, %v6438_v46, %v5099_v30 }
 0x44e   : > { %v5123_v1 = vpop.permute.xlu0 %5122 }
 0x44f   : > { %v5148_v52 = vpop.permute.xlu1 %5147  ;;  %v5125_v29 = vunpack.i.h.bf16 %v5123_v1  ;;  %v5124_v39 = vunpack.i.l.bf16 %v5123_v1 }
 0x450   : > { %v5150_v6 = vunpack.i.h.bf16 %v5148_v52  ;;  %v5149_v40 = vunpack.i.l.bf16 %v5148_v52  ;;  %v5080_v52 = vunpack.i.h.bf16 %v6643_v59 }
 0x451   : > { %v3473_v48 = vsel %vm468_vm0, %v7216_v7, %v5125_v29  ;;  %v3472_v45 = vsel %vm468_vm0, %v7217_v2, %v5124_v39  ;;  %v5084_v29 = vunpack.i.l.bf16 %v6657_v63  ;;  %v5120_v63 = vunpack.i.h.bf16 %v6669_v62 }
 0x452   : > { %v5133_v36 = vpop.permute.xlu0 %5132  ;;  %v3658_v11 = vsel %vm3645_vm14, %v3625_v50, %v5149_v40  ;;  %v3659_v49 = vsel %vm3645_vm14, %v3626_v47, %v5150_v6  ;;  %v5129_v7 = vunpack.i.l.bf16 %v6683_v22 }
 0x453   : > { %v5135_v4 = vunpack.i.h.bf16 %v5133_v36  ;;  %v5134_v31 = vunpack.i.l.bf16 %v5133_v36  ;;  %v5153_v43 = vpop.permute.xlu1 %5152 }
 0x454   : > { %v5155_v27 = vunpack.i.h.bf16 %v5153_v43  ;;  %v5154_v33 = vunpack.i.l.bf16 %v5153_v43  ;;  %v5130_v43 = vunpack.i.h.bf16 %v6683_v22 }
 0x455   : > { %v6706_v21 = vsel %vm472_vm3, %v3472_v45, %v5134_v31  ;;  %v6709_v58 = vsel %vm472_vm3, %v3473_v48, %v5135_v4  ;;  %v5119_v31 = vunpack.i.l.bf16 %v6669_v62  ;;  %v7218_v45 = vld [vmem:[#allocation13_spill] sm:$0xff]  ;;  %v5035_v62 = vunpack.i.h.bf16 %v6508_v8 }
 0x456   : > { %v3691_v15 = vsel %vm3678_vm15, %v3658_v11, %v5154_v33  ;;  %v3692_v61 = vsel %vm3678_vm15, %v3659_v49, %v5155_v27  ;;  %v5138_v19 = vpop.permute.xlu0 %5137  ;;  %v3467_v27 = vsel %vm468_vm0, %v7218_v45, %v5120_v63  ;;  %v7219_v33 = vld [vmem:[#allocation14_spill] sm:$0xff] }
 0x457   : > { %v3717_v17 = vpack.c.bf16 %v3692_v61, %v3691_v15  ;;  %v6713_v0 = vpop.permute.xlu1 %5167  ;;  %v5140_v53 = vunpack.i.h.bf16 %v5138_v19  ;;  %v5139_v13 = vunpack.i.l.bf16 %v5138_v19  ;;  %v3466_v11 = vsel %vm468_vm0, %v7219_v33, %v5119_v31 }
 0x458   : > { %v3498_v49 = vsel %vm472_vm3, %v3466_v11, %v5129_v7  ;;  %v3499_v15 = vsel %vm472_vm3, %v3467_v27, %v5130_v43  ;;  %v5034_v19 = vunpack.i.l.bf16 %v6508_v8  ;;  %v5095_v8 = vunpack.i.h.bf16 %v6630_v23 }
 0x459   : > { %4629 = vmatprep.mubr.msk.bf16.mxu1 %vm3763_vm2, %v3717_v17  ;;  %v3561_v56 = vsel %vm3546_vm11, %v3528_v51, %v5139_v13  ;;  %v3562_v60 = vsel %vm3546_vm11, %v3529_v44, %v5140_v53  ;;  %v3531_v30 = vsel %vm476_vm5, %v3499_v15, %v5035_v62  ;;  %v5090_v17 = vunpack.i.h.bf16 %v6614_v28 }
 0x45a   : > { %v5143_v24 = vpop.permute.xlu0 %5142  ;;  %v3530_v14 = vsel %vm476_vm5, %v3498_v49, %v5034_v19  ;;  %v5089_v53 = vunpack.i.l.bf16 %v6614_v28  ;;  %v5109_v49 = vunpack.i.l.bf16 %v6681_v3 }
 0x45b   : > { %v5145_v26 = vunpack.i.h.bf16 %v5143_v24  ;;  %v5144_v1 = vunpack.i.l.bf16 %v5143_v24  ;;  %v6720_v16 = vpop.permute.xlu1 %5172 }
 0x45d   : > { %v3594_v46 = vsel %vm3579_vm12, %v3561_v56, %v5144_v1  ;;  %v3595_v5 = vsel %vm3579_vm12, %v3562_v60, %v5145_v26  ;;  %v3563_v26 = vsel %vm3546_vm11, %v3530_v14, %v5089_v53  ;;  %v3564_v1 = vsel %vm3546_vm11, %v3531_v30, %v5090_v17 }
 0x45e   : > { %v3627_v39 = vsel %vm3612_vm13, %v3594_v46, %v5029_v10  ;;  %v3628_v25 = vsel %vm3612_vm13, %v3595_v5, %v5030_v41  ;;  %v6734_v6 = vpop.permute.xlu0 %5157  ;;  %v5094_v41 = vunpack.i.l.bf16 %v6630_v23  ;;  %v3597_v28 = vsel %vm3579_vm12, %v3564_v1, %v5095_v8 }
 0x45f   : > { %v3660_v40 = vsel %vm3645_vm14, %v3627_v39, %v5079_v42  ;;  %v3661_v18 = vsel %vm3645_vm14, %v3628_v25, %v5080_v52  ;;  %v5183_v20 = vpop.permute.xlu1 %5182  ;;  %v5160_v19 = vunpack.i.h.bf16 %v6734_v6  ;;  %v5159_v14 = vunpack.i.l.bf16 %v6734_v6 }
 0x460   : > { %v3693_v59 = vsel %vm3678_vm15, %v3660_v40, %v5084_v29  ;;  %v3694_v36 = vsel %vm3678_vm15, %v3661_v18, %v5085_v34  ;;  %v5185_v51 = vunpack.i.h.bf16 %v5183_v20  ;;  %v5184_v44 = vunpack.i.l.bf16 %v5183_v20 }
 0x461   : > { %v3718_v50 = vpack.c.bf16 %v3694_v36, %v3693_v59  ;;  %v3596_v52 = vsel %vm3579_vm12, %v3563_v26, %v5094_v41 }
 0x462   : > { %v6740_v47 = vpop.permute.xlu0 %5162  ;;  %v3629_v46 = vsel %vm3612_vm13, %v3596_v52, %v5184_v44  ;;  %v3630_v5 = vsel %vm3612_vm13, %v3597_v28, %v5185_v51 }
 0x463   : > { %v6742_v4 = vpop.permute.xlu1 %5192  ;;  %4630 = vmatmul.mubr.msk.bf16.vlgmr.msra.gmra.mrb[16].mxu1 %vm3763_vm2, %v3718_v50  ;;  %v5165_v30 = vunpack.i.h.bf16 %v6740_v47  ;;  %v5164_v17 = vunpack.i.l.bf16 %v6740_v47 }
 0x466   : > { %v5178_v48 = vpop.permute.xlu0 %5177 }
 0x467   : > { %v6749_v2 = vpop.permute.xlu1 %5197  ;;  %v5180_v20 = vunpack.i.h.bf16 %v5178_v48  ;;  %v5179_v59 = vunpack.i.l.bf16 %v5178_v48  ;;  %v5110_v48 = vunpack.i.h.bf16 %v6681_v3 }
 0x468   : > { %v5200_v47 = vunpack.i.h.bf16 %v6749_v2 }
 0x469   : > { %v3532_v7 = vsel %vm476_vm5, %v6599_v57, %v5179_v59  ;;  %v3533_v45 = vsel %vm476_vm5, %v6602_v32, %v5180_v20 }
 0x46a   : > { %v6757_v61 = vpop.permute.xlu0 %5187 }
 0x46b   : > { %v6761_v22 = vpop.permute.xlu1 %5207 }
 0x46c   : > { %v5210_v52 = vunpack.i.h.bf16 %v6761_v22  ;;  %v5209_v28 = vunpack.i.l.bf16 %v6761_v22 }
 0x46e   : > { %v6767_v13 = vpop.permute.xlu0 %5202 }
 0x46f   : > { %v5228_v24 = vpop.permute.xlu1 %5227 }
 0x470   : > { %v5230_v10 = vunpack.i.h.bf16 %v5228_v24  ;;  %v5229_v56 = vunpack.i.l.bf16 %v5228_v24 }
 0x472   : > { %v6773_v60 = vpop.permute.xlu0 %5212  ;;  %v3662_v39 = vsel %vm3645_vm14, %v3629_v46, %v5229_v56  ;;  %v3663_v25 = vsel %vm3645_vm14, %v3630_v5, %v5230_v10  ;;  %v5199_v56 = vunpack.i.l.bf16 %v6749_v2  ;;  %v7220_v5 = vld [vmem:[#allocation18_spill] sm:$0xff]  ;;  %v5115_v2 = vunpack.i.h.bf16 %v6659_v54 }
 0x473   : > { %v5233_v42 = vpop.permute.xlu1 %5232 }
 0x474   : > { %v5235_v34 = vunpack.i.h.bf16 %v5233_v42  ;;  %v5234_v29 = vunpack.i.l.bf16 %v5233_v42 }
 0x476   : > { %v3695_v23 = vsel %vm3678_vm15, %v3662_v39, %v5234_v29  ;;  %v3696_v40 = vsel %vm3678_vm15, %v3663_v25, %v5235_v34  ;;  %v5218_v18 = vpop.permute.xlu0 %5217  ;;  %v3471_v34 = vsel %vm468_vm0, %v7220_v5, %v5200_v47  ;;  %v7221_v29 = vld [vmem:[#allocation19_spill] sm:$0xff] }
 0x477   : > { %v3719_v36 = vpack.c.bf16 %v3696_v40, %v3695_v23  ;;  %v6783_v50 = vpop.permute.xlu1 %5247  ;;  %v5220_v63 = vunpack.i.h.bf16 %v5218_v18  ;;  %v5219_v31 = vunpack.i.l.bf16 %v5218_v18  ;;  %v3470_v39 = vsel %vm468_vm0, %v7221_v29, %v5199_v56 }
 0x478   : > { %v3502_v25 = vsel %vm472_vm3, %v3470_v39, %v5209_v28  ;;  %v3503_v23 = vsel %vm472_vm3, %v3471_v34, %v5210_v52  ;;  %v5114_v18 = vunpack.i.l.bf16 %v6659_v54  ;;  %v5175_v54 = vunpack.i.h.bf16 %v6720_v16 }
 0x479   : > { %4633 = vmatprep.mubr.msk.bf16.mxu1 %vm3763_vm2, %v3719_v36  ;;  %v3565_v15 = vsel %vm3546_vm11, %v3532_v7, %v5219_v31  ;;  %v3566_v62 = vsel %vm3546_vm11, %v3533_v45, %v5220_v63  ;;  %v3535_v59 = vsel %vm476_vm5, %v3503_v23, %v5115_v2  ;;  %v5170_v36 = vunpack.i.h.bf16 %v6713_v0 }
 0x47a   : > { %v5223_v43 = vpop.permute.xlu0 %5222  ;;  %v3534_v20 = vsel %vm476_vm5, %v3502_v25, %v5114_v18  ;;  %v5169_v63 = vunpack.i.l.bf16 %v6713_v0  ;;  %v5190_v52 = vunpack.i.h.bf16 %v6757_v61  ;;  %v5189_v28 = vunpack.i.l.bf16 %v6757_v61 }
 0x47b   : > { %v5225_v27 = vunpack.i.h.bf16 %v5223_v43  ;;  %v5224_v33 = vunpack.i.l.bf16 %v5223_v43  ;;  %v6790_v11 = vpop.permute.xlu1 %5252 }
 0x47d   : > { %v3598_v57 = vsel %vm3579_vm12, %v3565_v15, %v5224_v33  ;;  %v3599_v32 = vsel %vm3579_vm12, %v3566_v62, %v5225_v27  ;;  %v3567_v27 = vsel %vm3546_vm11, %v3534_v20, %v5169_v63  ;;  %v3568_v33 = vsel %vm3546_vm11, %v3535_v59, %v5170_v36 }
 0x47e   : > { %v3631_v53 = vsel %vm3612_vm13, %v3598_v57, %v5109_v49  ;;  %v3632_v3 = vsel %vm3612_vm13, %v3599_v32, %v5110_v48  ;;  %v6804_v24 = vpop.permute.xlu0 %5237  ;;  %v5174_v48 = vunpack.i.l.bf16 %v6720_v16  ;;  %v3601_v0 = vsel %vm3579_vm12, %v3568_v33, %v5175_v54 }
 0x47f   : > { %v5263_v51 = vpop.permute.xlu1 %5262  ;;  %v3664_v44 = vsel %vm3645_vm14, %v3631_v53, %v5159_v14  ;;  %v3665_v26 = vsel %vm3645_vm14, %v3632_v3, %v5160_v19  ;;  %v5240_v5 = vunpack.i.h.bf16 %v6804_v24  ;;  %v5239_v18 = vunpack.i.l.bf16 %v6804_v24 }
 0x480   : > { %v3697_v6 = vsel %vm3678_vm15, %v3664_v44, %v5164_v17  ;;  %v3698_v1 = vsel %vm3678_vm15, %v3665_v26, %v5165_v30  ;;  %v5265_v7 = vunpack.i.h.bf16 %v5263_v51  ;;  %v5264_v45 = vunpack.i.l.bf16 %v5263_v51 }
 0x481   : > { %v3720_v8 = vpack.c.bf16 %v3698_v1, %v3697_v6  ;;  %v3600_v19 = vsel %vm3579_vm12, %v3567_v27, %v5174_v48 }
 0x482   : > { %v6810_v41 = vpop.permute.xlu0 %5242  ;;  %v3633_v57 = vsel %vm3612_vm13, %v3600_v19, %v5264_v45  ;;  %v3634_v32 = vsel %vm3612_vm13, %v3601_v0, %v5265_v7  ;;  %v5205_v19 = vunpack.i.h.bf16 %v6767_v13  ;;  %v5204_v0 = vunpack.i.l.bf16 %v6767_v13  ;;  %v7223_v13 = vld [vmem:[#allocation4_spill] sm:$0xff] }
 0x483   : > { %v6812_v10 = vpop.permute.xlu1 %5272  ;;  %4634 = vmatmul.mubr.msk.bf16.gmra.mrb[20].mxu1 %vm3763_vm2, %v3720_v8  ;;  %v5245_v36 = vunpack.i.h.bf16 %v6810_v41 }
 0x486   : > { %v5258_v42 = vpop.permute.xlu0 %5257 }
 0x487   : > { %v6819_v46 = vpop.permute.xlu1 %5277  ;;  %v5260_v26 = vunpack.i.h.bf16 %v5258_v42  ;;  %v5259_v6 = vunpack.i.l.bf16 %v5258_v42 }
 0x488   : > { %v5279_v34 = vunpack.i.l.bf16 %v6819_v46  ;;  %v5280_v63 = vunpack.i.h.bf16 %v6819_v46 }
 0x489   : > { %v3536_v39 = vsel %vm476_vm5, %v6706_v21, %v5259_v6  ;;  %v3537_v42 = vsel %vm476_vm5, %v6709_v58, %v5260_v26  ;;  %v4710_v26 = vunpack.i.h.bf16 %v7223_v13  ;;  %v4709_v6 = vunpack.i.l.bf16 %v7223_v13 }
 0x48a   : > { %v6827_v40 = vpop.permute.xlu0 %5267  ;;  %v3474_v33 = vsel %vm468_vm0, %v6309_v37, %v5279_v34  ;;  %v3475_v37 = vsel %vm468_vm0, %v6304_v38, %v5280_v63 }
 0x48b   : > { %v6831_v22 = vpop.permute.xlu1 %5287 }
 0x48c   : > { %v5289_v20 = vunpack.i.l.bf16 %v6831_v22  ;;  %v5290_v7 = vunpack.i.h.bf16 %v6831_v22 }
 0x48e   : > { %v6837_v31 = vpop.permute.xlu0 %5282 }
 0x48f   : > { %v5308_v43 = vpop.permute.xlu1 %5307 }
 0x490   : > { %v5310_v49 = vunpack.i.h.bf16 %v5308_v43  ;;  %v5309_v15 = vunpack.i.l.bf16 %v5308_v43  ;;  %v5244_v43 = vunpack.i.l.bf16 %v6810_v41  ;;  %v3506_v41 = vsel %vm472_vm3, %v3474_v33, %v5289_v20 }
 0x491   : > { %v5274_v20 = vunpack.i.l.bf16 %v6812_v10 }
 0x492   : > { %v6843_v62 = vpop.permute.xlu0 %5292  ;;  %v3666_v53 = vsel %vm3645_vm14, %v3633_v57, %v5309_v15  ;;  %v3667_v3 = vsel %vm3645_vm14, %v3634_v32, %v5310_v49  ;;  %v5194_v49 = vunpack.i.l.bf16 %v6742_v4  ;;  %v5215_v57 = vunpack.i.h.bf16 %v6773_v60 }
 0x493   : > { %v5313_v14 = vpop.permute.xlu1 %5312  ;;  %v5214_v32 = vunpack.i.l.bf16 %v6773_v60  ;;  %v5249_v60 = vunpack.i.l.bf16 %v6783_v50 }
 0x494   : > { %v5315_v30 = vunpack.i.h.bf16 %v5313_v14  ;;  %v5314_v17 = vunpack.i.l.bf16 %v5313_v14 }
 0x496   : > { %v3699_v16 = vsel %vm3678_vm15, %v3666_v53, %v5314_v17  ;;  %v3700_v51 = vsel %vm3678_vm15, %v3667_v3, %v5315_v30  ;;  %v5298_v44 = vpop.permute.xlu0 %5297  ;;  %v3507_v30 = vsel %vm472_vm3, %v3475_v37, %v5290_v7  ;;  %v7222_v53 = vld [vmem:[#allocation3_spill] sm:$0xff] }
 0x497   : > { %v3721_v1 = vpack.c.bf16 %v3700_v51, %v3699_v16  ;;  %v6853_v8 = vpop.permute.xlu1 %5327  ;;  %v5300_v47 = vunpack.i.h.bf16 %v5298_v44  ;;  %v5299_v56 = vunpack.i.l.bf16 %v5298_v44  ;;  %v4705_v3 = vunpack.i.h.bf16 %v7222_v53 }
 0x498   : > { %v5195_v16 = vunpack.i.h.bf16 %v6742_v4  ;;  %v3538_v51 = vsel %vm476_vm5, %v3506_v41, %v5194_v49  ;;  %v4704_v38 = vunpack.i.l.bf16 %v7222_v53 }
 0x499   : > { %4637 = vmatprep.mubr.msk.bf16.mxu1 %vm3763_vm2, %v3721_v1  ;;  %v3569_v61 = vsel %vm3546_vm11, %v3536_v39, %v5299_v56  ;;  %v3570_v59 = vsel %vm3546_vm11, %v3537_v42, %v5300_v47  ;;  %v7224_v1 = vld [vmem:[#allocation21_spill] sm:$0xff]  ;;  %v7225_v56 = vld [vmem:[#allocation22_spill] sm:$0xff]  ;;  %v3571_v39 = vsel %vm3546_vm11, %v3538_v51, %v5249_v60 }
 0x49a   : > { %v5303_v29 = vpop.permute.xlu0 %5302  ;;  %v3477_v47 = vsel %vm468_vm0, %v7224_v1, %v5205_v19  ;;  %v3539_v4 = vsel %vm476_vm5, %v3507_v30, %v5195_v16 }
 0x49b   : > { %v5305_v25 = vunpack.i.h.bf16 %v5303_v29  ;;  %v5304_v23 = vunpack.i.l.bf16 %v5303_v29  ;;  %v6864_v2 = vpop.permute.xlu1 %5332  ;;  %v3509_v34 = vsel %vm472_vm3, %v3477_v47, %v5215_v57  ;;  %v5250_v29 = vunpack.i.h.bf16 %v6783_v50 }
 0x49d   : > { %v3602_v21 = vsel %vm3579_vm12, %v3569_v61, %v5304_v23  ;;  %v3603_v58 = vsel %vm3579_vm12, %v3570_v59, %v5305_v25  ;;  %v5255_v25 = vunpack.i.h.bf16 %v6790_v11  ;;  %v5254_v23 = vunpack.i.l.bf16 %v6790_v11 }
 0x49e   : > { %v3635_v24 = vsel %vm3612_vm13, %v3602_v21, %v5189_v28  ;;  %v3636_v45 = vsel %vm3612_vm13, %v3603_v58, %v5190_v52  ;;  %v6878_v27 = vpop.permute.xlu0 %5317  ;;  %v3476_v52 = vsel %vm468_vm0, %v7225_v56, %v5204_v0  ;;  %v5285_v28 = vunpack.i.h.bf16 %v6837_v31 }
 0x49f   : > { %v5343_v54 = vpop.permute.xlu1 %5342  ;;  %v3668_v46 = vsel %vm3645_vm14, %v3635_v24, %v5239_v18  ;;  %v3669_v48 = vsel %vm3645_vm14, %v3636_v45, %v5240_v5  ;;  %v3508_v5 = vsel %vm472_vm3, %v3476_v52, %v5214_v32  ;;  %v5275_v18 = vunpack.i.h.bf16 %v6812_v10 }
 0x4a0   : > { %v3701_v22 = vsel %vm3678_vm15, %v3668_v46, %v5244_v43  ;;  %v3702_v15 = vsel %vm3678_vm15, %v3669_v48, %v5245_v36  ;;  %v5270_v59 = vunpack.i.h.bf16 %v6827_v40  ;;  %v5269_v36 = vunpack.i.l.bf16 %v6827_v40 }
 0x4a1   : > { %v3722_v14 = vpack.c.bf16 %v3702_v15, %v3701_v22  ;;  %v5344_v63 = vunpack.i.l.bf16 %v5343_v54  ;;  %v3572_v21 = vsel %vm3546_vm11, %v3539_v4, %v5250_v29  ;;  %v6924_v50 = vsel %vm468_vm0, %v6337_v35, %v5285_v28 }
 0x4a2   : > { %v6895_v17 = vpop.permute.xlu0 %5322  ;;  %v5284_v58 = vunpack.i.l.bf16 %v6837_v31  ;;  %v5345_v43 = vunpack.i.h.bf16 %v5343_v54  ;;  %v3604_v11 = vsel %vm3579_vm12, %v3571_v39, %v5254_v23  ;;  %v5320_v46 = vunpack.i.h.bf16 %v6878_v27 }
 0x4a3   : > { %v5348_v44 = vpop.permute.xlu1 %5347  ;;  %4638 = vmatmul.mubr.msk.bf16.gmra.mrb[24].mxu1 %vm3763_vm2, %v3722_v14  ;;  %v3605_v40 = vsel %vm3579_vm12, %v3572_v21, %v5255_v25  ;;  %v5319_v35 = vunpack.i.l.bf16 %v6878_v27  ;;  %v3637_v22 = vsel %vm3612_vm13, %v3604_v11, %v5344_v63  ;;  %v5324_v19 = vunpack.i.l.bf16 %v6895_v17 }
 0x4a4   : > { %v5350_v7 = vunpack.i.h.bf16 %v5348_v44  ;;  %v5349_v24 = vunpack.i.l.bf16 %v5348_v44  ;;  %v3638_v15 = vsel %vm3612_vm13, %v3605_v40, %v5345_v43  ;;  %v5295_v23 = vunpack.i.h.bf16 %v6843_v62 }
 0x4a6   : > { %v5338_v42 = vpop.permute.xlu0 %5337  ;;  %v3479_v14 = vsel %vm468_vm0, %v6489_v12, %v5350_v7  ;;  %v3478_v57 = vsel %vm468_vm0, %v6494_v9, %v5349_v24  ;;  %v5294_v24 = vunpack.i.l.bf16 %v6843_v62 }
 0x4a7   : > { %v5353_v61 = vpop.permute.xlu1 %5352  ;;  %v5340_v10 = vunpack.i.h.bf16 %v5338_v42  ;;  %v5339_v45 = vunpack.i.l.bf16 %v5338_v42 }
 0x4a8   : > { %v5355_v48 = vunpack.i.h.bf16 %v5353_v61  ;;  %v5354_v49 = vunpack.i.l.bf16 %v5353_v61  ;;  %v5325_v61 = vunpack.i.h.bf16 %v6895_v17 }
 0x4a9   : > { %v3540_v32 = vsel %vm476_vm5, %v3508_v5, %v5339_v45  ;;  %v3541_v27 = vsel %vm476_vm5, %v3509_v34, %v5340_v10  ;;  %v5330_v10 = vunpack.i.h.bf16 %v6853_v8  ;;  %v5329_v45 = vunpack.i.l.bf16 %v6853_v8 }
 0x4aa   : > { %v5358_v33 = vpop.permute.xlu0 %5357  ;;  %v3510_v16 = vsel %vm472_vm3, %v3478_v57, %v5354_v49  ;;  %v3511_v51 = vsel %vm472_vm3, %v3479_v14, %v5355_v48  ;;  %v5335_v8 = vunpack.i.h.bf16 %v6864_v2 }
 0x4ab   : > { %v5368_v41 = vpop.permute.xlu1 %5367  ;;  %v5360_v31 = vunpack.i.h.bf16 %v5358_v33  ;;  %v5359_v54 = vunpack.i.l.bf16 %v5358_v33  ;;  %v3542_v11 = vsel %vm476_vm5, %v3510_v16, %v5274_v20  ;;  %v3543_v7 = vsel %vm476_vm5, %v3511_v51, %v5275_v18 }
 0x4ac   : > { %v5370_v0 = vunpack.i.h.bf16 %v5368_v41  ;;  %v5369_v37 = vunpack.i.l.bf16 %v5368_v41  ;;  %v3480_v33 = vsel %vm468_vm0, %v6342_v55, %v5284_v58  ;;  %v3575_v41 = vsel %vm3546_vm11, %v3542_v11, %v5329_v45 }
 0x4ad   : > { %v3573_v47 = vsel %vm3546_vm11, %v3540_v32, %v5359_v54  ;;  %v3574_v56 = vsel %vm3546_vm11, %v3541_v27, %v5360_v31  ;;  %v3576_v62 = vsel %vm3546_vm11, %v3543_v7, %v5330_v10  ;;  %v3512_v55 = vsel %vm472_vm3, %v3480_v33, %v5294_v24 }
 0x4ae   : > { %v5363_v30 = vpop.permute.xlu0 %5362  ;;  %v3670_v9 = vsel %vm3645_vm14, %v3637_v22, %v5369_v37  ;;  %v3671_v4 = vsel %vm3645_vm14, %v3638_v15, %v5370_v0  ;;  %v5334_v22 = vunpack.i.l.bf16 %v6864_v2  ;;  %v3513_v58 = vsel %vm472_vm3, %v6924_v50, %v5295_v23 }
 0x4af   : > { %v5365_v44 = vunpack.i.h.bf16 %v5363_v30  ;;  %v5364_v60 = vunpack.i.l.bf16 %v5363_v30  ;;  %v5373_v1 = vpop.permute.xlu1 %5372  ;;  %v3609_v57 = vsel %vm3579_vm12, %v3576_v62, %v5335_v8  ;;  %vm4180_vm0 = vcmask 25600  }
 0x4b0   : > { %v5375_v12 = vunpack.i.h.bf16 %v5373_v1  ;;  %v5374_v52 = vunpack.i.l.bf16 %v5373_v1  ;;  %v3608_v14 = vsel %vm3579_vm12, %v3575_v41, %v5334_v22 }
 0x4b1   : > { %v3606_v28 = vsel %vm3579_vm12, %v3573_v47, %v5364_v60  ;;  %v3607_v5 = vsel %vm3579_vm12, %v3574_v56, %v5365_v44 }
 0x4b2   : > { %v3639_v34 = vsel %vm3612_vm13, %v3606_v28, %v5269_v36  ;;  %v3640_v29 = vsel %vm3612_vm13, %v3607_v5, %v5270_v59  ;;  %v3703_v39 = vsel %vm3678_vm15, %v3670_v9, %v5374_v52  ;;  %v3704_v42 = vsel %vm3678_vm15, %v3671_v4, %v5375_v12  ;;  %v5378_v25 = vpop.permute.xlu0 %5377 }
 0x4b3   : > { %v3723_v63 = vpack.c.bf16 %v3704_v42, %v3703_v39  ;;  %v5383_v21 = vpop.permute.xlu1 %5382  ;;  %v3672_v43 = vsel %vm3645_vm14, %v3639_v34, %v5319_v35  ;;  %v3673_v36 = vsel %vm3645_vm14, %v3640_v29, %v5320_v46  ;;  %v5380_v20 = vunpack.i.h.bf16 %v5378_v25 }
 0x4b4   : > { %v3705_v59 = vsel %vm3678_vm15, %v3672_v43, %v5324_v19  ;;  %v3706_v17 = vsel %vm3678_vm15, %v3673_v36, %v5325_v61  ;;  %v5379_v40 = vunpack.i.l.bf16 %v5378_v25  ;;  %v5385_v46 = vunpack.i.h.bf16 %v5383_v21 }
 0x4b5   : > { %4641 = vmatprep.mubr.msk.bf16.mxu1 %vm3763_vm2, %v3723_v63  ;;  %v3724_v48 = vpack.c.bf16 %v3706_v17, %v3705_v59  ;;  %v5384_v49 = vunpack.i.l.bf16 %v5383_v21  ;;  %v3545_v37 = vsel %vm476_vm5, %v3513_v58, %v5380_v20 }
 0x4b6   : > { %v5388_v18 = vpop.permute.xlu0 %5387  ;;  %v3544_v0 = vsel %vm476_vm5, %v3512_v55, %v5379_v40  ;;  %v3642_v27 = vsel %vm3612_vm13, %v3609_v57, %v5385_v46 }
 0x4b7   : > { %v5398_v35 = vpop.permute.xlu1 %5397  ;;  %v5390_v31 = vunpack.i.h.bf16 %v5388_v18  ;;  %v5389_v54 = vunpack.i.l.bf16 %v5388_v18  ;;  %4642 = vmatmul.mubr.msk.bf16.gmra.mrb[28].mxu1 %vm3763_vm2, %v3724_v48  ;;  %v3641_v32 = vsel %vm3612_vm13, %v3608_v14, %v5384_v49 }
 0x4b8   : > { %v5400_v15 = vunpack.i.h.bf16 %v5398_v35  ;;  %v5399_v19 = vunpack.i.l.bf16 %v5398_v35 }
 0x4b9   : > { %v3577_v50 = vsel %vm3546_vm11, %v3544_v0, %v5389_v54  ;;  %v3578_v44 = vsel %vm3546_vm11, %v3545_v37, %v5390_v31 }
 0x4ba   : > { %v5393_v2 = vpop.permute.xlu0 %5392  ;;  %v3674_v47 = vsel %vm3645_vm14, %v3641_v32, %v5399_v19  ;;  %v3675_v56 = vsel %vm3645_vm14, %v3642_v27, %v5400_v15 }
 0x4bb   : > { %v5395_v30 = vunpack.i.h.bf16 %v5393_v2  ;;  %v5394_v16 = vunpack.i.l.bf16 %v5393_v2  ;;  %v5403_v51 = vpop.permute.xlu1 %5402 }
 0x4bc   : > { %v5405_v60 = vunpack.i.h.bf16 %v5403_v51  ;;  %v5404_v1 = vunpack.i.l.bf16 %v5403_v51 }
 0x4bd   : > { %v3610_v12 = vsel %vm3579_vm12, %v3577_v50, %v5394_v16  ;;  %v3611_v52 = vsel %vm3579_vm12, %v3578_v44, %v5395_v30 }
 0x4be   : > { %v3643_v9 = vsel %vm3612_vm13, %v3610_v12, %v4704_v38  ;;  %v3644_v4 = vsel %vm3612_vm13, %v3611_v52, %v4705_v3  ;;  %v3707_v28 = vsel %vm3678_vm15, %v3674_v47, %v5404_v1  ;;  %v3708_v5 = vsel %vm3678_vm15, %v3675_v56, %v5405_v60  ;;  %v5408_v34 = vpop.permute.xlu0 %5407 }
 0x4bf   : > { %v3725_v29 = vpack.c.bf16 %v3708_v5, %v3707_v28  ;;  %v5410_v39 = vunpack.i.h.bf16 %v5408_v34  ;;  %v5409_v42 = vunpack.i.l.bf16 %v5408_v34  ;;  %v3676_v25 = vsel %vm3645_vm14, %v3643_v9, %v4709_v6 }
 0x4c0   : > { %v3677_v38 = vsel %vm3645_vm14, %v3644_v4, %v4710_v26 }
 0x4c1   : > { %v3709_v53 = vsel %vm3678_vm15, %v3676_v25, %v5409_v42  ;;  %v3710_v3 = vsel %vm3678_vm15, %v3677_v38, %v5410_v39  ;;  %4645 = vmatprep.mubr.msk.bf16.mxu1 %vm3763_vm2, %v3725_v29 }
 0x4c2   : > { %v3726_v23 = vpack.c.bf16 %v3710_v3, %v3709_v53 }
 0x4c4   : > { %4646 = vmatmul.mubr.msk.bf16.gmra.mrb[32].mxu1 %vm3763_vm2, %v3726_v23 }
 0x4d8   : > { %v4619_v13 = vpop.f32.mrb[20].mxu0 }
 0x4d9   : > { %3979 = vst.msk [vmem:[%s7008_s28 + $0x10] sm:$0xff] %vm466_vm1, %v4619_v13  ;;  %v3850_v26 = vpop.f32.mrb[21].mxu0  ;;  %v4080_v21 = vmul.f32 %v4619_v13, %v4619_v13  ;;  %v4012_v59 = vsel %vm466_vm1, %v4619_v13, 0.0 }
 0x4da   : > { %3977 = vst.msk [vmem:[%s7008_s28] sm:$0xff] %vm466_vm1, %v3850_v26  ;;  %v4078_v6 = vmul.f32 %v3850_v26, %v3850_v26  ;;  %v4620_v61 = vpop.f32.mrb[22].mxu0  ;;  %v4009_v43 = vsel %vm466_vm1, %v3850_v26, 0.0 }
 0x4db   : > { %3980 = vst.msk [vmem:[%s7008_s28 + $0x18] sm:$0xff] %vm466_vm1, %v4620_v61  ;;  %v3853_v63 = vpop.f32.mrb[23].mxu0  ;;  %v4081_v10 = vmul.f32 %v4620_v61, %v4620_v61  ;;  %v4113_v20 = vsel %vm466_vm1, %v4080_v21, 0.0  ;;  %v4014_v40 = vsel %vm466_vm1, %v4620_v61, 0.0 }
 0x4dc   : > { %3978 = vst.msk [vmem:[%s7008_s28 + $0x8] sm:$0xff] %vm466_vm1, %v3853_v63  ;;  %v4010_v11 = vsel %vm466_vm1, %v3853_v63, 0.0  ;;  %v4079_v7 = vmul.f32 %v3853_v63, %v3853_v63  ;;  %v4110_v24 = vsel %vm466_vm1, %v4078_v6, 0.0 }
 0x4dd   : > { %v4011_v36 = vadd.f32 %v4010_v11, %v4009_v43  ;;  %v4115_v46 = vsel %vm466_vm1, %v4081_v10, 0.0 }
 0x4de   : > { %v4111_v45 = vsel %vm466_vm1, %v4079_v7, 0.0 }
 0x4df   : > { %v4013_v17 = vadd.f32 %v4012_v59, %v4011_v36  ;;  %v4112_v33 = vadd.f32 %v4111_v45, %v4110_v24 }
 0x4e1   : > { %v4114_v18 = vadd.f32 %v4113_v20, %v4112_v33  ;;  %v4015_v48 = vadd.f32 %v4014_v40, %v4013_v17 }
 0x4e3   : > { %v4116_v49 = vadd.f32 %v4115_v46, %v4114_v18 }
 0x4f8   : > { %v4623_v41 = vpop.f32.mrb[24].mxu0 }
 0x4f9   : > { %3983 = vst.msk [vmem:[%s7008_s28 + $0x30] sm:$0xff] %vm466_vm1, %v4623_v41  ;;  %v3866_v62 = vpop.f32.mrb[25].mxu0  ;;  %v4084_v55 = vmul.f32 %v4623_v41, %v4623_v41  ;;  %v4020_v14 = vsel %vm466_vm1, %v4623_v41, 0.0 }
 0x4fa   : > { %3981 = vst.msk [vmem:[%s7008_s28 + $0x20] sm:$0xff] %vm466_vm1, %v3866_v62  ;;  %v4016_v35 = vsel %vm466_vm1, %v3866_v62, 0.0  ;;  %v4082_v8 = vmul.f32 %v3866_v62, %v3866_v62  ;;  %v4624_v22 = vpop.f32.mrb[26].mxu0 }
 0x4fb   : > { %v4017_v31 = vadd.f32 %v4016_v35, %v4015_v48  ;;  %3984 = vst.msk [vmem:[%s7008_s28 + $0x38] sm:$0xff] %vm466_vm1, %v4624_v22  ;;  %v3869_v54 = vpop.f32.mrb[27].mxu0  ;;  %v4085_v57 = vmul.f32 %v4624_v22, %v4624_v22  ;;  %v4121_v30 = vsel %vm466_vm1, %v4084_v55, 0.0  ;;  %v4022_v16 = vsel %vm466_vm1, %v4624_v22, 0.0 }
 0x4fc   : > { %v4117_v58 = vsel %vm466_vm1, %v4082_v8, 0.0  ;;  %3982 = vst.msk [vmem:[%s7008_s28 + $0x28] sm:$0xff] %vm466_vm1, %v3869_v54  ;;  %v4018_v15 = vsel %vm466_vm1, %v3869_v54, 0.0  ;;  %v4083_v19 = vmul.f32 %v3869_v54, %v3869_v54 }
 0x4fd   : > { %v4118_v0 = vadd.f32 %v4117_v58, %v4116_v49  ;;  %v4019_v37 = vadd.f32 %v4018_v15, %v4017_v31  ;;  %v4123_v44 = vsel %vm466_vm1, %v4085_v57, 0.0 }
 0x4fe   : > { %v4119_v2 = vsel %vm466_vm1, %v4083_v19, 0.0 }
 0x4ff   : > { %v4021_v32 = vadd.f32 %v4020_v14, %v4019_v37  ;;  %v4120_v27 = vadd.f32 %v4119_v2, %v4118_v0 }
 0x501   : > { %v4122_v51 = vadd.f32 %v4121_v30, %v4120_v27  ;;  %v4023_v50 = vadd.f32 %v4022_v16, %v4021_v32 }
 0x503   : > { %v4124_v60 = vadd.f32 %v4123_v44, %v4122_v51 }
 0x514   : > { %v4627_v1 = vpop.f32.mrb[28].mxu0 }
 0x515   : > { %3987 = vst.msk [vmem:[%s7008_s28 + $0x50] sm:$0xff] %vm466_vm1, %v4627_v1  ;;  %v3882_v47 = vpop.f32.mrb[29].mxu0  ;;  %v4088_v28 = vmul.f32 %v4627_v1, %v4627_v1  ;;  %v4028_v25 = vsel %vm466_vm1, %v4627_v1, 0.0 }
 0x516   : > { %3985 = vst.msk [vmem:[%s7008_s28 + $0x40] sm:$0xff] %vm466_vm1, %v3882_v47  ;;  %v4024_v56 = vsel %vm466_vm1, %v3882_v47, 0.0  ;;  %v4086_v12 = vmul.f32 %v3882_v47, %v3882_v47  ;;  %v4628_v52 = vpop.f32.mrb[30].mxu0 }
 0x517   : > { %v4025_v9 = vadd.f32 %v4024_v56, %v4023_v50  ;;  %3988 = vst.msk [vmem:[%s7008_s28 + $0x58] sm:$0xff] %vm466_vm1, %v4628_v52  ;;  %v3885_v4 = vpop.f32.mrb[31].mxu0  ;;  %v4089_v38 = vmul.f32 %v4628_v52, %v4628_v52  ;;  %v4129_v13 = vsel %vm466_vm1, %v4088_v28, 0.0  ;;  %v4030_v26 = vsel %vm466_vm1, %v4628_v52, 0.0 }
 0x518   : > { %v4125_v5 = vsel %vm466_vm1, %v4086_v12, 0.0  ;;  %3986 = vst.msk [vmem:[%s7008_s28 + $0x48] sm:$0xff] %vm466_vm1, %v3885_v4  ;;  %v4026_v34 = vsel %vm466_vm1, %v3885_v4, 0.0  ;;  %v4087_v29 = vmul.f32 %v3885_v4, %v3885_v4 }
 0x519   : > { %v4126_v39 = vadd.f32 %v4125_v5, %v4124_v60  ;;  %v4027_v42 = vadd.f32 %v4026_v34, %v4025_v9  ;;  %v4131_v63 = vsel %vm466_vm1, %v4089_v38, 0.0 }
 0x51a   : > { %v4127_v53 = vsel %vm466_vm1, %v4087_v29, 0.0 }
 0x51b   : > { %v4029_v3 = vadd.f32 %v4028_v25, %v4027_v42  ;;  %v4128_v23 = vadd.f32 %v4127_v53, %v4126_v39 }
 0x51d   : > { %v4130_v6 = vadd.f32 %v4129_v13, %v4128_v23  ;;  %v4031_v61 = vadd.f32 %v4030_v26, %v4029_v3 }
 0x51f   : > { %v4132_v21 = vadd.f32 %v4131_v63, %v4130_v6 }
 0x536   : > { %v4631_v43 = vpop.f32.mrb[16].mxu1 }
 0x537   : > { %3991 = vst.msk [vmem:[%s7008_s28 + $0x70] sm:$0xff] %vm466_vm1, %v4631_v43  ;;  %v3898_v11 = vpop.f32.mrb[17].mxu1  ;;  %v4092_v45 = vmul.f32 %v4631_v43, %v4631_v43  ;;  %v4036_v48 = vsel %vm466_vm1, %v4631_v43, 0.0 }
 0x538   : > { %3989 = vst.msk [vmem:[%s7008_s28 + $0x60] sm:$0xff] %vm466_vm1, %v3898_v11  ;;  %v4032_v7 = vsel %vm466_vm1, %v3898_v11, 0.0  ;;  %v4090_v36 = vmul.f32 %v3898_v11, %v3898_v11  ;;  %v4632_v59 = vpop.f32.mrb[18].mxu1 }
 0x539   : > { %v4033_v24 = vadd.f32 %v4032_v7, %v4031_v61  ;;  %3992 = vst.msk [vmem:[%s7008_s28 + $0x78] sm:$0xff] %vm466_vm1, %v4632_v59  ;;  %v3901_v10 = vpop.f32.mrb[19].mxu1  ;;  %v4093_v46 = vmul.f32 %v4632_v59, %v4632_v59  ;;  %v4137_v35 = vsel %vm466_vm1, %v4092_v45, 0.0  ;;  %v4038_v8 = vsel %vm466_vm1, %v4632_v59, 0.0 }
 0x53a   : > { %v4133_v17 = vsel %vm466_vm1, %v4090_v36, 0.0  ;;  %3990 = vst.msk [vmem:[%s7008_s28 + $0x68] sm:$0xff] %vm466_vm1, %v3901_v10  ;;  %v4034_v33 = vsel %vm466_vm1, %v3901_v10, 0.0  ;;  %v4091_v20 = vmul.f32 %v3901_v10, %v3901_v10 }
 0x53b   : > { %v4134_v40 = vadd.f32 %v4133_v17, %v4132_v21  ;;  %v4035_v18 = vadd.f32 %v4034_v33, %v4033_v24  ;;  %v4139_v54 = vsel %vm466_vm1, %v4093_v46, 0.0 }
 0x53c   : > { %v4135_v49 = vsel %vm466_vm1, %v4091_v20, 0.0 }
 0x53d   : > { %v4037_v41 = vadd.f32 %v4036_v48, %v4035_v18  ;;  %v4136_v62 = vadd.f32 %v4135_v49, %v4134_v40 }
 0x53f   : > { %v4138_v22 = vadd.f32 %v4137_v35, %v4136_v62  ;;  %v4039_v31 = vadd.f32 %v4038_v8, %v4037_v41 }
 0x541   : > { %v4140_v55 = vadd.f32 %v4139_v54, %v4138_v22 }
 0x556   : > { %v4635_v58 = vpop.f32.mrb[20].mxu1 }
 0x557   : > { %3995 = vst.msk [vmem:[%s7008_s28 + $0x90] sm:$0xff] %vm466_vm1, %v4635_v58  ;;  %v3914_v15 = vpop.f32.mrb[21].mxu1  ;;  %v4096_v2 = vmul.f32 %v4635_v58, %v4635_v58  ;;  %v4044_v50 = vsel %vm466_vm1, %v4635_v58, 0.0 }
 0x558   : > { %3993 = vst.msk [vmem:[%s7008_s28 + $0x80] sm:$0xff] %vm466_vm1, %v3914_v15  ;;  %v4040_v19 = vsel %vm466_vm1, %v3914_v15, 0.0  ;;  %v4094_v0 = vmul.f32 %v3914_v15, %v3914_v15  ;;  %v4636_v37 = vpop.f32.mrb[22].mxu1 }
 0x559   : > { %v4041_v14 = vadd.f32 %v4040_v19, %v4039_v31  ;;  %3996 = vst.msk [vmem:[%s7008_s28 + $0x98] sm:$0xff] %vm466_vm1, %v4636_v37  ;;  %v3917_v57 = vpop.f32.mrb[23].mxu1  ;;  %v4097_v44 = vmul.f32 %v4636_v37, %v4636_v37  ;;  %v4145_v56 = vsel %vm466_vm1, %v4096_v2, 0.0  ;;  %v4046_v12 = vsel %vm466_vm1, %v4636_v37, 0.0 }
 0x55a   : > { %v4141_v32 = vsel %vm466_vm1, %v4094_v0, 0.0  ;;  %3994 = vst.msk [vmem:[%s7008_s28 + $0x88] sm:$0xff] %vm466_vm1, %v3917_v57  ;;  %v4042_v27 = vsel %vm466_vm1, %v3917_v57, 0.0  ;;  %v4095_v30 = vmul.f32 %v3917_v57, %v3917_v57 }
 0x55b   : > { %v4142_v16 = vadd.f32 %v4141_v32, %v4140_v55  ;;  %v4043_v51 = vadd.f32 %v4042_v27, %v4041_v14  ;;  %v4147_v4 = vsel %vm466_vm1, %v4097_v44, 0.0 }
 0x55c   : > { %v4143_v60 = vsel %vm466_vm1, %v4095_v30, 0.0 }
 0x55d   : > { %v4045_v1 = vadd.f32 %v4044_v50, %v4043_v51  ;;  %v4144_v47 = vadd.f32 %v4143_v60, %v4142_v16 }
 0x55f   : > { %v4146_v52 = vadd.f32 %v4145_v56, %v4144_v47  ;;  %v4047_v9 = vadd.f32 %v4046_v12, %v4045_v1 }
 0x561   : > { %v4148_v28 = vadd.f32 %v4147_v4, %v4146_v52 }
 0x576   : > { %v4639_v5 = vpop.f32.mrb[24].mxu1 }
 0x577   : > { %3999 = vst.msk [vmem:[%s7008_s28 + $0xb0] sm:$0xff] %vm466_vm1, %v4639_v5  ;;  %v3930_v34 = vpop.f32.mrb[25].mxu1  ;;  %v4100_v53 = vmul.f32 %v4639_v5, %v4639_v5  ;;  %v4052_v61 = vsel %vm466_vm1, %v4639_v5, 0.0 }
 0x578   : > { %3997 = vst.msk [vmem:[%s7008_s28 + $0xa0] sm:$0xff] %vm466_vm1, %v3930_v34  ;;  %v4048_v29 = vsel %vm466_vm1, %v3930_v34, 0.0  ;;  %v4098_v39 = vmul.f32 %v3930_v34, %v3930_v34  ;;  %v4640_v42 = vpop.f32.mrb[26].mxu1 }
 0x579   : > { %v4049_v25 = vadd.f32 %v4048_v29, %v4047_v9  ;;  %4000 = vst.msk [vmem:[%s7008_s28 + $0xb8] sm:$0xff] %vm466_vm1, %v4640_v42  ;;  %v3933_v38 = vpop.f32.mrb[27].mxu1  ;;  %v4101_v63 = vmul.f32 %v4640_v42, %v4640_v42  ;;  %v4153_v7 = vsel %vm466_vm1, %v4100_v53, 0.0  ;;  %v4054_v36 = vsel %vm466_vm1, %v4640_v42, 0.0 }
 0x57a   : > { %v4149_v3 = vsel %vm466_vm1, %v4098_v39, 0.0  ;;  %3998 = vst.msk [vmem:[%s7008_s28 + $0xa8] sm:$0xff] %vm466_vm1, %v3933_v38  ;;  %v4050_v23 = vsel %vm466_vm1, %v3933_v38, 0.0  ;;  %v4099_v13 = vmul.f32 %v3933_v38, %v3933_v38 }
 0x57b   : > { %v4150_v26 = vadd.f32 %v4149_v3, %v4148_v28  ;;  %v4051_v6 = vadd.f32 %v4050_v23, %v4049_v25  ;;  %v4155_v10 = vsel %vm466_vm1, %v4101_v63, 0.0 }
 0x57c   : > { %v4151_v21 = vsel %vm466_vm1, %v4099_v13, 0.0 }
 0x57d   : > { %v4053_v43 = vadd.f32 %v4052_v61, %v4051_v6  ;;  %v4152_v11 = vadd.f32 %v4151_v21, %v4150_v26 }
 0x57f   : > { %v4154_v59 = vadd.f32 %v4153_v7, %v4152_v11  ;;  %v4055_v24 = vadd.f32 %v4054_v36, %v4053_v43 }
 0x581   : > { %v4156_v45 = vadd.f32 %v4155_v10, %v4154_v59 }
 0x58a   : > { %v4643_v17 = vpop.f32.mrb[28].mxu1 }
 0x58b   : > { %4003 = vst.msk [vmem:[%s7008_s28 + $0xd0] sm:$0xff] %vm466_vm1, %v4643_v17  ;;  %v3946_v33 = vpop.f32.mrb[29].mxu1  ;;  %v4104_v49 = vmul.f32 %v4643_v17, %v4643_v17  ;;  %v4060_v31 = vsel %vm466_vm1, %v4643_v17, 0.0 }
 0x58c   : > { %4001 = vst.msk [vmem:[%s7008_s28 + $0xc0] sm:$0xff] %vm466_vm1, %v3946_v33  ;;  %v4056_v20 = vsel %vm466_vm1, %v3946_v33, 0.0  ;;  %v4102_v40 = vmul.f32 %v3946_v33, %v3946_v33  ;;  %v4644_v18 = vpop.f32.mrb[30].mxu1 }
 0x58d   : > { %v4057_v48 = vadd.f32 %v4056_v20, %v4055_v24  ;;  %4004 = vst.msk [vmem:[%s7008_s28 + $0xd8] sm:$0xff] %vm466_vm1, %v4644_v18  ;;  %v3949_v46 = vpop.f32.mrb[31].mxu1  ;;  %v4105_v54 = vmul.f32 %v4644_v18, %v4644_v18  ;;  %v4161_v19 = vsel %vm466_vm1, %v4104_v49, 0.0  ;;  %v4062_v0 = vsel %vm466_vm1, %v4644_v18, 0.0 }
 0x58e   : > { %v4157_v41 = vsel %vm466_vm1, %v4102_v40, 0.0  ;;  %4002 = vst.msk [vmem:[%s7008_s28 + $0xc8] sm:$0xff] %vm466_vm1, %v3949_v46  ;;  %v4058_v62 = vsel %vm466_vm1, %v3949_v46, 0.0  ;;  %v4103_v35 = vmul.f32 %v3949_v46, %v3949_v46 }
 0x58f   : > { %v4158_v8 = vadd.f32 %v4157_v41, %v4156_v45  ;;  %v4059_v22 = vadd.f32 %v4058_v62, %v4057_v48  ;;  %v4163_v57 = vsel %vm466_vm1, %v4105_v54, 0.0 }
 0x590   : > { %v4159_v55 = vsel %vm466_vm1, %v4103_v35, 0.0 }
 0x591   : > { %v4061_v58 = vadd.f32 %v4060_v31, %v4059_v22  ;;  %v4160_v15 = vadd.f32 %v4159_v55, %v4158_v8 }
 0x593   : > { %v4162_v37 = vadd.f32 %v4161_v19, %v4160_v15  ;;  %v4063_v14 = vadd.f32 %v4062_v0, %v4061_v58 }
 0x595   : > { %v4164_v2 = vadd.f32 %v4163_v57, %v4162_v37 }
 0x597   : > { %v4647_v32 = vpop.f32.mrb[32].mxu1 }
 0x598   : > { %4007 = vst.msk [vmem:[%s7008_s28 + $0xf0] sm:$0xff] %vm466_vm1, %v4647_v32  ;;  %v3962_v27 = vpop.f32.mrb[33].mxu1  ;;  %v4108_v60 = vmul.f32 %v4647_v32, %v4647_v32  ;;  %v4068_v9 = vsel %vm466_vm1, %v4647_v32, 0.0 }
 0x599   : > { %4005 = vst.msk [vmem:[%s7008_s28 + $0xe0] sm:$0xff] %vm466_vm1, %v3962_v27  ;;  %v4064_v30 = vsel %vm466_vm1, %v3962_v27, 0.0  ;;  %v4106_v16 = vmul.f32 %v3962_v27, %v3962_v27  ;;  %v4648_v51 = vpop.f32.mrb[34].mxu1 }
 0x59a   : > { %v4065_v50 = vadd.f32 %v4064_v30, %v4063_v14  ;;  %4008 = vst.msk [vmem:[%s7008_s28 + $0xf8] sm:$0xff] %vm466_vm1, %v4648_v51  ;;  %v3965_v44 = vpop.f32.mrb[35].mxu1  ;;  %v4109_v4 = vmul.f32 %v4648_v51, %v4648_v51  ;;  %v4169_v29 = vsel %vm466_vm1, %v4108_v60, 0.0  ;;  %v4070_v39 = vsel %vm466_vm1, %v4648_v51, 0.0 }
 0x59b   : > { %v4165_v1 = vsel %vm466_vm1, %v4106_v16, 0.0  ;;  %4006 = vst.msk [vmem:[%s7008_s28 + $0xe8] sm:$0xff] %vm466_vm1, %v3965_v44  ;;  %v4066_v47 = vsel %vm466_vm1, %v3965_v44, 0.0  ;;  %v4107_v56 = vmul.f32 %v3965_v44, %v3965_v44 }
 0x59c   : > { %v4166_v12 = vadd.f32 %v4165_v1, %v4164_v2  ;;  %v4067_v52 = vadd.f32 %v4066_v47, %v4065_v50  ;;  %v4171_v38 = vsel %vm466_vm1, %v4109_v4, 0.0 }
 0x59d   : > { %v4167_v28 = vsel %vm466_vm1, %v4107_v56, 0.0 }
 0x59e   : > { %v4069_v5 = vadd.f32 %v4068_v9, %v4067_v52  ;;  %v4168_v34 = vadd.f32 %v4167_v28, %v4166_v12 }
 0x5a0   : > { %v4071_v42 = vadd.f32 %v4070_v39, %v4069_v5  ;;  %v4170_v25 = vadd.f32 %v4169_v29, %v4168_v34 }
 0x5a2   : > { %v4072_v53 = vrot.slane %v4071_v42, 4  ;;  %v4172_v3 = vadd.f32 %v4171_v38, %v4170_v25 }
 0x5a4   : > { %v4073_v23 = vadd.f32 %v4072_v53, %v4071_v42  ;;  %v4173_v13 = vrot.slane %v4172_v3, 4 }
 0x5a6   : > { %v4074_v26 = vrot.slane %v4073_v23, 2  ;;  %v4174_v6 = vadd.f32 %v4173_v13, %v4172_v3 }
 0x5a8   : > { %v4075_v61 = vadd.f32 %v4074_v26, %v4073_v23  ;;  %v4175_v63 = vrot.slane %v4174_v6, 2 }
 0x5aa   : > { %v4076_v21 = vrot.slane %v4075_v61, 1  ;;  %v4176_v43 = vadd.f32 %v4175_v63, %v4174_v6 }
 0x5ac   : > { %v4177_v11 = vrot.slane %v4176_v43, 1  ;;  %v4077_v7 = vadd.f32 %v4076_v21, %v4075_v61 }
 0x5ae   : > { %v4178_v36 = vadd.f32 %v4177_v11, %v4176_v43 }
 0x5b0   : > { %v4179_v59 = vsel %vm2342_vm7, %v4077_v7, %v4178_v36 }
 0x5b1   : > { %4181 = vst.msk [vmem:[%s282_s11] sm:$0x3] %vm4180_vm0, %v4179_v59 }
 0x5b2 PF: > { %s17_s21 = sadd.s32 1, %s5422_s21  }
 0x5b3   : > { %p14_p4 = scmp.ge.s32.totalorder %s17_s21, 4  }
 0x5b5   :  { %16 = sbr.rel (!%p14_p4) target bundleno = 1 (0x1), region = 85 }

// kernel: up_forward.4
= control target key start
LH: loop header
LB: loop body
LE: loop exit
PB: predicated region body
PF: predicated region fallthrough
CT: control target
= control target key end

     0   :  { %s3098_s15 = smov 0   ;;  %s4535_s0 = inlined_call_operand.vmem [shape: f32[2,16,16,4], index: 0, kind: input, shape index: {}]   ;;  %s4536_s1 = inlined_call_operand.vmem [shape: f32[2,4], index: 1, kind: input, shape index: {}]   ;;  %s4537_s2 = inlined_call_operand.vmem [shape: bf16[36,4], index: 2, kind: input, shape index: {}]   ;;  %s4538_s3 = inlined_call_operand.vmem [shape: f32[2,16,16,4], index: 3, kind: output, shape index: {0}]   ;;  %s4539_s4 = inlined_call_operand.vmem [shape: f32[2,2,4], index: 4, kind: output, shape index: {1}]  }
   0x1 LB: > { %s2294_s16 = sadd.s32 4294967295, %s3062_s15   ;;  %p2298_p0 = scmp.ge.s32.totalorder %s3062_s15, 1  ;;  %s3062_s15 = sphi %s3098_s15, %s15_s15  }
   0x2   : > { %p165_p1 = scmp.lt.s32.totalorder %s3062_s15, 3 }
   0x4   : > { %p166_p2 = pnand %p2298_p0, %p165_p1 }
   0x6   : > { %169 = sbr.rel (%p166_p2) target bundleno = 673 (0x2a1), region = 32 }
   0xd   : > { %vm381_vm0 = vcmask 1040384   ;;  %p195_p3 = scmp.lt.s32.totalorder %s2294_s16, 1  ;;  %v3064_v0 = vmov 0.0   ;;  %vm547_vm1 = vcmask 1046528   ;;  %vm628_vm2 = vcmask 1045504   ;;  %s3065_s25 = smov 4  }
   0xe   : > { %v3106_v1 = vrot.slane %v3064_v0, 7  ;;  %v3123_v8 = vld [vmem:[%s4536_s1] ss:$0 sm:$0xff]  ;;  %v3136_v10 = vld [vmem:[%s4536_s1 + $0x1] ss:$0 sm:$0xff]  ;;  %s3066_s26 = smov 8  }
   0xf   : > { %s4708_s16 = smov (!%p195_p3, %s2294_s16), 1  ;;  %s3067_s27 = smov 12   ;;  %vm1838_vm3 = vcmask 1041408   ;;  %vm1489_vm4 = vcmask 31744   ;;  %vm1522_vm5 = vcmask 64512   ;;  %vm1555_vm6 = vcmask 97280  }
  0x10   : > { %4601 = vst [vmem:[#allocation2_spill] sm:$0xff] %v3106_v1  ;;  %v3112_v2 = vsel %vm381_vm0, 0.0, %v3106_v1  ;;  %v498_v3 = vsel %vm381_vm0, %v3106_v1, 0.0  ;;  %v549_v4 = vrot.slane %v3106_v1, 1  ;;  %v630_v5 = vrot.slane %v3106_v1, 2  ;;  %s2327_s17 = sshll.u32 %s4708_s16, 8 }
  0x11   : > { %4602 = vst [vmem:[#allocation3_spill] sm:$0xff] %v3112_v2  ;;  %v548_v6 = vrot.slane %v3112_v2, 1  ;;  %v551_v7 = vrot.slane %v498_v3, 1  ;;  %v629_v9 = vrot.slane %v3112_v2, 2  ;;  %s3131_s22 = scalar_lea.vmem %s4535_s0, %s2327_s17  ;;  %v632_v13 = vrot.slane %v498_v3, 2  ;;  %s3068_s30 = smov 16  }
  0x12   : > { %v214_v14 = vld [vmem:[%s3131_s22 + $0x10] sm:$0xff]  ;;  %v215_v15 = vld [vmem:[%s3131_s22 + $0x18] sm:$0xff]  ;;  %v212_v16 = vld [vmem:[%s3131_s22] sm:$0xff]  ;;  %s3069_s7 = smov 20   ;;  %s3070_s10 = smov 24   ;;  %vm1588_vm7 = vcmask 130048  }
  0x13   : > { %v550_v11 = vsel %vm547_vm1, %v548_v6, %v549_v4  ;;  %v552_v12 = vsel %vm547_vm1, %v549_v4, %v551_v7  ;;  %v3144_v17 = vsel %vm628_vm2, %v629_v9, %v630_v5  ;;  %v250_v19 = vmul.f32 %v3123_v8, %v214_v14  ;;  %v213_v21 = vld [vmem:[%s3131_s22 + $0x8] sm:$0xff]  ;;  %v216_v22 = vld [vmem:[%s3131_s22 + $0x20] sm:$0xff]  ;;  %v218_v28 = vld [vmem:[%s3131_s22 + $0x30] sm:$0xff]  ;;  %s3071_s11 = smov 28   ;;  %s3072_s12 = smov 32  }
  0x14   : > { %v3146_v18 = vpack.i.bf16 %v552_v12, %v550_v11  ;;  %v251_v20 = vmul.f32 %v3123_v8, %v215_v15  ;;  %v217_v23 = vld [vmem:[%s3131_s22 + $0x28] sm:$0xff]  ;;  %v248_v24 = vmul.f32 %v3123_v8, %v212_v16  ;;  %v249_v25 = vmul.f32 %v3123_v8, %v213_v21  ;;  %v219_v29 = vld [vmem:[%s3131_s22 + $0x38] sm:$0xff]  ;;  %v220_v9 = vld [vmem:[%s3131_s22 + $0x40] sm:$0xff] }
  0x15   : > { %v252_v26 = vmul.f32 %v3123_v8, %v216_v22  ;;  %v253_v27 = vmul.f32 %v3123_v8, %v217_v23  ;;  %v286_v30 = vadd.f32 %v3136_v10, %v250_v19  ;;  %v254_v32 = vmul.f32 %v3123_v8, %v218_v28  ;;  %v221_v21 = vld [vmem:[%s3131_s22 + $0x48] sm:$0xff] }
  0x16   : > { %4603 = vst [vmem:[#allocation4_spill] sm:$0xff] %v3146_v18  ;;  %2412 = vrot.lane.b32.xlu0 %v3146_v18, %s3065_s25  ;;  %v287_v31 = vadd.f32 %v3136_v10, %v251_v20  ;;  %v255_v33 = vmul.f32 %v3123_v8, %v219_v29  ;;  %v284_v34 = vadd.f32 %v3136_v10, %v248_v24  ;;  %vm1621_vm8 = vcmask 162816  }
  0x17   : > { %v285_v35 = vadd.f32 %v3136_v10, %v249_v25  ;;  %v288_v36 = vadd.f32 %v3136_v10, %v252_v26  ;;  %v289_v37 = vadd.f32 %v3136_v10, %v253_v27  ;;  %v318_v38 = vmax.f32 %v286_v30, 0.0  ;;  %v222_v26 = vld [vmem:[%s3131_s22 + $0x50] sm:$0xff] }
  0x18   : > { %v319_v39 = vmax.f32 %v287_v31, 0.0  ;;  %v290_v40 = vadd.f32 %v3136_v10, %v254_v32  ;;  %v291_v41 = vadd.f32 %v3136_v10, %v255_v33  ;;  %v316_v42 = vmax.f32 %v284_v34, 0.0  ;;  %v223_v31 = vld [vmem:[%s3131_s22 + $0x58] sm:$0xff]  ;;  %v224_v32 = vld [vmem:[%s3131_s22 + $0x60] sm:$0xff]  ;;  %v225_v33 = vld [vmem:[%s3131_s22 + $0x68] sm:$0xff] }
  0x19   : > { %v317_v43 = vmax.f32 %v285_v35, 0.0  ;;  %v320_v44 = vmax.f32 %v288_v36, 0.0  ;;  %v321_v45 = vmax.f32 %v289_v37, 0.0  ;;  %v387_v46 = vrot.slane %v318_v38, 7 }
  0x1a   : > { %v388_v47 = vrot.slane %v319_v39, 7  ;;  %v322_v48 = vmax.f32 %v290_v40, 0.0  ;;  %v3172_v49 = vsel %vm628_vm2, %v630_v5, %v632_v13  ;;  %v384_v50 = vrot.slane %v316_v42, 7 }
  0x1b   : > { %v385_v51 = vrot.slane %v317_v43, 7  ;;  %v390_v52 = vrot.slane %v320_v44, 7  ;;  %v391_v53 = vrot.slane %v321_v45, 7  ;;  %v3178_v55 = vsel %vm381_vm0, 0.0, %v387_v46 }
  0x1c   : > { %v3175_v54 = vsel %vm381_vm0, %v387_v46, %v388_v47  ;;  %v3181_v56 = vsel %vm381_vm0, %v388_v47, 0.0  ;;  %v323_v57 = vmax.f32 %v291_v41, 0.0  ;;  %v558_v58 = vrot.slane %v3178_v55, 1  ;;  %v226_v46 = vld [vmem:[%s3131_s22 + $0x70] sm:$0xff] }
  0x1d   : > { %v559_v59 = vrot.slane %v3175_v54, 1  ;;  %v561_v60 = vrot.slane %v3181_v56, 1  ;;  %v393_v61 = vrot.slane %v322_v48, 7  ;;  %v3187_v62 = vsel %vm381_vm0, %v384_v50, %v385_v51 }
  0x1e   : > { %v3190_v63 = vsel %vm381_vm0, 0.0, %v384_v50  ;;  %v3193_v0 = vsel %vm381_vm0, %v385_v51, 0.0  ;;  %v3196_v3 = vsel %vm381_vm0, %v390_v52, %v391_v53  ;;  %v554_v7 = vrot.slane %v3187_v62, 1 }
  0x1f   : > { %v560_v4 = vsel %vm547_vm1, %v558_v58, %v559_v59  ;;  %v562_v5 = vsel %vm547_vm1, %v559_v59, %v561_v60  ;;  %v553_v6 = vrot.slane %v3190_v63, 1  ;;  %v556_v12 = vrot.slane %v3193_v0, 1 }
  0x20   : > { %v3203_v11 = vpack.i.bf16 %v562_v5, %v560_v4  ;;  %v3207_v13 = vsel %vm381_vm0, 0.0, %v390_v52  ;;  %v3210_v14 = vsel %vm381_vm0, %v391_v53, 0.0  ;;  %v564_v19 = vrot.slane %v3196_v3, 1  ;;  %v227_v52 = vld [vmem:[%s3131_s22 + $0x78] sm:$0xff] }
  0x21   : > { %v555_v15 = vsel %vm547_vm1, %v553_v6, %v554_v7  ;;  %v563_v16 = vrot.slane %v3207_v13, 1  ;;  %v566_v20 = vrot.slane %v3210_v14, 1  ;;  %v557_v22 = vsel %vm547_vm1, %v554_v7, %v556_v12 }
  0x22   : > { %2422 = vrot.lane.b32.xlu1 %v3203_v11, %s3065_s25  ;;  %v394_v23 = vrot.slane %v323_v57, 7  ;;  %v3221_v24 = vsel %vm381_vm0, 0.0, %v393_v61  ;;  %v256_v25 = vmul.f32 %v3123_v8, %v220_v9  ;;  %v3225_v27 = vpack.i.bf16 %v557_v22, %v555_v15 }
  0x23   : > { %v565_v28 = vsel %vm547_vm1, %v563_v16, %v564_v19  ;;  %v567_v29 = vsel %vm547_vm1, %v564_v19, %v566_v20  ;;  %v568_v30 = vrot.slane %v3221_v24, 1  ;;  %v257_v37 = vmul.f32 %v3123_v8, %v221_v21 }
  0x24   : > { %v3233_v34 = vpack.i.bf16 %v567_v29, %v565_v28  ;;  %v3236_v35 = vsel %vm381_vm0, %v393_v61, %v394_v23  ;;  %v3239_v36 = vsel %vm381_vm0, %v394_v23, 0.0  ;;  %2417 = vrot.lane.b32.xlu0 %v3225_v27, %s3065_s25  ;;  %v292_v40 = vadd.f32 %v3136_v10, %v256_v25 }
  0x25   : > { %v569_v38 = vrot.slane %v3236_v35, 1  ;;  %v571_v39 = vrot.slane %v3239_v36, 1  ;;  %v258_v41 = vmul.f32 %v3123_v8, %v222_v26  ;;  %v293_v42 = vadd.f32 %v3136_v10, %v257_v37 }
  0x26   : > { %4604 = vst [vmem:[#allocation5_spill] sm:$0xff] %v3233_v34  ;;  %2427 = vrot.lane.b32.xlu1 %v3233_v34, %s3065_s25  ;;  %v259_v43 = vmul.f32 %v3123_v8, %v223_v31  ;;  %v260_v44 = vmul.f32 %v3123_v8, %v224_v32  ;;  %v261_v45 = vmul.f32 %v3123_v8, %v225_v33  ;;  %v324_v50 = vmax.f32 %v292_v40, 0.0 }
  0x27   : > { %v570_v47 = vsel %vm547_vm1, %v568_v30, %v569_v38  ;;  %v572_v48 = vsel %vm547_vm1, %v569_v38, %v571_v39  ;;  %v294_v51 = vadd.f32 %v3136_v10, %v258_v41  ;;  %v325_v57 = vmax.f32 %v293_v42, 0.0 }
  0x28   : > { %v3259_v53 = vpack.i.bf16 %v572_v48, %v570_v47  ;;  %v295_v58 = vadd.f32 %v3136_v10, %v259_v43  ;;  %v296_v59 = vadd.f32 %v3136_v10, %v260_v44  ;;  %v396_v60 = vrot.slane %v324_v50, 7  ;;  %v229_v47 = vld [vmem:[%s3131_s22 + $0x88] sm:$0xff]  ;;  %v230_v48 = vld [vmem:[%s3131_s22 + $0x90] sm:$0xff] }
  0x29   : > { %v326_v61 = vmax.f32 %v294_v51, 0.0  ;;  %v297_v4 = vadd.f32 %v3136_v10, %v261_v45  ;;  %v262_v5 = vmul.f32 %v3123_v8, %v226_v46  ;;  %v397_v6 = vrot.slane %v325_v57, 7  ;;  %v228_v46 = vld [vmem:[%s3131_s22 + $0x80] sm:$0xff] }
  0x2a   : > { %4605 = vst [vmem:[#allocation6_spill] sm:$0xff] %v3259_v53  ;;  %2432 = vrot.lane.b32.xlu0 %v3259_v53, %s3065_s25  ;;  %v327_v7 = vmax.f32 %v295_v58, 0.0  ;;  %v328_v9 = vmax.f32 %v296_v59, 0.0  ;;  %v263_v12 = vmul.f32 %v3123_v8, %v227_v52  ;;  %v3269_v15 = vsel %vm381_vm0, 0.0, %v396_v60  ;;  %v231_v58 = vld [vmem:[%s3131_s22 + $0x98] sm:$0xff] }
  0x2b   : > { %v399_v16 = vrot.slane %v326_v61, 7  ;;  %v329_v19 = vmax.f32 %v297_v4, 0.0  ;;  %v298_v20 = vadd.f32 %v3136_v10, %v262_v5  ;;  %v3273_v21 = vsel %vm381_vm0, %v396_v60, %v397_v6 }
  0x2c   : > { %v3276_v22 = vsel %vm381_vm0, %v397_v6, 0.0  ;;  %v573_v23 = vrot.slane %v3269_v15, 1  ;;  %v400_v25 = vrot.slane %v327_v7, 7  ;;  %v574_v26 = vrot.slane %v3273_v21, 1 }
  0x2d   : > { %v576_v28 = vrot.slane %v3276_v22, 1  ;;  %v3282_v29 = vsel %vm381_vm0, 0.0, %v399_v16  ;;  %v402_v30 = vrot.slane %v328_v9, 7  ;;  %v403_v37 = vrot.slane %v329_v19, 7 }
  0x2e   : > { %4606 = vst [vmem:[#allocation7_spill] sm:$0xff] %v3282_v29  ;;  %v3285_v31 = vsel %vm381_vm0, %v399_v16, %v400_v25  ;;  %v3288_v32 = vsel %vm381_vm0, %v400_v25, 0.0  ;;  %v578_v33 = vrot.slane %v3282_v29, 1  ;;  %v575_v38 = vsel %vm547_vm1, %v573_v23, %v574_v26  ;;  %v232_v16 = vld [vmem:[%s3131_s22 + $0xa0] sm:$0xff] }
  0x2f   : > { %4607 = vst [vmem:[#allocation8_spill] sm:$0xff] %v3285_v31  ;;  %v577_v39 = vsel %vm547_vm1, %v574_v26, %v576_v28  ;;  %v579_v40 = vrot.slane %v3285_v31, 1  ;;  %v581_v41 = vrot.slane %v3288_v32, 1  ;;  %v3298_v43 = vsel %vm381_vm0, %v402_v30, %v403_v37 }
  0x30   : > { %v3295_v42 = vpack.i.bf16 %v577_v39, %v575_v38  ;;  %4609 = vst [vmem:[#allocation10_spill] sm:$0xff] %v3298_v43  ;;  %v3301_v44 = vsel %vm381_vm0, 0.0, %v402_v30  ;;  %v3304_v45 = vsel %vm381_vm0, %v403_v37, 0.0  ;;  %v584_v57 = vrot.slane %v3298_v43, 1 }
  0x31   : > { %4610 = vst [vmem:[#allocation11_spill] sm:$0xff] %v3301_v44  ;;  %v580_v50 = vsel %vm547_vm1, %v578_v33, %v579_v40  ;;  %v582_v51 = vsel %vm547_vm1, %v579_v40, %v581_v41  ;;  %v583_v52 = vrot.slane %v3301_v44, 1  ;;  %v586_v60 = vrot.slane %v3304_v45, 1  ;;  %v233_v33 = vld [vmem:[%s3131_s22 + $0xa8] sm:$0xff] }
  0x32   : > { %4608 = vst [vmem:[#allocation9_spill] sm:$0xff] %v3295_v42  ;;  %2437 = vrot.lane.b32.xlu1 %v3295_v42, %s3065_s25  ;;  %v3316_v59 = vpack.i.bf16 %v582_v51, %v580_v50  ;;  %v299_v61 = vadd.f32 %v3136_v10, %v263_v12  ;;  %v330_v4 = vmax.f32 %v298_v20, 0.0  ;;  %v264_v6 = vmul.f32 %v3123_v8, %v228_v46 }
  0x33   : > { %v585_v5 = vsel %vm547_vm1, %v583_v52, %v584_v57  ;;  %v265_v7 = vmul.f32 %v3123_v8, %v229_v47  ;;  %v266_v9 = vmul.f32 %v3123_v8, %v230_v48  ;;  %v587_v19 = vsel %vm547_vm1, %v584_v57, %v586_v60 }
  0x34   : > { %4611 = vst [vmem:[#allocation12_spill] sm:$0xff] %v3316_v59  ;;  %2442 = vrot.lane.b32.xlu0 %v3316_v59, %s3065_s25  ;;  %v331_v23 = vmax.f32 %v299_v61, 0.0  ;;  %v405_v25 = vrot.slane %v330_v4, 7  ;;  %v267_v12 = vmul.f32 %v3123_v8, %v231_v58  ;;  %v3329_v26 = vpack.i.bf16 %v587_v19, %v585_v5 }
  0x35   : > { %v300_v20 = vadd.f32 %v3136_v10, %v264_v6  ;;  %v301_v28 = vadd.f32 %v3136_v10, %v265_v7  ;;  %v302_v30 = vadd.f32 %v3136_v10, %v266_v9  ;;  %v268_v40 = vmul.f32 %v3123_v8, %v232_v16 }
  0x36   : > { %4612 = vst [vmem:[#allocation13_spill] sm:$0xff] %v3329_v26  ;;  %v406_v37 = vrot.slane %v331_v23, 7  ;;  %v3336_v38 = vsel %vm381_vm0, 0.0, %v405_v25  ;;  %v303_v39 = vadd.f32 %v3136_v10, %v267_v12  ;;  %2447 = vrot.lane.b32.xlu1 %v3329_v26, %s3065_s25  ;;  %v269_v57 = vmul.f32 %v3123_v8, %v233_v33  ;;  %v234_v33 = vld [vmem:[%s3131_s22 + $0xb0] sm:$0xff]  ;;  %v240_v26 = vld [vmem:[%s3131_s22 + $0xe0] sm:$0xff] }
  0x37   : > { %4613 = vst [vmem:[#allocation14_spill] sm:$0xff] %v3336_v38  ;;  %v588_v41 = vrot.slane %v3336_v38, 1  ;;  %v332_v46 = vmax.f32 %v300_v20, 0.0  ;;  %v333_v47 = vmax.f32 %v301_v28, 0.0  ;;  %v334_v48 = vmax.f32 %v302_v30, 0.0 }
  0x38   : > { %v3344_v50 = vsel %vm381_vm0, %v405_v25, %v406_v37  ;;  %v3347_v51 = vsel %vm381_vm0, %v406_v37, 0.0  ;;  %v335_v52 = vmax.f32 %v303_v39, 0.0  ;;  %v304_v7 = vadd.f32 %v3136_v10, %v268_v40 }
  0x39   : > { %4614 = vst [vmem:[#allocation15_spill] sm:$0xff] %v3344_v50  ;;  %v589_v58 = vrot.slane %v3344_v50, 1  ;;  %v591_v60 = vrot.slane %v3347_v51, 1  ;;  %v408_v61 = vrot.slane %v332_v46, 7  ;;  %v409_v4 = vrot.slane %v333_v47, 7  ;;  %v235_v46 = vld [vmem:[%s3131_s22 + $0xb8] sm:$0xff] }
  0x3a   : > { %v411_v5 = vrot.slane %v334_v48, 7  ;;  %v412_v6 = vrot.slane %v335_v52, 7  ;;  %v305_v9 = vadd.f32 %v3136_v10, %v269_v57  ;;  %v271_v2 = vmul.f32 %v3123_v8, %v235_v46 }
  0x3b   : > { %v590_v16 = vsel %vm547_vm1, %v588_v41, %v589_v58  ;;  %v592_v19 = vsel %vm547_vm1, %v589_v58, %v591_v60  ;;  %v3357_v23 = vsel %vm381_vm0, %v408_v61, %v409_v4  ;;  %v3360_v25 = vsel %vm381_vm0, 0.0, %v408_v61 }
  0x3c   : > { %4615 = vst [vmem:[#allocation16_spill] sm:$0xff] %v3357_v23  ;;  %4616 = vst [vmem:[#allocation17_spill] sm:$0xff] %v3360_v25  ;;  %v3362_v12 = vpack.i.bf16 %v592_v19, %v590_v16  ;;  %v3365_v20 = vsel %vm381_vm0, %v409_v4, 0.0  ;;  %v593_v28 = vrot.slane %v3360_v25, 1  ;;  %v594_v30 = vrot.slane %v3357_v23, 1  ;;  %v238_v16 = vld [vmem:[%s3131_s22 + $0xd0] sm:$0xff] }
  0x3d   : > { %v596_v37 = vrot.slane %v3365_v20, 1  ;;  %v3372_v39 = vsel %vm381_vm0, %v411_v5, %v412_v6  ;;  %v3375_v40 = vsel %vm381_vm0, 0.0, %v411_v5  ;;  %v3378_v41 = vsel %vm381_vm0, %v412_v6, 0.0  ;;  %v236_v5 = vld [vmem:[%s3131_s22 + $0xc0] sm:$0xff]  ;;  %v237_v6 = vld [vmem:[%s3131_s22 + $0xc8] sm:$0xff] }
  0x3e   : > { %4617 = vst [vmem:[#allocation18_spill] sm:$0xff] %v3362_v12  ;;  %4618 = vst [vmem:[#allocation19_spill] sm:$0xff] %v3372_v39  ;;  %2452 = vrot.lane.b32.xlu0 %v3362_v12, %s3065_s25  ;;  %v595_v47 = vsel %vm547_vm1, %v593_v28, %v594_v30  ;;  %v598_v48 = vrot.slane %v3375_v40, 1  ;;  %v599_v52 = vrot.slane %v3372_v39, 1  ;;  %v601_v57 = vrot.slane %v3378_v41, 1 }
  0x3f   : > { %4619 = vst [vmem:[#allocation20_spill] sm:$0xff] %v3375_v40  ;;  %v597_v58 = vsel %vm547_vm1, %v594_v30, %v596_v37  ;;  %v336_v60 = vmax.f32 %v304_v7, 0.0  ;;  %v337_v61 = vmax.f32 %v305_v9, 0.0  ;;  %v270_v4 = vmul.f32 %v3123_v8, %v234_v33 }
  0x40   : > { %v3392_v19 = vpack.i.bf16 %v597_v58, %v595_v47  ;;  %v600_v28 = vsel %vm547_vm1, %v598_v48, %v599_v52  ;;  %v602_v18 = vsel %vm547_vm1, %v599_v52, %v601_v57  ;;  %v307_v9 = vadd.f32 %v3136_v10, %v271_v2  ;;  %v239_v47 = vld [vmem:[%s3131_s22 + $0xd8] sm:$0xff] }
  0x41   : > { %v3397_v1 = vpack.i.bf16 %v602_v18, %v600_v28  ;;  %v414_v12 = vrot.slane %v336_v60, 7  ;;  %v415_v30 = vrot.slane %v337_v61, 7  ;;  %v306_v7 = vadd.f32 %v3136_v10, %v270_v4 }
  0x42   : > { %4620 = vst [vmem:[#allocation21_spill] sm:$0xff] %v3392_v19  ;;  %2457 = vrot.lane.b32.xlu1 %v3392_v19, %s3065_s25  ;;  %v272_v33 = vmul.f32 %v3123_v8, %v236_v5  ;;  %v273_v37 = vmul.f32 %v3123_v8, %v237_v6  ;;  %v274_v48 = vmul.f32 %v3123_v8, %v238_v16  ;;  %v339_v61 = vmax.f32 %v307_v9, 0.0 }
  0x43   : > { %4621 = vst [vmem:[#allocation22_spill] sm:$0xff] %v3397_v1  ;;  %2462 = vrot.lane.b32.xlu0 %v3397_v1, %s3065_s25  ;;  %v3410_v18 = vsel %vm381_vm0, %v414_v12, %v415_v30  ;;  %v3413_v46 = vsel %vm381_vm0, 0.0, %v414_v12  ;;  %v3416_v52 = vsel %vm381_vm0, %v415_v30, 0.0  ;;  %v338_v2 = vmax.f32 %v306_v7, 0.0 }
  0x44   : > { %4622 = vst [vmem:[#allocation23_spill] sm:$0xff] %v3410_v18  ;;  %4623 = vst [vmem:[#allocation24_spill] sm:$0xff] %v3413_v46  ;;  %v603_v57 = vrot.slane %v3413_v46, 1  ;;  %v604_v58 = vrot.slane %v3410_v18, 1  ;;  %v606_v60 = vrot.slane %v3416_v52, 1  ;;  %v308_v5 = vadd.f32 %v3136_v10, %v272_v33  ;;  %v241_v33 = vld [vmem:[%s3131_s22 + $0xe8] sm:$0xff] }
  0x45   : > { %v417_v4 = vrot.slane %v338_v2, 7  ;;  %v309_v6 = vadd.f32 %v3136_v10, %v273_v37  ;;  %v275_v12 = vmul.f32 %v3123_v8, %v239_v47  ;;  %v418_v30 = vrot.slane %v339_v61, 7 }
  0x46   : > { %v605_v16 = vsel %vm547_vm1, %v603_v57, %v604_v58  ;;  %v607_v28 = vsel %vm547_vm1, %v604_v58, %v606_v60  ;;  %v310_v7 = vadd.f32 %v3136_v10, %v274_v48  ;;  %v340_v9 = vmax.f32 %v308_v5, 0.0 }
  0x47   : > { %v3427_v1 = vpack.i.bf16 %v607_v28, %v605_v16  ;;  %v3430_v19 = vsel %vm381_vm0, 0.0, %v417_v4  ;;  %v341_v2 = vmax.f32 %v309_v6, 0.0  ;;  %v3435_v37 = vsel %vm381_vm0, %v417_v4, %v418_v30 }
  0x48   : > { %4625 = vst [vmem:[#allocation26_spill] sm:$0xff] %v3430_v19  ;;  %4626 = vst [vmem:[#allocation27_spill] sm:$0xff] %v3435_v37  ;;  %v3438_v47 = vsel %vm381_vm0, %v418_v30, 0.0  ;;  %v608_v57 = vrot.slane %v3430_v19, 1  ;;  %v311_v58 = vadd.f32 %v3136_v10, %v275_v12  ;;  %v609_v48 = vrot.slane %v3435_v37, 1 }
  0x49   : > { %4624 = vst [vmem:[#allocation25_spill] sm:$0xff] %v3427_v1  ;;  %2467 = vrot.lane.b32.xlu1 %v3427_v1, %s3065_s25  ;;  %v611_v60 = vrot.slane %v3438_v47, 1  ;;  %v420_v61 = vrot.slane %v340_v9, 7  ;;  %v421_v5 = vrot.slane %v341_v2, 7  ;;  %v342_v6 = vmax.f32 %v310_v7, 0.0 }
  0x4a   : > { %v343_v16 = vmax.f32 %v311_v58, 0.0  ;;  %v276_v4 = vmul.f32 %v3123_v8, %v240_v26  ;;  %v277_v28 = vmul.f32 %v3123_v8, %v241_v33  ;;  %v610_v30 = vsel %vm547_vm1, %v608_v57, %v609_v48 }
  0x4b   : > { %v612_v59 = vsel %vm547_vm1, %v609_v48, %v611_v60  ;;  %v3451_v12 = vsel %vm381_vm0, %v420_v61, %v421_v5  ;;  %v3454_v1 = vsel %vm381_vm0, 0.0, %v420_v61  ;;  %v3459_v9 = vsel %vm381_vm0, %v421_v5, 0.0 }
  0x4c   : > { %4627 = vst [vmem:[#allocation28_spill] sm:$0xff] %v3451_v12  ;;  %4628 = vst [vmem:[#allocation29_spill] sm:$0xff] %v3454_v1  ;;  %v3456_v42 = vpack.i.bf16 %v612_v59, %v610_v30  ;;  %v613_v7 = vrot.slane %v3454_v1, 1  ;;  %v614_v26 = vrot.slane %v3451_v12, 1  ;;  %v616_v8 = vrot.slane %v3459_v9, 1 }
  0x4d   : > { %v423_v2 = vrot.slane %v342_v6, 7  ;;  %v424_v33 = vrot.slane %v343_v16, 7  ;;  %v312_v57 = vadd.f32 %v3136_v10, %v276_v4  ;;  %v313_v59 = vadd.f32 %v3136_v10, %v277_v28 }
  0x4e   : > { %4629 = vst [vmem:[#allocation30_spill] sm:$0xff] %v3456_v42  ;;  %2472 = vrot.lane.b32.xlu0 %v3456_v42, %s3065_s25  ;;  %v615_v58 = vsel %vm547_vm1, %v613_v7, %v614_v26  ;;  %v3471_v48 = vpack.i.bf16 %v3172_v49, %v3144_v17  ;;  %v617_v60 = vsel %vm547_vm1, %v614_v26, %v616_v8  ;;  %v634_v30 = vrot.slane %v3190_v63, 2 }
  0x4f   : > { %v3475_v61 = vsel %vm381_vm0, %v423_v2, %v424_v33  ;;  %v3478_v5 = vsel %vm381_vm0, 0.0, %v423_v2  ;;  %v3481_v6 = vsel %vm381_vm0, %v424_v33, 0.0  ;;  %v3483_v16 = vpack.i.bf16 %v617_v60, %v615_v58 }
  0x50   : > { %4630 = vst [vmem:[#allocation31_spill] sm:$0xff] %v3471_v48  ;;  %v618_v4 = vrot.slane %v3478_v5, 1  ;;  %v619_v10 = vrot.slane %v3475_v61, 1  ;;  %v621_v17 = vrot.slane %v3481_v6, 1  ;;  %v344_v49 = vmax.f32 %v312_v57, 0.0 }
  0x51   : > { %4631 = vst [vmem:[#allocation32_spill] sm:$0xff] %v3483_v16  ;;  %v345_v28 = vmax.f32 %v313_v59, 0.0  ;;  %v635_v7 = vrot.slane %v3187_v62, 2  ;;  %2477 = vrot.lane.b32.xlu1 %v3483_v16, %s3065_s25  ;;  %v637_v2 = vrot.slane %v3193_v0, 2  ;;  %v639_v33 = vrot.slane %v3178_v55, 2 }
  0x52   : > { %v620_v26 = vsel %vm547_vm1, %v618_v4, %v619_v10  ;;  %v622_v8 = vsel %vm547_vm1, %v619_v10, %v621_v17  ;;  %v642_v58 = vrot.slane %v3181_v56, 2  ;;  %v426_v57 = vrot.slane %v344_v49, 7 }
  0x53   : > { %v3497_v60 = vpack.i.bf16 %v622_v8, %v620_v26  ;;  %v427_v59 = vrot.slane %v345_v28, 7  ;;  %v636_v42 = vsel %vm628_vm2, %v634_v30, %v635_v7  ;;  %v640_v53 = vrot.slane %v3175_v54, 2 }
  0x54   : > { %v3507_v0 = vsel %vm381_vm0, 0.0, %v426_v57  ;;  %v638_v56 = vsel %vm628_vm2, %v635_v7, %v637_v2  ;;  %v644_v8 = vrot.slane %v3207_v13, 2  ;;  %v647_v2 = vrot.slane %v3210_v14, 2 }
  0x55   : > { %4632 = vst [vmem:[#allocation33_spill] sm:$0xff] %v3497_v60  ;;  %2482 = vrot.lane.b32.xlu0 %v3497_v60, %s3065_s25  ;;  %v3504_v4 = vsel %vm381_vm0, %v426_v57, %v427_v59  ;;  %v3510_v10 = vsel %vm381_vm0, %v427_v59, 0.0  ;;  %v623_v17 = vrot.slane %v3507_v0, 1  ;;  %v641_v30 = vsel %vm628_vm2, %v639_v33, %v640_v53 }
  0x56   : > { %v624_v49 = vrot.slane %v3504_v4, 1  ;;  %v626_v28 = vrot.slane %v3510_v10, 1  ;;  %v643_v26 = vsel %vm628_vm2, %v640_v53, %v642_v58  ;;  %v645_v57 = vrot.slane %v3196_v3, 2 }
  0x57   : > { %v649_v60 = vrot.slane %v3221_v24, 2  ;;  %v650_v16 = vrot.slane %v3236_v35, 2  ;;  %v3529_v53 = vpack.i.bf16 %v643_v26, %v641_v30  ;;  %v652_v33 = vrot.slane %v3239_v36, 2 }
  0x58   : > { %v625_v59 = vsel %vm547_vm1, %v623_v17, %v624_v49  ;;  %v627_v7 = vsel %vm547_vm1, %v624_v49, %v626_v28  ;;  %v3532_v58 = vpack.i.bf16 %v638_v56, %v636_v42  ;;  %v654_v49 = vrot.slane %v3269_v15, 2 }
  0x59   : > { %v3525_v34 = vpack.i.bf16 %v627_v7, %v625_v59  ;;  %2492 = vrot.lane.b32.xlu0 %v3471_v48, %s3066_s26  ;;  %v651_v17 = vsel %vm628_vm2, %v649_v60, %v650_v16  ;;  %v655_v14 = vrot.slane %v3273_v21, 2  ;;  %v653_v28 = vsel %vm628_vm2, %v650_v16, %v652_v33 }
  0x5a   : > { %v659_v59 = vrot.slane %v3282_v29, 2  ;;  %v660_v30 = vrot.slane %v3285_v31, 2  ;;  %v662_v26 = vrot.slane %v3288_v32, 2  ;;  %v646_v36 = vsel %vm628_vm2, %v644_v8, %v645_v57 }
  0x5b   : > { %2487 = vrot.lane.b32.xlu1 %v3525_v34, %s3065_s25  ;;  %v648_v42 = vsel %vm628_vm2, %v645_v57, %v647_v2  ;;  %v657_v60 = vrot.slane %v3276_v22, 2  ;;  %v3548_v56 = vpack.i.bf16 %v653_v28, %v651_v17  ;;  %v669_v33 = vrot.slane %v3336_v38, 2 }
  0x5c   : > { %v661_v7 = vsel %vm628_vm2, %v659_v59, %v660_v30  ;;  %v663_v16 = vsel %vm628_vm2, %v660_v30, %v662_v26  ;;  %v670_v48 = vrot.slane %v3344_v50, 2  ;;  %v3556_v32 = vpack.i.bf16 %v648_v42, %v646_v36 }
  0x5d   : > { %2502 = vrot.lane.b32.xlu0 %v3529_v53, %s3066_s26  ;;  %v656_v22 = vsel %vm628_vm2, %v654_v49, %v655_v14  ;;  %v672_v8 = vrot.slane %v3347_v51, 2  ;;  %v658_v57 = vsel %vm628_vm2, %v655_v14, %v657_v60  ;;  %v664_v2 = vrot.slane %v3301_v44, 2 }
  0x5e   : > { %v665_v17 = vrot.slane %v3298_v43, 2  ;;  %v667_v28 = vrot.slane %v3304_v45, 2  ;;  %v3566_v59 = vpack.i.bf16 %v663_v16, %v661_v7  ;;  %v671_v30 = vsel %vm628_vm2, %v669_v33, %v670_v48 }
  0x5f   : > { %2497 = vrot.lane.b32.xlu1 %v3532_v58, %s3066_s26  ;;  %v673_v26 = vsel %vm628_vm2, %v670_v48, %v672_v8  ;;  %v679_v49 = vrot.slane %v3375_v40, 2  ;;  %v680_v51 = vrot.slane %v3372_v39, 2  ;;  %v682_v14 = vrot.slane %v3378_v41, 2 }
  0x60   : > { %v3575_v36 = vpack.i.bf16 %v658_v57, %v656_v22  ;;  %v674_v45 = vrot.slane %v3360_v25, 2  ;;  %v675_v42 = vrot.slane %v3357_v23, 2  ;;  %v666_v60 = vsel %vm628_vm2, %v664_v2, %v665_v17 }
  0x61   : > { %2512 = vrot.lane.b32.xlu0 %v3548_v56, %s3066_s26  ;;  %v668_v7 = vsel %vm628_vm2, %v665_v17, %v667_v28  ;;  %v677_v48 = vrot.slane %v3365_v20, 2  ;;  %v3584_v16 = vpack.i.bf16 %v673_v26, %v671_v30  ;;  %v689_v41 = vrot.slane %v3430_v19, 2 }
  0x62   : > { %v690_v33 = vrot.slane %v3435_v37, 2  ;;  %v681_v22 = vsel %vm628_vm2, %v679_v49, %v680_v51  ;;  %v683_v8 = vsel %vm628_vm2, %v680_v51, %v682_v14  ;;  %v692_v57 = vrot.slane %v3438_v47, 2 }
  0x63   : > { %2507 = vrot.lane.b32.xlu1 %v3556_v32, %s3066_s26  ;;  %v3593_v2 = vpack.i.bf16 %v668_v7, %v666_v60  ;;  %v676_v20 = vsel %vm628_vm2, %v674_v45, %v675_v42  ;;  %v678_v17 = vsel %vm628_vm2, %v675_v42, %v677_v48  ;;  %v684_v28 = vrot.slane %v3413_v46, 2 }
  0x64   : > { %v685_v30 = vrot.slane %v3410_v18, 2  ;;  %v687_v26 = vrot.slane %v3416_v52, 2  ;;  %v3602_v49 = vpack.i.bf16 %v683_v8, %v681_v22  ;;  %v691_v47 = vsel %vm628_vm2, %v689_v41, %v690_v33 }
  0x65   : > { %2522 = vrot.lane.b32.xlu0 %v3566_v59, %s3066_s26  ;;  %v693_v51 = vsel %vm628_vm2, %v690_v33, %v692_v57  ;;  %v699_v14 = vrot.slane %v3478_v5, 2  ;;  %v700_v45 = vrot.slane %v3475_v61, 2  ;;  %v702_v42 = vrot.slane %v3481_v6, 2 }
  0x66   : > { %v3611_v60 = vpack.i.bf16 %v678_v17, %v676_v20  ;;  %v694_v52 = vrot.slane %v3454_v1, 2  ;;  %v695_v7 = vrot.slane %v3451_v12, 2  ;;  %v686_v48 = vsel %vm628_vm2, %v684_v28, %v685_v30 }
  0x67   : > { %2517 = vrot.lane.b32.xlu1 %v3575_v36, %s3066_s26  ;;  %v688_v41 = vsel %vm628_vm2, %v685_v30, %v687_v26  ;;  %v697_v33 = vrot.slane %v3459_v9, 2  ;;  %v3620_v22 = vpack.i.bf16 %v693_v51, %v691_v47  ;;  %v701_v6 = vsel %vm628_vm2, %v699_v14, %v700_v45 }
  0x68   : > { %v703_v8 = vsel %vm628_vm2, %v700_v45, %v702_v42  ;;  %v3626_v57 = vpack.i.bf16 %v688_v41, %v686_v48  ;;  %v696_v20 = vsel %vm628_vm2, %v694_v52, %v695_v7  ;;  %v704_v17 = vrot.slane %v3507_v0, 2 }
  0x69   : > { %2532 = vrot.lane.b32.xlu0 %v3584_v16, %s3066_s26  ;;  %v705_v9 = vrot.slane %v3504_v4, 2  ;;  %v698_v28 = vsel %vm628_vm2, %v695_v7, %v697_v33  ;;  %v707_v30 = vrot.slane %v3510_v10, 2  ;;  %v3635_v26 = vpack.i.bf16 %v703_v8, %v701_v6  ;;  %v3051_v6 = vld [vmem:[%s4537_s2] sm:$0xff]   ;;  %v3052_v8 = vld [vmem:[%s4537_s2 + $0x8] sm:$0xff]  }
  0x6a   : > { %v3639_v47 = vpack.i.bf16 %v698_v28, %v696_v20  ;;  %v2571_v10 = vpack.i.bf16 %v3187_v62, %v3190_v63  ;;  %v2581_v42 = vpack.i.bf16 %v3196_v3, %v3207_v13  ;;  %v2576_v52 = vpack.i.bf16 %v3175_v54, %v3178_v55  ;;  %2348 = vmatprep.subr.bf16.mxu0 %v3051_v6  ;;  %v3053_v20 = vld [vmem:[%s4537_s2 + $0x10] ss:$0 sps:$4 sm:$0x33]  }
  0x6b   : > { %2527 = vrot.lane.b32.xlu1 %v3593_v2, %s3066_s26  ;;  %v706_v51 = vsel %vm628_vm2, %v704_v17, %v705_v9  ;;  %v708_v14 = vsel %vm628_vm2, %v705_v9, %v707_v30  ;;  %v2591_v7 = vpack.i.bf16 %v3273_v21, %v3269_v15  ;;  %v2586_v48 = vpack.i.bf16 %v3236_v35, %v3221_v24 }
  0x6c   : > { %v3649_v45 = vpack.i.bf16 %v708_v14, %v706_v51  ;;  %v2601_v41 = vpack.i.bf16 %v3298_v43, %v3301_v44  ;;  %v2596_v33 = vpack.i.bf16 %v3285_v31, %v3282_v29  ;;  %2386 = vmatprep.subr.bf16.mxu1 %v3051_v6  ;;  %2349 = vmatpush3.bf16.msra.mxu0 %v3051_v6  ;;  %v1840_v17 = vsel %vm1838_vm3, %v3053_v20, 0 }
  0x6d   : > { %2542 = vrot.lane.b32.xlu0 %v3602_v49, %s3066_s26  ;;  %2389 = vmatpush3.bf16.msra.mxu1 %v3051_v6  ;;  %vm1654_vm9 = vcmask 195584   ;;  %vm1687_vm10 = vcmask 228352   ;;  %vm1720_vm11 = vcmask 261120   ;;  %vm1789_vm12 = vcmask 293888  }
  0x6e   : > { %2350 = vmatprep.subr.bf16.mxu0 %v3052_v8  ;;  %2387 = vmatprep.subr.bf16.mxu1 %v3052_v8  ;;  %vm2206_vm13 = vcmask 25600  }
  0x6f   : > { %2537 = vrot.lane.b32.xlu1 %v3611_v60, %s3066_s26 }
  0x70   : > { %2351 = vmatpush3.bf16.msra.mxu0 %v3052_v8 }
  0x71   : > { %2552 = vrot.lane.b32.xlu0 %v3620_v22, %s3066_s26  ;;  %2390 = vmatpush3.bf16.msra.mxu1 %v3052_v8 }
  0x72   : > { %2392 = vmatprep.subr.msk.bf16.mxu0 %vm1838_vm3, %v3053_v20  ;;  %2393 = vmatprep.subr.msk.bf16.mxu1 %vm1838_vm3, %v3053_v20  ;;  %v4644_v20 = vld [vmem:[#allocation18_spill] sm:$0xff] }
  0x73   : > { %2547 = vrot.lane.b32.xlu1 %v3626_v57, %s3066_s26 }
  0x74   : > { %2353 = vmatpush3.bf16.msra.mxu0 %v1840_v17 }
  0x75   : > { %2562 = vrot.lane.b32.xlu0 %v3635_v26, %s3066_s26  ;;  %2391 = vmatpush3.bf16.msra.mxu1 %v1840_v17 }
  0x77   : > { %2557 = vrot.lane.b32.xlu1 %v3639_v47, %s3066_s26 }
  0x79   : > { %2572 = vrot.lane.b32.xlu0 %v2571_v10, %s3067_s27  ;;  %v4636_v10 = vld [vmem:[#allocation12_spill] sm:$0xff] }
  0x7b   : > { %2567 = vrot.lane.b32.xlu1 %v3649_v45, %s3066_s26 }
  0x7d   : > { %2582 = vrot.lane.b32.xlu0 %v2581_v42, %s3067_s27 }
  0x7f   : > { %2577 = vrot.lane.b32.xlu1 %v2576_v52, %s3067_s27 }
  0x81   : > { %2592 = vrot.lane.b32.xlu0 %v2591_v7, %s3067_s27 }
  0x83   : > { %2587 = vrot.lane.b32.xlu1 %v2586_v48, %s3067_s27 }
  0x85   : > { %2602 = vrot.lane.b32.xlu0 %v2601_v41, %s3067_s27 }
  0x87   : > { %2597 = vrot.lane.b32.xlu1 %v2596_v33, %s3067_s27 }
  0x88   : > { %v3701_v9 = vpop.permute.xlu0 %2412 }
  0x89   : > { %2612 = vrot.lane.b32.xlu0 %v3203_v11, %s3068_s30 }
  0x8b   : > { %2607 = vrot.lane.b32.xlu1 %v3225_v27, %s3068_s30  ;;  %v4633_v27 = vld [vmem:[#allocation5_spill] sm:$0xff] }
  0x8d   : > { %2622 = vrot.lane.b32.xlu0 %v3529_v53, %s3069_s7 }
  0x8f   : > { %2617 = vrot.lane.b32.xlu1 %v3532_v58, %s3069_s7  ;;  %v4634_v58 = vld [vmem:[#allocation6_spill] sm:$0xff] }
  0x91   : > { %2632 = vrot.lane.b32.xlu0 %v2581_v42, %s3070_s10 }
  0x93   : > { %2627 = vrot.lane.b32.xlu1 %v2576_v52, %s3070_s10 }
  0x95   : > { %2642 = vrot.lane.b32.xlu0 %v4633_v27, %s3071_s11 }
  0x96   : > { %v3711_v28 = vpop.permute.xlu0 %2417 }
  0x97   : > { %2637 = vrot.lane.b32.xlu1 %v3203_v11, %s3071_s11  ;;  %v3709_v11 = vpop.permute.xlu1 %2422 }
  0x99   : > { %2652 = vrot.lane.b32.xlu0 %v3556_v32, %s3072_s12 }
  0x9b   : > { %2647 = vrot.lane.b32.xlu1 %v3529_v53, %s3072_s12  ;;  %v4635_v53 = vld [vmem:[#allocation9_spill] sm:$0xff]  ;;  %v3717_v30 = vpop.permute.xlu1 %2427 }
  0x9c   : > { %v3719_v51 = vpop.permute.xlu0 %2432 }
  0x9d   : > { %2662 = vrot.lane.b32.xlu0 %v4634_v58, %s3068_s30 }
  0x9f   : > { %2657 = vrot.lane.b32.xlu1 %v4633_v27, %s3068_s30 }
  0xa1   : > { %2672 = vrot.lane.b32.xlu0 %v3548_v56, %s3069_s7 }
  0xa3   : > { %2667 = vrot.lane.b32.xlu1 %v3556_v32, %s3069_s7 }
  0xa4   : > { %v3727_v32 = vpop.permute.xlu1 %2437 }
  0xa5   : > { %2682 = vrot.lane.b32.xlu0 %v2591_v7, %s3070_s10 }
  0xa6   : > { %v3729_v14 = vpop.permute.xlu0 %2442 }
  0xa7   : > { %2677 = vrot.lane.b32.xlu1 %v2586_v48, %s3070_s10  ;;  %v4640_v48 = vld [vmem:[#allocation13_spill] sm:$0xff] }
  0xa8   : > { %v3737_v42 = vpop.permute.xlu1 %2447 }
  0xa9   : > { %2692 = vrot.lane.b32.xlu0 %v4635_v53, %s3071_s11 }
  0xab   : > { %2687 = vrot.lane.b32.xlu1 %v4634_v58, %s3071_s11  ;;  %v2786_v58 = vpack.i.bf16 %v3357_v23, %v3360_v25 }
  0xad   : > { %2702 = vrot.lane.b32.xlu0 %v3575_v36, %s3072_s12 }
  0xaf   : > { %2697 = vrot.lane.b32.xlu1 %v3548_v56, %s3072_s12 }
  0xb0   : > { %v3739_v52 = vpop.permute.xlu0 %2452 }
  0xb1   : > { %2712 = vrot.lane.b32.xlu0 %v4636_v10, %s3068_s30  ;;  %4637 = vst [vmem:[#allocation5_spill] sm:$0xff] %v3739_v52  ;;  %v2420_v52 = vunpack.i.h.bf16 %v3711_v28 }
  0xb3   : > { %2707 = vrot.lane.b32.xlu1 %v4635_v53, %s3068_s30 }
  0xb4   : > { %v3745_v56 = vpop.permute.xlu1 %2457 }
  0xb5   : > { %2722 = vrot.lane.b32.xlu0 %v3566_v59, %s3069_s7  ;;  %4638 = vst [vmem:[#allocation6_spill] sm:$0xff] %v3745_v56  ;;  %v3747_v7 = vpop.permute.xlu0 %2462 }
  0xb6   : > { %4639 = vst [vmem:[#allocation9_spill] sm:$0xff] %v3747_v7 }
  0xb7   : > { %2717 = vrot.lane.b32.xlu1 %v3575_v36, %s3069_s7 }
  0xb9   : > { %2732 = vrot.lane.b32.xlu0 %v2601_v41, %s3070_s10  ;;  %v2756_v41 = vpack.i.bf16 %v3344_v50, %v3336_v38 }
  0xbb   : > { %2727 = vrot.lane.b32.xlu1 %v2596_v33, %s3070_s10  ;;  %v3755_v6 = vpop.permute.xlu1 %2467 }
  0xbc   : > { %4641 = vst [vmem:[#allocation12_spill] sm:$0xff] %v3755_v6 }
  0xbd   : > { %2742 = vrot.lane.b32.xlu0 %v4640_v48, %s3071_s11 }
  0xbf   : > { %2737 = vrot.lane.b32.xlu1 %v4636_v10, %s3071_s11 }
  0xc0   : > { %v3757_v36 = vpop.permute.xlu0 %2472 }
  0xc1   : > { %2752 = vrot.lane.b32.xlu0 %v3593_v2, %s3072_s12  ;;  %4642 = vst [vmem:[#allocation13_spill] sm:$0xff] %v3757_v36  ;;  %v2816_v36 = vpack.i.bf16 %v3372_v39, %v3375_v40 }
  0xc3   : > { %2747 = vrot.lane.b32.xlu1 %v3566_v59, %s3072_s12  ;;  %v3766_v33 = vpop.permute.xlu1 %2477 }
  0xc4   : > { %4643 = vst [vmem:[#allocation34_spill] sm:$0xff] %v3766_v33 }
  0xc5   : > { %2762 = vrot.lane.b32.xlu0 %v4640_v48, %s3068_s30  ;;  %v4645_v48 = vld [vmem:[#allocation21_spill] sm:$0xff] }
  0xc7   : > { %2757 = vrot.lane.b32.xlu1 %v2756_v41, %s3067_s27  ;;  %v2483_v8 = vpop.permute.xlu0 %2482 }
  0xc8   : > { %v2485_v40 = vunpack.i.h.bf16 %v2483_v8  ;;  %v2484_v39 = vunpack.i.l.bf16 %v2483_v8 }
  0xc9   : > { %2772 = vrot.lane.b32.xlu0 %v3593_v2, %s3069_s7 }
  0xca   : > { %v1518_v8 = vsel %vm1489_vm4, %v3478_v5, %v2484_v39 }
  0xcb   : > { %2767 = vrot.lane.b32.xlu1 %v4644_v20, %s3068_s30  ;;  %v3772_v17 = vpop.permute.xlu0 %2492 }
  0xcc   : > { %v2494_v44 = vunpack.i.l.bf16 %v3772_v17 }
  0xcd   : > { %v2488_v59 = vpop.permute.xlu1 %2487  ;;  %2782 = vrot.lane.b32.xlu0 %v2756_v41, %s3070_s10 }
  0xcf   : > { %2777 = vrot.lane.b32.xlu1 %v3584_v16, %s3069_s7  ;;  %v3777_v27 = vpop.permute.xlu0 %2502 }
  0xd1   : > { %v3781_v53 = vpop.permute.xlu1 %2497  ;;  %2792 = vrot.lane.b32.xlu0 %v4644_v20, %s3071_s11 }
  0xd3   : > { %2787 = vrot.lane.b32.xlu1 %v2786_v58, %s3070_s10  ;;  %v3786_v2 = vpop.permute.xlu0 %2512 }
  0xd5   : > { %v3788_v10 = vpop.permute.xlu1 %2507  ;;  %2802 = vrot.lane.b32.xlu0 %v3584_v16, %s3072_s12 }
  0xd7   : > { %2797 = vrot.lane.b32.xlu1 %v4645_v48, %s3071_s11  ;;  %v3794_v41 = vpop.permute.xlu0 %2522 }
  0xd8   : > { %4646 = vst [vmem:[#allocation18_spill] sm:$0xff] %v3794_v41 }
  0xd9   : > { %v3796_v33 = vpop.permute.xlu1 %2517  ;;  %2812 = vrot.lane.b32.xlu0 %v2786_v58, %s3067_s27  ;;  %v4651_v58 = vld [vmem:[#allocation22_spill] sm:$0xff] }
  0xdb   : > { %2807 = vrot.lane.b32.xlu1 %v3611_v60, %s3072_s12  ;;  %v3801_v20 = vpop.permute.xlu0 %2532 }
  0xdc   : > { %4647 = vst [vmem:[#allocation21_spill] sm:$0xff] %v3801_v20  ;;  %v4663_v20 = vld [vmem:[#allocation3_spill] sm:$0xff] }
  0xdd   : > { %v3805_v6 = vpop.permute.xlu1 %2527  ;;  %2822 = vrot.lane.b32.xlu0 %v4645_v48, %s3068_s30 }
  0xde   : > { %4648 = vst [vmem:[#allocation35_spill] sm:$0xff] %v3805_v6 }
  0xdf   : > { %2817 = vrot.lane.b32.xlu1 %v2816_v36, %s3067_s27  ;;  %v3810_v16 = vpop.permute.xlu0 %2542 }
  0xe0   : > { %4649 = vst [vmem:[#allocation36_spill] sm:$0xff] %v3810_v16  ;;  %v2846_v16 = vpack.i.bf16 %v3410_v18, %v3413_v46  ;;  %v2490_v18 = vunpack.i.h.bf16 %v2488_v59 }
  0xe1   : > { %v3812_v7 = vpop.permute.xlu1 %2537  ;;  %2832 = vrot.lane.b32.xlu0 %v3611_v60, %s3069_s7 }
  0xe2   : > { %4650 = vst [vmem:[#allocation37_spill] sm:$0xff] %v3812_v7  ;;  %v1519_v7 = vsel %vm1489_vm4, %v3475_v61, %v2485_v40 }
  0xe3   : > { %2827 = vrot.lane.b32.xlu1 %v4651_v58, %s3068_s30  ;;  %v3818_v25 = vpop.permute.xlu0 %2552 }
  0xe4   : > { %4652 = vst [vmem:[#allocation22_spill] sm:$0xff] %v3818_v25 }
  0xe5   : > { %v3820_v23 = vpop.permute.xlu1 %2547  ;;  %2842 = vrot.lane.b32.xlu0 %v2816_v36, %s3070_s10 }
  0xe6   : > { %4653 = vst [vmem:[#allocation38_spill] sm:$0xff] %v3820_v23 }
  0xe7   : > { %2837 = vrot.lane.b32.xlu1 %v3602_v49, %s3069_s7  ;;  %v2563_v48 = vpop.permute.xlu0 %2562 }
  0xe8   : > { %v2565_v60 = vunpack.i.h.bf16 %v2563_v48  ;;  %v2564_v38 = vunpack.i.l.bf16 %v2563_v48  ;;  %v2489_v48 = vunpack.i.l.bf16 %v2488_v59  ;;  %v4657_v59 = vld [vmem:[#allocation25_spill] sm:$0xff] }
  0xe9   : > { %v3831_v25 = vpop.permute.xlu1 %2557  ;;  %2852 = vrot.lane.b32.xlu0 %v4651_v58, %s3071_s11 }
  0xea   : > { %4654 = vst [vmem:[#allocation39_spill] sm:$0xff] %v3831_v25  ;;  %v3836_v36 = vsel %vm1522_vm5, %v1518_v8, %v2564_v38  ;;  %v3839_v46 = vsel %vm1522_vm5, %v1519_v7, %v2565_v60  ;;  %v1521_v38 = vsel %vm1489_vm4, %v3504_v4, %v2490_v18  ;;  %v1520_v7 = vsel %vm1489_vm4, %v3507_v0, %v2489_v48 }
  0xeb   : > { %4655 = vst [vmem:[#allocation40_spill] sm:$0xff] %v3836_v36  ;;  %4656 = vst [vmem:[#allocation41_spill] sm:$0xff] %v3839_v46  ;;  %2847 = vrot.lane.b32.xlu1 %v2846_v16, %s3070_s10  ;;  %v3842_v40 = vpop.permute.xlu0 %2572  ;;  %v2876_v48 = vpack.i.bf16 %v3435_v37, %v3430_v19  ;;  %v243_v36 = vld [vmem:[%s3131_s22 + $0xf8] sm:$0xff]  ;;  %v3055_v37 = vld [vmem:[%s4536_s1 + $0x1] ss:$0 sm:$0xff] }
  0xec   : > { %v2575_v43 = vunpack.i.h.bf16 %v3842_v40  ;;  %v2574_v29 = vunpack.i.l.bf16 %v3842_v40 }
  0xed   : > { %v2568_v39 = vpop.permute.xlu1 %2567  ;;  %2862 = vrot.lane.b32.xlu0 %v3602_v49, %s3072_s12 }
  0xee   : > { %v2570_v25 = vunpack.i.h.bf16 %v2568_v39  ;;  %v2569_v58 = vunpack.i.l.bf16 %v2568_v39  ;;  %v242_v39 = vld [vmem:[%s3131_s22 + $0xf0] sm:$0xff]  ;;  %s4397_s22 = scalar_lea.vmem %s4538_s3, %s2327_s17  ;;  %s2303_s17 = sshll.u32 %s4708_s16, 1 }
  0xef   : > { %2857 = vrot.lane.b32.xlu1 %v4657_v59, %s3071_s11  ;;  %v3852_v60 = vpop.permute.xlu0 %2582  ;;  %s208_s25 = scalar_lea.vmem %s4539_s4, %s2303_s17 }
  0xf0   : > { %v3855_v8 = vsel %vm1522_vm5, %v1521_v38, %v2570_v25  ;;  %v3858_v46 = vsel %vm1522_vm5, %v1520_v7, %v2569_v58 }
  0xf1   : > { %4658 = vst [vmem:[#allocation25_spill] sm:$0xff] %v3855_v8  ;;  %4659 = vst [vmem:[#allocation42_spill] sm:$0xff] %v3858_v46  ;;  %v3860_v49 = vpop.permute.xlu1 %2577  ;;  %2872 = vrot.lane.b32.xlu0 %v2846_v16, %s3067_s27  ;;  %v3054_v16 = vld [vmem:[%s4536_s1] ss:$0 sm:$0xff]  ;;  %v2415_v46 = vunpack.i.h.bf16 %v3701_v9  ;;  %v2414_v8 = vunpack.i.l.bf16 %v3701_v9 }
  0xf2   : > { %v278_v58 = vmul.f32 %v3054_v16, %v242_v39  ;;  %v279_v38 = vmul.f32 %v3054_v16, %v243_v36  ;;  %v4662_v9 = vld [vmem:[#allocation2_spill] sm:$0xff]  ;;  %v2579_v40 = vunpack.i.l.bf16 %v3860_v49 }
  0xf3   : > { %2867 = vrot.lane.b32.xlu1 %v3626_v57, %s3072_s12  ;;  %v3865_v18 = vpop.permute.xlu0 %2592  ;;  %v1491_v50 = vsel %vm1489_vm4, %v4662_v9, %v2415_v46  ;;  %v1490_v56 = vsel %vm1489_vm4, %v4663_v20, %v2414_v8  ;;  %v2495_v8 = vunpack.i.h.bf16 %v3772_v17 }
  0xf4   : > { %v314_v39 = vadd.f32 %v3055_v37, %v278_v58  ;;  %v315_v36 = vadd.f32 %v3055_v37, %v279_v38  ;;  %v2419_v58 = vunpack.i.l.bf16 %v3711_v28  ;;  %v2500_v28 = vunpack.i.h.bf16 %v3781_v53 }
  0xf5   : > { %v3871_v23 = vpop.permute.xlu1 %2587  ;;  %2882 = vrot.lane.b32.xlu0 %v4657_v59, %s3068_s30  ;;  %v4661_v59 = vld [vmem:[#allocation30_spill] sm:$0xff] }
  0xf6   : > { %v346_v38 = vmax.f32 %v314_v39, 0.0  ;;  %v1492_v39 = vsel %vm1489_vm4, %v3190_v63, %v2419_v58  ;;  %v1523_v63 = vsel %vm1522_vm5, %v1490_v56, %v2494_v44 }
  0xf7   : > { %2877 = vrot.lane.b32.xlu1 %v2876_v48, %s3067_s27  ;;  %v3876_v25 = vpop.permute.xlu0 %2602 }
  0xf8   : > { %4660 = vst [vmem:[#allocation43_spill] sm:$0xff] %v3876_v25  ;;  %v2499_v25 = vunpack.i.l.bf16 %v3781_v53  ;;  %v2580_v53 = vunpack.i.h.bf16 %v3860_v49  ;;  %v1556_v49 = vsel %vm1555_vm6, %v1523_v63, %v2574_v29  ;;  %v4664_v29 = vld [vmem:[#allocation32_spill] sm:$0xff] }
  0xf9   : > { %v3881_v7 = vpop.permute.xlu1 %2597  ;;  %2892 = vrot.lane.b32.xlu0 %v3626_v57, %s3069_s7  ;;  %v2906_v57 = vpack.i.bf16 %v3451_v12, %v3454_v1  ;;  %v347_v1 = vmax.f32 %v315_v36, 0.0 }
  0xfa   : > { %v1525_v36 = vsel %vm1522_vm5, %v1492_v39, %v2499_v25 }
  0xfb   : > { %2887 = vrot.lane.b32.xlu1 %v4661_v59, %s3068_s30  ;;  %v3889_v19 = vpop.permute.xlu0 %2612  ;;  %v3930_v46 = vrot.slane %v347_v1, 7 }
  0xfc   : > { %v2614_v58 = vunpack.i.l.bf16 %v3889_v19 }
  0xfd   : > { %v3894_v16 = vpop.permute.xlu1 %2607  ;;  %2902 = vrot.lane.b32.xlu0 %v2876_v48, %s3070_s10  ;;  %v3909_v48 = vpack.i.bf16 %v3475_v61, %v3478_v5  ;;  %v1493_v5 = vsel %vm1489_vm4, %v3187_v62, %v2420_v52  ;;  %v1524_v62 = vsel %vm1522_vm5, %v1491_v50, %v2495_v8  ;;  %v2615_v52 = vunpack.i.h.bf16 %v3889_v19 }
  0xfe   : > { %v1526_v17 = vsel %vm1522_vm5, %v1493_v5, %v2500_v28  ;;  %v1557_v6 = vsel %vm1555_vm6, %v1524_v62, %v2575_v43  ;;  %v2610_v1 = vunpack.i.h.bf16 %v3894_v16  ;;  %v2609_v44 = vunpack.i.l.bf16 %v3894_v16 }
  0xff   : > { %2897 = vrot.lane.b32.xlu1 %v3620_v22, %s3069_s7  ;;  %v2623_v37 = vpop.permute.xlu0 %2622  ;;  %v1558_v19 = vsel %vm1555_vm6, %v1525_v36, %v2579_v40  ;;  %v1559_v25 = vsel %vm1555_vm6, %v1526_v17, %v2580_v53 }
 0x100   : > { %v2625_v50 = vunpack.i.h.bf16 %v2623_v37  ;;  %v2624_v56 = vunpack.i.l.bf16 %v2623_v37  ;;  %v1591_v28 = vsel %vm1588_vm7, %v1558_v19, %v2614_v58  ;;  %v1589_v17 = vsel %vm1588_vm7, %v1556_v49, %v2609_v44 }
 0x101   : > { %v2618_v61 = vpop.permute.xlu1 %2617  ;;  %2912 = vrot.lane.b32.xlu0 %v4661_v59, %s3071_s11  ;;  %v429_v59 = vrot.slane %v346_v38, 7 }
 0x102   : > { %v2620_v38 = vunpack.i.h.bf16 %v2618_v61  ;;  %v2619_v8 = vunpack.i.l.bf16 %v2618_v61  ;;  %v1590_v61 = vsel %vm1588_vm7, %v1557_v6, %v2610_v1  ;;  %v1624_v36 = vsel %vm1621_vm8, %v1591_v28, %v2624_v56 }
 0x103   : > { %2907 = vrot.lane.b32.xlu1 %v2906_v57, %s3070_s10  ;;  %v2633_v12 = vpop.permute.xlu0 %2632 }
 0x104   : > { %v2635_v5 = vunpack.i.h.bf16 %v2633_v12  ;;  %v2634_v39 = vunpack.i.l.bf16 %v2633_v12  ;;  %v1622_v40 = vsel %vm1621_vm8, %v1589_v17, %v2619_v8 }
 0x105   : > { %v2628_v31 = vpop.permute.xlu1 %2627  ;;  %2922 = vrot.lane.b32.xlu0 %v3620_v22, %s3072_s12  ;;  %v1592_v22 = vsel %vm1588_vm7, %v1559_v25, %v2615_v52  ;;  %v1623_v52 = vsel %vm1621_vm8, %v1590_v61, %v2620_v38  ;;  %v4666_v61 = vunpack.i.l.bf16 %v3709_v11 }
 0x106   : > { %v2630_v62 = vunpack.i.h.bf16 %v2628_v31  ;;  %v2629_v16 = vunpack.i.l.bf16 %v2628_v31  ;;  %v1625_v53 = vsel %vm1621_vm8, %v1592_v22, %v2625_v50 }
 0x107   : > { %2917 = vrot.lane.b32.xlu1 %v4664_v29, %s3071_s11  ;;  %v2643_v43 = vpop.permute.xlu0 %2642  ;;  %v1658_v49 = vsel %vm1654_vm9, %v1625_v53, %v2635_v5 }
 0x108   : > { %v2645_v37 = vunpack.i.h.bf16 %v2643_v43  ;;  %v2644_v41 = vunpack.i.l.bf16 %v2643_v43  ;;  %v1655_v1 = vsel %vm1654_vm9, %v1622_v40, %v2629_v16  ;;  %v1656_v50 = vsel %vm1654_vm9, %v1623_v52, %v2630_v62 }
 0x109   : > { %v2638_v63 = vpop.permute.xlu1 %2637  ;;  %2932 = vrot.lane.b32.xlu0 %v2906_v57, %s3067_s27  ;;  %v1657_v57 = vsel %vm1654_vm9, %v1624_v36, %v2634_v39  ;;  %v3977_v39 = vsel %vm381_vm0, %v429_v59, %v3930_v46  ;;  %v1494_v36 = vsel %vm1489_vm4, %v3178_v55, %v4666_v61  ;;  %v3998_v40 = vpack.i.bf16 %v3504_v4, %v3507_v0  ;;  %v4669_v4 = vld [vmem:[#allocation33_spill] sm:$0xff] }
 0x10a   : > { %v2640_v12 = vunpack.i.h.bf16 %v2638_v63  ;;  %v2639_v58 = vunpack.i.l.bf16 %v2638_v63  ;;  %v1690_v56 = vsel %vm1687_vm10, %v1657_v57, %v2644_v41  ;;  %v1691_v19 = vsel %vm1687_vm10, %v1658_v49, %v2645_v37 }
 0x10b   : > { %2927 = vrot.lane.b32.xlu1 %v3639_v47, %s3072_s12  ;;  %v2653_v31 = vpop.permute.xlu0 %2652  ;;  %v4665_v37 = vunpack.i.h.bf16 %v3709_v11  ;;  %v4668_v55 = vunpack.i.l.bf16 %v3717_v30  ;;  %v2505_v57 = vunpack.i.h.bf16 %v3777_v27  ;;  %v2504_v49 = vunpack.i.l.bf16 %v3777_v27 }
 0x10c   : > { %v2655_v44 = vunpack.i.h.bf16 %v2653_v31  ;;  %v2654_v6 = vunpack.i.l.bf16 %v2653_v31  ;;  %v1688_v5 = vsel %vm1687_vm10, %v1655_v1, %v2639_v58  ;;  %v1689_v41 = vsel %vm1687_vm10, %v1656_v50, %v2640_v12 }
 0x10d   : > { %v2648_v25 = vpop.permute.xlu1 %2647  ;;  %2942 = vrot.lane.b32.xlu0 %v4664_v29, %s3068_s30  ;;  %v3980_v29 = vsel %vm381_vm0, 0.0, %v429_v59  ;;  %v1495_v17 = vsel %vm1489_vm4, %v3175_v54, %v4665_v37  ;;  %v712_v12 = vrot.slane %v3977_v39, 1  ;;  %v4667_v54 = vunpack.i.h.bf16 %v3717_v30 }
 0x10e   : > { %v2650_v38 = vunpack.i.h.bf16 %v2648_v25  ;;  %v2649_v8 = vunpack.i.l.bf16 %v2648_v25  ;;  %v1723_v43 = vsel %vm1720_vm11, %v1690_v56, %v2654_v6  ;;  %v1724_v28 = vsel %vm1720_vm11, %v1691_v19, %v2655_v44 }
 0x10f   : > { %2937 = vrot.lane.b32.xlu1 %v3909_v48, %s3067_s27  ;;  %v3971_v22 = vpop.permute.xlu0 %2662  ;;  %v1754_v62 = vpack.c.bf16 %v1724_v28, %v1723_v43  ;;  %v711_v52 = vrot.slane %v3980_v29, 1  ;;  %v1497_v11 = vsel %vm1489_vm4, %v3196_v3, %v4667_v54  ;;  %v1496_v58 = vsel %vm1489_vm4, %v3207_v13, %v4668_v55 }
 0x110   : > { %v1721_v16 = vsel %vm1720_vm11, %v1688_v5, %v2649_v8  ;;  %v1722_v63 = vsel %vm1720_vm11, %v1689_v41, %v2650_v38  ;;  %v2434_v31 = vunpack.i.l.bf16 %v3719_v51  ;;  %v4020_v3 = vsel %vm381_vm0, %v3930_v46, 0.0 }
 0x111   : > { %v3992_v53 = vpop.permute.xlu1 %2657  ;;  %2952 = vrot.lane.b32.xlu0 %v3639_v47, %s3069_s7  ;;  %v1753_v59 = vpack.c.bf16 %v1722_v63, %v1721_v16  ;;  %v2435_v47 = vunpack.i.h.bf16 %v3719_v51  ;;  %v2510_v13 = vunpack.i.h.bf16 %v3788_v10  ;;  %v2509_v30 = vunpack.i.l.bf16 %v3788_v10 }
 0x112   : > { %v2585_v44 = vunpack.i.h.bf16 %v3852_v60  ;;  %v2584_v6 = vunpack.i.l.bf16 %v3852_v60  ;;  %v4030_v27 = vpack.i.bf16 %v3977_v39, %v3980_v29  ;;  %v4035_v46 = vsel %vm547_vm1, %v711_v52, %v712_v12 }
 0x113   : > { %2947 = vrot.lane.b32.xlu1 %v4669_v4, %s3068_s30  ;;  %2354 = vmatprep.mubr.msk.bf16.mxu0 %vm1789_vm12, %v1753_v59  ;;  %v2673_v0 = vpop.permute.xlu0 %2672  ;;  %v2590_v50 = vunpack.i.h.bf16 %v3871_v23  ;;  %v2589_v10 = vunpack.i.l.bf16 %v3871_v23  ;;  %v714_v56 = vrot.slane %v4020_v3, 1  ;;  %v1528_v19 = vsel %vm1522_vm5, %v1495_v17, %v2505_v57 }
 0x114   : > { %2355 = vmatmul.mubr.msk.bf16.vlgmr.msra.gmra.mrb[0].mxu0 %vm1789_vm12, %v1754_v62  ;;  %v1527_v25 = vsel %vm1522_vm5, %v1494_v36, %v2504_v49  ;;  %v2665_v38 = vunpack.i.h.bf16 %v3971_v22  ;;  %v2664_v8 = vunpack.i.l.bf16 %v3971_v22  ;;  %v1530_v43 = vsel %vm1522_vm5, %v1497_v11, %v2510_v13 }
 0x115   : > { %v2668_v1 = vpop.permute.xlu1 %2667  ;;  %2962 = vrot.lane.b32.xlu0 %v3909_v48, %s3070_s10  ;;  %v716_v48 = vrot.slane %v3980_v29, 2  ;;  %v1529_v23 = vsel %vm1522_vm5, %v1496_v58, %v2509_v30  ;;  %v1560_v28 = vsel %vm1555_vm6, %v1527_v25, %v2584_v6  ;;  %v1561_v5 = vsel %vm1555_vm6, %v1528_v19, %v2585_v44 }
 0x116   : > { %v2660_v62 = vunpack.i.h.bf16 %v3992_v53  ;;  %v2659_v16 = vunpack.i.l.bf16 %v3992_v53  ;;  %v2675_v63 = vunpack.i.h.bf16 %v2673_v0  ;;  %v2674_v37 = vunpack.i.l.bf16 %v2673_v0 }
 0x117   : > { %2957 = vrot.lane.b32.xlu1 %v3635_v26, %s3069_s7  ;;  %v2683_v60 = vpop.permute.xlu0 %2682  ;;  %v1562_v22 = vsel %vm1555_vm6, %v1529_v23, %v2589_v10  ;;  %v1563_v17 = vsel %vm1555_vm6, %v1530_v43, %v2590_v50  ;;  %v2670_v61 = vunpack.i.h.bf16 %v2668_v1  ;;  %v2669_v36 = vunpack.i.l.bf16 %v2668_v1 }
 0x118   : > { %v1596_v52 = vsel %vm1588_vm7, %v1563_v17, %v2665_v38  ;;  %v1595_v54 = vsel %vm1588_vm7, %v1562_v22, %v2664_v8  ;;  %v2685_v11 = vunpack.i.h.bf16 %v2683_v60  ;;  %v2684_v55 = vunpack.i.l.bf16 %v2683_v60 }
 0x119   : > { %v2678_v41 = vpop.permute.xlu1 %2677  ;;  %2972 = vrot.lane.b32.xlu0 %v4669_v4, %s3071_s11  ;;  %v1593_v49 = vsel %vm1588_vm7, %v1560_v28, %v2659_v16  ;;  %v1594_v13 = vsel %vm1588_vm7, %v1561_v5, %v2660_v62  ;;  %v1628_v30 = vsel %vm1621_vm8, %v1595_v54, %v2674_v37  ;;  %v1629_v44 = vsel %vm1621_vm8, %v1596_v52, %v2675_v63 }
 0x11a   : > { %v2680_v58 = vunpack.i.h.bf16 %v2678_v41  ;;  %v2679_v53 = vunpack.i.l.bf16 %v2678_v41  ;;  %v1626_v6 = vsel %vm1621_vm8, %v1593_v49, %v2669_v36  ;;  %v1627_v1 = vsel %vm1621_vm8, %v1594_v13, %v2670_v61 }
 0x11b   : > { %2967 = vrot.lane.b32.xlu1 %v3998_v40, %s3070_s10  ;;  %v2693_v59 = vpop.permute.xlu0 %2692  ;;  %v1662_v19 = vsel %vm1654_vm9, %v1629_v44, %v2685_v11  ;;  %v717_v61 = vrot.slane %v3977_v39, 2  ;;  %v719_v36 = vrot.slane %v4020_v3, 2  ;;  %v715_v54 = vsel %vm547_vm1, %v712_v12, %v714_v56 }
 0x11c   : > { %v2695_v0 = vunpack.i.h.bf16 %v2693_v59  ;;  %v2694_v57 = vunpack.i.l.bf16 %v2693_v59  ;;  %v1659_v8 = vsel %vm1654_vm9, %v1626_v6, %v2679_v53  ;;  %v1660_v43 = vsel %vm1654_vm9, %v1627_v1, %v2680_v58 }
 0x11d   : > { %v2688_v4 = vpop.permute.xlu1 %2687  ;;  %2982 = vrot.lane.b32.xlu0 %v3635_v26, %s3072_s12  ;;  %v1661_v26 = vsel %vm1654_vm9, %v1628_v30, %v2684_v55  ;;  %v1499_v58 = vsel %vm1489_vm4, %v3236_v35, %v2435_v47  ;;  %v2440_v53 = vunpack.i.h.bf16 %v3727_v32  ;;  %v3006_v12 = vpack.i.bf16 %v715_v54, %v4035_v46 }
 0x11e   : > { %v2690_v50 = vunpack.i.h.bf16 %v2688_v4  ;;  %v2689_v10 = vunpack.i.l.bf16 %v2688_v4  ;;  %v1694_v23 = vsel %vm1687_vm10, %v1661_v26, %v2694_v57  ;;  %v1695_v28 = vsel %vm1687_vm10, %v1662_v19, %v2695_v0 }
 0x11f   : > { %2977 = vrot.lane.b32.xlu1 %v3525_v34, %s3071_s11  ;;  %v2703_v60 = vpop.permute.xlu0 %2702  ;;  %v2439_v4 = vunpack.i.l.bf16 %v3727_v32  ;;  %v720_v3 = vsel %vm628_vm2, %v717_v61, %v719_v36  ;;  %v1498_v35 = vsel %vm1489_vm4, %v3221_v24, %v2434_v31  ;;  %v2515_v32 = vunpack.i.h.bf16 %v3786_v2 }
 0x120   : > { %v2705_v25 = vunpack.i.h.bf16 %v2703_v60  ;;  %v2704_v38 = vunpack.i.l.bf16 %v2703_v60  ;;  %v1692_v37 = vsel %vm1687_vm10, %v1659_v8, %v2689_v10  ;;  %v1693_v22 = vsel %vm1687_vm10, %v1660_v43, %v2690_v50 }
 0x121   : > { %v2698_v5 = vpop.permute.xlu1 %2697  ;;  %2992 = vrot.lane.b32.xlu0 %v3998_v40, %s3067_s27  ;;  %v2514_v47 = vunpack.i.l.bf16 %v3786_v2  ;;  %v2520_v56 = vunpack.i.h.bf16 %v3796_v33  ;;  %v2519_v46 = vunpack.i.l.bf16 %v3796_v33  ;;  %v2595_v29 = vunpack.i.h.bf16 %v3865_v18 }
 0x122   : > { %v2700_v41 = vunpack.i.h.bf16 %v2698_v5  ;;  %v2699_v62 = vunpack.i.l.bf16 %v2698_v5  ;;  %v1727_v16 = vsel %vm1720_vm11, %v1694_v23, %v2704_v38  ;;  %v1728_v63 = vsel %vm1720_vm11, %v1695_v28, %v2705_v25 }
 0x123   : > { %2987 = vrot.lane.b32.xlu1 %v3649_v45, %s3072_s12  ;;  %v2713_v17 = vpop.permute.xlu0 %2712  ;;  %v1756_v52 = vpack.c.bf16 %v1728_v63, %v1727_v16  ;;  %v1501_v24 = vsel %vm1489_vm4, %v3273_v21, %v2440_v53  ;;  %v1500_v51 = vsel %vm1489_vm4, %v3269_v15, %v2439_v4  ;;  %v3026_v31 = vpack.i.bf16 %v4662_v9, %v4663_v20 }
 0x124   : > { %v1725_v40 = vsel %vm1720_vm11, %v1692_v37, %v2699_v62  ;;  %v1726_v59 = vsel %vm1720_vm11, %v1693_v22, %v2700_v41  ;;  %v2600_v33 = vunpack.i.h.bf16 %v3881_v7  ;;  %v2599_v57 = vunpack.i.l.bf16 %v3881_v7 }
 0x125   : > { %v1755_v11 = vpack.c.bf16 %v1726_v59, %v1725_v40  ;;  %v2708_v55 = vpop.permute.xlu1 %2707  ;;  %3002 = vrot.lane.b32.xlu0 %v3525_v34, %s3068_s30  ;;  %v718_v34 = vsel %vm628_vm2, %v716_v48, %v717_v61  ;;  %v2594_v48 = vunpack.i.l.bf16 %v3865_v18  ;;  %v1531_v49 = vsel %vm1522_vm5, %v1498_v35, %v2514_v47 }
 0x126   : > { %v3016_v2 = vpack.i.bf16 %v720_v3, %v718_v34  ;;  %v2715_v13 = vunpack.i.h.bf16 %v2713_v17  ;;  %v2714_v21 = vunpack.i.l.bf16 %v2713_v17  ;;  %v1534_v30 = vsel %vm1522_vm5, %v1501_v24, %v2520_v56 }
 0x127   : > { %2997 = vrot.lane.b32.xlu1 %v4030_v27, %s3067_s27  ;;  %2358 = vmatprep.mubr.msk.bf16.mxu0 %vm1789_vm12, %v1755_v11  ;;  %v2723_v39 = vpop.permute.xlu0 %2722  ;;  %v1533_v15 = vsel %vm1522_vm5, %v1500_v51, %v2519_v46  ;;  %v1564_v44 = vsel %vm1555_vm6, %v1531_v49, %v2594_v48  ;;  %v2710_v7 = vunpack.i.h.bf16 %v2708_v55  ;;  %v2709_v6 = vunpack.i.l.bf16 %v2708_v55  ;;  %v4670_v46 = vld [vmem:[#allocation4_spill] sm:$0xff] }
 0x128   : > { %2359 = vmatmul.mubr.msk.bf16.gmra.mrb[4].mxu0 %vm1789_vm12, %v1756_v52  ;;  %v2725_v1 = vunpack.i.h.bf16 %v2723_v39  ;;  %v2724_v50 = vunpack.i.l.bf16 %v2723_v39  ;;  %v1566_v10 = vsel %vm1555_vm6, %v1533_v15, %v2599_v57  ;;  %v1567_v60 = vsel %vm1555_vm6, %v1534_v30, %v2600_v33 }
 0x129   : > { %v2718_v0 = vpop.permute.xlu1 %2717  ;;  %3012 = vrot.lane.b32.xlu0 %v3649_v45, %s3069_s7  ;;  %v1532_v45 = vsel %vm1522_vm5, %v1499_v58, %v2515_v32  ;;  %v1600_v38 = vsel %vm1588_vm7, %v1567_v60, %v2715_v13  ;;  %v1599_v8 = vsel %vm1588_vm7, %v1566_v10, %v2714_v21  ;;  %v1597_v16 = vsel %vm1588_vm7, %v1564_v44, %v2709_v6  ;;  %v4672_v21 = vld [vmem:[#allocation18_spill] sm:$0xff] }
 0x12a   : > { %v1565_v20 = vsel %vm1555_vm6, %v1532_v45, %v2595_v29  ;;  %v2720_v26 = vunpack.i.h.bf16 %v2718_v0  ;;  %v2719_v19 = vunpack.i.l.bf16 %v2718_v0  ;;  %v1632_v37 = vsel %vm1621_vm8, %v1599_v8, %v2724_v50  ;;  %v4675_v50 = vld [vmem:[#allocation7_spill] sm:$0xff]  ;;  %v4676_v10 = vld [vmem:[#allocation10_spill] sm:$0xff] }
 0x12b   : > { %3007 = vrot.lane.b32.xlu1 %v3006_v12, %s3068_s30  ;;  %v2733_v18 = vpop.permute.xlu0 %2732  ;;  %v1598_v63 = vsel %vm1588_vm7, %v1565_v20, %v2710_v7  ;;  %v1633_v22 = vsel %vm1621_vm8, %v1600_v38, %v2725_v1  ;;  %v2445_v57 = vunpack.i.h.bf16 %v3729_v14  ;;  %v2450_v49 = vunpack.i.h.bf16 %v3737_v42  ;;  %v4673_v20 = vld [vmem:[#allocation8_spill] sm:$0xff]  ;;  %v4674_v7 = vld [vmem:[#allocation35_spill] sm:$0xff] }
 0x12c   : > { %v2735_v43 = vunpack.i.h.bf16 %v2733_v18  ;;  %v2734_v23 = vunpack.i.l.bf16 %v2733_v18  ;;  %v1630_v17 = vsel %vm1621_vm8, %v1597_v16, %v2719_v19  ;;  %v1631_v61 = vsel %vm1621_vm8, %v1598_v63, %v2720_v26  ;;  %v4677_v26 = vld [vmem:[#allocation43_spill] sm:$0xff] }
 0x12d   : > { %v2728_v9 = vpop.permute.xlu1 %2727  ;;  %3022 = vrot.lane.b32.xlu0 %v4030_v27, %s3070_s10  ;;  %v2444_v18 = vunpack.i.l.bf16 %v3729_v14  ;;  %v2449_v13 = vunpack.i.l.bf16 %v3737_v42  ;;  %v2525_v30 = vunpack.i.h.bf16 %v4672_v21  ;;  %v2524_v15 = vunpack.i.l.bf16 %v4672_v21  ;;  %v4678_v38 = vld [vmem:[#allocation11_spill] sm:$0xff] }
 0x12e   : > { %v2730_v27 = vunpack.i.h.bf16 %v2728_v9  ;;  %v2729_v28 = vunpack.i.l.bf16 %v2728_v9  ;;  %v1665_v52 = vsel %vm1654_vm9, %v1632_v37, %v2734_v23  ;;  %v1666_v54 = vsel %vm1654_vm9, %v1633_v22, %v2735_v43 }
 0x12f   : > { %3017 = vrot.lane.b32.xlu1 %v3016_v2, %s3069_s7  ;;  %v2743_v25 = vpop.permute.xlu0 %2742  ;;  %v1503_v9 = vsel %vm1489_vm4, %v4673_v20, %v2445_v57  ;;  %v2530_v6 = vunpack.i.h.bf16 %v4674_v7  ;;  %v2529_v1 = vunpack.i.l.bf16 %v4674_v7  ;;  %v1502_v14 = vsel %vm1489_vm4, %v4675_v50, %v2444_v18 }
 0x130   : > { %v2745_v41 = vunpack.i.h.bf16 %v2743_v25  ;;  %v2744_v62 = vunpack.i.l.bf16 %v2743_v25  ;;  %v1663_v58 = vsel %vm1654_vm9, %v1630_v17, %v2729_v28  ;;  %v1664_v53 = vsel %vm1654_vm9, %v1631_v61, %v2730_v27 }
 0x131   : > { %v2738_v5 = vpop.permute.xlu1 %2737  ;;  %3032 = vrot.lane.b32.xlu0 %v3006_v12, %s3071_s11  ;;  %v1505_v60 = vsel %vm1489_vm4, %v4676_v10, %v2450_v49  ;;  %v2605_v42 = vunpack.i.h.bf16 %v4677_v26  ;;  %v2604_v19 = vunpack.i.l.bf16 %v4677_v26  ;;  %v1504_v8 = vsel %vm1489_vm4, %v4678_v38, %v2449_v13 }
 0x132   : > { %v2740_v36 = vunpack.i.h.bf16 %v2738_v5  ;;  %v2739_v40 = vunpack.i.l.bf16 %v2738_v5  ;;  %v1698_v4 = vsel %vm1687_vm10, %v1665_v52, %v2744_v62  ;;  %v1699_v39 = vsel %vm1687_vm10, %v1666_v54, %v2745_v41 }
 0x133   : > { %3027 = vrot.lane.b32.xlu1 %v3026_v31, %s3070_s10  ;;  %v2753_v59 = vpop.permute.xlu0 %2752  ;;  %v4671_v31 = vld [vmem:[#allocation31_spill] sm:$0xff]  ;;  %v1535_v28 = vsel %vm1522_vm5, %v1502_v14, %v2524_v15  ;;  %v1536_v5 = vsel %vm1522_vm5, %v1503_v9, %v2525_v30  ;;  %v1538_v63 = vsel %vm1522_vm5, %v1505_v60, %v2530_v6  ;;  %v1537_v37 = vsel %vm1522_vm5, %v1504_v8, %v2529_v1 }
 0x134   : > { %v2755_v11 = vunpack.i.h.bf16 %v2753_v59  ;;  %v2754_v55 = vunpack.i.l.bf16 %v2753_v59  ;;  %v1696_v47 = vsel %vm1687_vm10, %v1663_v58, %v2739_v40  ;;  %v1697_v56 = vsel %vm1687_vm10, %v1664_v53, %v2740_v36 }
 0x135   : > { %v2748_v12 = vpop.permute.xlu1 %2747  ;;  %3042 = vrot.lane.b32.xlu0 %v3016_v2, %s3072_s12  ;;  %v1568_v61 = vsel %vm1555_vm6, %v1535_v28, %v2604_v19  ;;  %v1569_v36 = vsel %vm1555_vm6, %v1536_v5, %v2605_v42  ;;  %v4681_v5 = vld [vmem:[#allocation21_spill] sm:$0xff] }
 0x136   : > { %v2750_v34 = vunpack.i.h.bf16 %v2748_v12  ;;  %v2749_v3 = vunpack.i.l.bf16 %v2748_v12  ;;  %v1731_v35 = vsel %vm1720_vm11, %v1698_v4, %v2754_v55  ;;  %v1732_v32 = vsel %vm1720_vm11, %v1699_v39, %v2755_v11 }
 0x137   : > { %3037 = vrot.lane.b32.xlu1 %v4670_v46, %s3071_s11  ;;  %v2763_v29 = vpop.permute.xlu0 %2762  ;;  %v1758_v24 = vpack.c.bf16 %v1732_v32, %v1731_v35 }
 0x138   : > { %v1729_v48 = vsel %vm1720_vm11, %v1696_v47, %v2749_v3  ;;  %v1730_v0 = vsel %vm1720_vm11, %v1697_v56, %v2750_v34  ;;  %v2765_v23 = vunpack.i.h.bf16 %v2763_v29  ;;  %v2764_v27 = vunpack.i.l.bf16 %v2763_v29 }
 0x139   : > { %v1757_v51 = vpack.c.bf16 %v1730_v0, %v1729_v48  ;;  %v4168_v2 = vpop.permute.xlu1 %2757 }
 0x13a   : > { %v2760_v43 = vunpack.i.h.bf16 %v4168_v2  ;;  %v2759_v11 = vunpack.i.l.bf16 %v4168_v2  ;;  %v1601_v55 = vsel %vm1588_vm7, %v1568_v61, %v2764_v27  ;;  %v1602_v58 = vsel %vm1588_vm7, %v1569_v36, %v2765_v23  ;;  %v4684_v36 = vld [vmem:[#allocation14_spill] sm:$0xff] }
 0x13b   : > { %3047 = vrot.lane.b32.xlu1 %v4671_v31, %s3072_s12  ;;  %2362 = vmatprep.mubr.msk.bf16.mxu0 %vm1789_vm12, %v1757_v51  ;;  %v2773_v33 = vpop.permute.xlu0 %2772 }
 0x13c   : > { %2363 = vmatmul.mubr.msk.bf16.gmra.mrb[8].mxu0 %vm1789_vm12, %v1758_v24  ;;  %v2775_v41 = vunpack.i.h.bf16 %v2773_v33  ;;  %v2774_v62 = vunpack.i.l.bf16 %v2773_v33  ;;  %v1571_v54 = vsel %vm1555_vm6, %v1538_v63, %v2760_v43  ;;  %v1570_v33 = vsel %vm1555_vm6, %v1537_v37, %v2759_v11  ;;  %v4680_v43 = vld [vmem:[#allocation6_spill] sm:$0xff]  ;;  %v4682_v63 = vld [vmem:[#allocation15_spill] sm:$0xff] }
 0x13d   : > { %v2768_v45 = vpop.permute.xlu1 %2767  ;;  %v2460_v23 = vunpack.i.h.bf16 %v4680_v43  ;;  %v2459_v28 = vunpack.i.l.bf16 %v4680_v43 }
 0x13e   : > { %v2770_v53 = vunpack.i.h.bf16 %v2768_v45  ;;  %v2769_v4 = vunpack.i.l.bf16 %v2768_v45  ;;  %v1634_v39 = vsel %vm1621_vm8, %v1601_v55, %v2774_v62  ;;  %v1635_v12 = vsel %vm1621_vm8, %v1602_v58, %v2775_v41  ;;  %v4686_v58 = vld [vmem:[#allocation17_spill] sm:$0xff] }
 0x13f   : > { %v2783_v44 = vpop.permute.xlu0 %2782  ;;  %v2535_v41 = vunpack.i.h.bf16 %v4681_v5  ;;  %v2534_v62 = vunpack.i.l.bf16 %v4681_v5 }
 0x140   : > { %v2785_v22 = vunpack.i.h.bf16 %v2783_v44  ;;  %v2784_v17 = vunpack.i.l.bf16 %v2783_v44  ;;  %v1603_v13 = vsel %vm1588_vm7, %v1570_v33, %v2769_v4  ;;  %v1604_v21 = vsel %vm1588_vm7, %v1571_v54, %v2770_v53 }
 0x141   : > { %v2778_v25 = vpop.permute.xlu1 %2777  ;;  %v1508_v53 = vsel %vm1489_vm4, %v4686_v58, %v2459_v28 }
 0x142   : > { %v1667_v3 = vsel %vm1654_vm9, %v1634_v39, %v2784_v17  ;;  %v1668_v35 = vsel %vm1654_vm9, %v1635_v12, %v2785_v22  ;;  %v2780_v56 = vunpack.i.h.bf16 %v2778_v25  ;;  %v2779_v46 = vunpack.i.l.bf16 %v2778_v25  ;;  %v4679_v25 = vld [vmem:[#allocation5_spill] sm:$0xff] }
 0x143   : > { %v2793_v16 = vpop.permute.xlu0 %2792  ;;  %v2455_v38 = vunpack.i.h.bf16 %v4679_v25  ;;  %v2454_v8 = vunpack.i.l.bf16 %v4679_v25  ;;  %v4683_v22 = vld [vmem:[#allocation37_spill] sm:$0xff] }
 0x144   : > { %v2795_v59 = vunpack.i.h.bf16 %v2793_v16  ;;  %v2794_v52 = vunpack.i.l.bf16 %v2793_v16  ;;  %v1636_v30 = vsel %vm1621_vm8, %v1603_v13, %v2779_v46  ;;  %v1637_v15 = vsel %vm1621_vm8, %v1604_v21, %v2780_v56 }
 0x145   : > { %v2788_v40 = vpop.permute.xlu1 %2787  ;;  %v1507_v37 = vsel %vm1489_vm4, %v4682_v63, %v2455_v38  ;;  %v2540_v17 = vunpack.i.h.bf16 %v4683_v22  ;;  %v2539_v61 = vunpack.i.l.bf16 %v4683_v22 }
 0x146   : > { %v1700_v29 = vsel %vm1687_vm10, %v1667_v3, %v2794_v52  ;;  %v1701_v48 = vsel %vm1687_vm10, %v1668_v35, %v2795_v59  ;;  %v2790_v24 = vunpack.i.h.bf16 %v2788_v40  ;;  %v2789_v51 = vunpack.i.l.bf16 %v2788_v40  ;;  %v4685_v59 = vld [vmem:[#allocation16_spill] sm:$0xff] }
 0x147   : > { %v2803_v34 = vpop.permute.xlu0 %2802  ;;  %v1506_v40 = vsel %vm1489_vm4, %v4684_v36, %v2454_v8  ;;  %v1509_v52 = vsel %vm1489_vm4, %v4685_v59, %v2460_v23  ;;  %v1540_v3 = vsel %vm1522_vm5, %v1507_v37, %v2535_v41  ;;  %v1541_v46 = vsel %vm1522_vm5, %v1508_v53, %v2539_v61 }
 0x148   : > { %v2805_v32 = vunpack.i.h.bf16 %v2803_v34  ;;  %v2804_v47 = vunpack.i.l.bf16 %v2803_v34  ;;  %v1669_v20 = vsel %vm1654_vm9, %v1636_v30, %v2789_v51  ;;  %v1670_v9 = vsel %vm1654_vm9, %v1637_v15, %v2790_v24 }
 0x149   : > { %v2798_v0 = vpop.permute.xlu1 %2797  ;;  %v1539_v34 = vsel %vm1522_vm5, %v1506_v40, %v2534_v62  ;;  %v1542_v56 = vsel %vm1522_vm5, %v1509_v52, %v2540_v17 }
 0x14a   : > { %v1733_v2 = vsel %vm1720_vm11, %v1700_v29, %v2804_v47  ;;  %v1734_v31 = vsel %vm1720_vm11, %v1701_v48, %v2805_v32  ;;  %v2800_v57 = vunpack.i.h.bf16 %v2798_v0  ;;  %v2799_v18 = vunpack.i.l.bf16 %v2798_v0 }
 0x14b   : > { %v1759_v49 = vpack.c.bf16 %v1734_v31, %v1733_v2  ;;  %v2813_v45 = vpop.permute.xlu0 %2812 }
 0x14c   : > { %v1702_v1 = vsel %vm1687_vm10, %v1669_v20, %v2799_v18  ;;  %v1703_v50 = vsel %vm1687_vm10, %v1670_v9, %v2800_v57  ;;  %v2815_v54 = vunpack.i.h.bf16 %v2813_v45  ;;  %v2814_v11 = vunpack.i.l.bf16 %v2813_v45 }
 0x14d   : > { %v2808_v44 = vpop.permute.xlu1 %2807  ;;  %2366 = vmatprep.mubr.msk.bf16.mxu0 %vm1789_vm12, %v1759_v49 }
 0x14e   : > { %v2810_v7 = vunpack.i.h.bf16 %v2808_v44  ;;  %v2809_v6 = vunpack.i.l.bf16 %v2808_v44  ;;  %v1572_v0 = vsel %vm1555_vm6, %v1539_v34, %v2814_v11  ;;  %v1573_v24 = vsel %vm1555_vm6, %v1540_v3, %v2815_v54  ;;  %v4689_v3 = vld [vmem:[#allocation36_spill] sm:$0xff] }
 0x14f   : > { %v2823_v14 = vpop.permute.xlu0 %2822 }
 0x150   : > { %v1735_v10 = vsel %vm1720_vm11, %v1702_v1, %v2809_v6  ;;  %v1736_v60 = vsel %vm1720_vm11, %v1703_v50, %v2810_v7  ;;  %v2825_v39 = vunpack.i.h.bf16 %v2823_v14  ;;  %v2824_v12 = vunpack.i.l.bf16 %v2823_v14 }
 0x151   : > { %v1760_v26 = vpack.c.bf16 %v1736_v60, %v1735_v10  ;;  %v2818_v42 = vpop.permute.xlu1 %2817 }
 0x152   : > { %v2820_v4 = vunpack.i.h.bf16 %v2818_v42  ;;  %v2819_v57 = vunpack.i.l.bf16 %v2818_v42  ;;  %v1605_v18 = vsel %vm1588_vm7, %v1572_v0, %v2824_v12  ;;  %v1606_v49 = vsel %vm1588_vm7, %v1573_v24, %v2825_v39  ;;  %v4692_v24 = vld [vmem:[#allocation20_spill] sm:$0xff] }
 0x153   : > { %2367 = vmatmul.mubr.msk.bf16.gmra.mrb[12].mxu0 %vm1789_vm12, %v1760_v26  ;;  %v2833_v19 = vpop.permute.xlu0 %2832 }
 0x154   : > { %v2835_v35 = vunpack.i.h.bf16 %v2833_v19  ;;  %v2834_v32 = vunpack.i.l.bf16 %v2833_v19  ;;  %v1575_v33 = vsel %vm1555_vm6, %v1542_v56, %v2820_v4  ;;  %v1574_v25 = vsel %vm1555_vm6, %v1541_v46, %v2819_v57  ;;  %v4688_v4 = vld [vmem:[#allocation12_spill] sm:$0xff]  ;;  %v4690_v56 = vld [vmem:[#allocation19_spill] sm:$0xff] }
 0x155   : > { %v2828_v27 = vpop.permute.xlu1 %2827  ;;  %v2470_v39 = vunpack.i.h.bf16 %v4688_v4  ;;  %v2469_v34 = vunpack.i.l.bf16 %v4688_v4 }
 0x156   : > { %v2830_v45 = vunpack.i.h.bf16 %v2828_v27  ;;  %v2829_v13 = vunpack.i.l.bf16 %v2828_v27  ;;  %v1638_v21 = vsel %vm1621_vm8, %v1605_v18, %v2834_v32  ;;  %v1639_v30 = vsel %vm1621_vm8, %v1606_v49, %v2835_v35  ;;  %v4694_v49 = vld [vmem:[#allocation24_spill] sm:$0xff] }
 0x157   : > { %v2843_v16 = vpop.permute.xlu0 %2842  ;;  %v2545_v35 = vunpack.i.h.bf16 %v4689_v3  ;;  %v2544_v32 = vunpack.i.l.bf16 %v4689_v3 }
 0x158   : > { %v2845_v29 = vunpack.i.h.bf16 %v2843_v16  ;;  %v2844_v48 = vunpack.i.l.bf16 %v2843_v16  ;;  %v1607_v27 = vsel %vm1588_vm7, %v1574_v25, %v2829_v13  ;;  %v1608_v28 = vsel %vm1588_vm7, %v1575_v33, %v2830_v45 }
 0x159   : > { %v2838_v55 = vpop.permute.xlu1 %2837  ;;  %v1512_v45 = vsel %vm1489_vm4, %v4694_v49, %v2469_v34 }
 0x15a   : > { %v1671_v44 = vsel %vm1654_vm9, %v1638_v21, %v2844_v48  ;;  %v1672_v20 = vsel %vm1654_vm9, %v1639_v30, %v2845_v29  ;;  %v2840_v6 = vunpack.i.h.bf16 %v2838_v55  ;;  %v2839_v1 = vunpack.i.l.bf16 %v2838_v55  ;;  %v4687_v55 = vld [vmem:[#allocation9_spill] sm:$0xff]  ;;  %v4691_v29 = vld [vmem:[#allocation38_spill] sm:$0xff] }
 0x15b   : > { %v2853_v47 = vpop.permute.xlu0 %2852  ;;  %v2465_v58 = vunpack.i.h.bf16 %v4687_v55  ;;  %v2464_v53 = vunpack.i.l.bf16 %v4687_v55  ;;  %v2550_v48 = vunpack.i.h.bf16 %v4691_v29  ;;  %v2549_v0 = vunpack.i.l.bf16 %v4691_v29 }
 0x15c   : > { %v2855_v2 = vunpack.i.h.bf16 %v2853_v47  ;;  %v2854_v31 = vunpack.i.l.bf16 %v2853_v47  ;;  %v1640_v5 = vsel %vm1621_vm8, %v1607_v27, %v2839_v1  ;;  %v1641_v41 = vsel %vm1621_vm8, %v1608_v28, %v2840_v6 }
 0x15d   : > { %v2848_v51 = vpop.permute.xlu1 %2847  ;;  %v1511_v46 = vsel %vm1489_vm4, %v4690_v56, %v2465_v58  ;;  %v1545_v1 = vsel %vm1522_vm5, %v1512_v45, %v2549_v0 }
 0x15e   : > { %v1704_v14 = vsel %vm1687_vm10, %v1671_v44, %v2854_v31  ;;  %v1705_v10 = vsel %vm1687_vm10, %v1672_v20, %v2855_v2  ;;  %v2850_v60 = vunpack.i.h.bf16 %v2848_v51  ;;  %v2849_v26 = vunpack.i.l.bf16 %v2848_v51  ;;  %v4693_v2 = vld [vmem:[#allocation23_spill] sm:$0xff] }
 0x15f   : > { %v2863_v15 = vpop.permute.xlu0 %2862  ;;  %v1510_v51 = vsel %vm1489_vm4, %v4692_v24, %v2464_v53  ;;  %v1513_v31 = vsel %vm1489_vm4, %v4693_v2, %v2470_v39  ;;  %v1544_v44 = vsel %vm1522_vm5, %v1511_v46, %v2545_v35 }
 0x160   : > { %v2865_v9 = vunpack.i.h.bf16 %v2863_v15  ;;  %v2864_v7 = vunpack.i.l.bf16 %v2863_v15  ;;  %v1673_v16 = vsel %vm1654_vm9, %v1640_v5, %v2849_v26  ;;  %v1674_v63 = vsel %vm1654_vm9, %v1641_v41, %v2850_v60 }
 0x161   : > { %v2858_v50 = vpop.permute.xlu1 %2857  ;;  %v1543_v15 = vsel %vm1522_vm5, %v1510_v51, %v2544_v32  ;;  %v1546_v6 = vsel %vm1522_vm5, %v1513_v31, %v2550_v48 }
 0x162   : > { %v1737_v42 = vsel %vm1720_vm11, %v1704_v14, %v2864_v7  ;;  %v1738_v19 = vsel %vm1720_vm11, %v1705_v10, %v2865_v9  ;;  %v2860_v38 = vunpack.i.h.bf16 %v2858_v50  ;;  %v2859_v8 = vunpack.i.l.bf16 %v2858_v50 }
 0x163   : > { %v2873_v43 = vpop.permute.xlu0 %2872  ;;  %v1761_v23 = vpack.c.bf16 %v1738_v19, %v1737_v42 }
 0x164   : > { %v1706_v17 = vsel %vm1687_vm10, %v1673_v16, %v2859_v8  ;;  %v1707_v61 = vsel %vm1687_vm10, %v1674_v63, %v2860_v38  ;;  %v2875_v33 = vunpack.i.h.bf16 %v2873_v43  ;;  %v2874_v57 = vunpack.i.l.bf16 %v2873_v43 }
 0x165   : > { %v2868_v62 = vpop.permute.xlu1 %2867  ;;  %2370 = vmatprep.mubr.msk.bf16.mxu1 %vm1789_vm12, %v1761_v23 }
 0x166   : > { %v2870_v37 = vunpack.i.h.bf16 %v2868_v62  ;;  %v2869_v22 = vunpack.i.l.bf16 %v2868_v62  ;;  %v1576_v10 = vsel %vm1555_vm6, %v1543_v15, %v2874_v57  ;;  %v1577_v60 = vsel %vm1555_vm6, %v1544_v44, %v2875_v33  ;;  %v4697_v44 = vld [vmem:[#allocation22_spill] sm:$0xff] }
 0x167   : > { %v2883_v36 = vpop.permute.xlu0 %2882 }
 0x168   : > { %v1739_v40 = vsel %vm1720_vm11, %v1706_v17, %v2869_v22  ;;  %v1740_v59 = vsel %vm1720_vm11, %v1707_v61, %v2870_v37  ;;  %v2885_v21 = vunpack.i.h.bf16 %v2883_v36  ;;  %v2884_v30 = vunpack.i.l.bf16 %v2883_v36 }
 0x169   : > { %v1762_v52 = vpack.c.bf16 %v1740_v59, %v1739_v40  ;;  %v2878_v54 = vpop.permute.xlu1 %2877 }
 0x16a   : > { %v2880_v13 = vunpack.i.h.bf16 %v2878_v54  ;;  %v2879_v38 = vunpack.i.l.bf16 %v2878_v54  ;;  %v1609_v8 = vsel %vm1588_vm7, %v1576_v10, %v2884_v30  ;;  %v1610_v43 = vsel %vm1588_vm7, %v1577_v60, %v2885_v21  ;;  %v4700_v60 = vld [vmem:[#allocation26_spill] sm:$0xff] }
 0x16b   : > { %2371 = vmatmul.mubr.msk.bf16.vlgmr.msra.gmra.mrb[0].mxu1 %vm1789_vm12, %v1762_v52  ;;  %v2893_v11 = vpop.permute.xlu0 %2892 }
 0x16c   : > { %v2895_v20 = vunpack.i.h.bf16 %v2893_v11  ;;  %v2894_v9 = vunpack.i.l.bf16 %v2893_v11  ;;  %v1579_v25 = vsel %vm1555_vm6, %v1546_v6, %v2880_v13  ;;  %v1578_v55 = vsel %vm1555_vm6, %v1545_v1, %v2879_v38  ;;  %v4696_v13 = vld [vmem:[#allocation34_spill] sm:$0xff]  ;;  %v4698_v6 = vld [vmem:[#allocation27_spill] sm:$0xff] }
 0x16d   : > { %v2888_v12 = vpop.permute.xlu1 %2887  ;;  %v2480_v21 = vunpack.i.h.bf16 %v4696_v13  ;;  %v2479_v15 = vunpack.i.l.bf16 %v4696_v13 }
 0x16e   : > { %v2890_v23 = vunpack.i.h.bf16 %v2888_v12  ;;  %v2889_v27 = vunpack.i.l.bf16 %v2888_v12  ;;  %v1642_v28 = vsel %vm1621_vm8, %v1609_v8, %v2894_v9  ;;  %v1643_v5 = vsel %vm1621_vm8, %v1610_v43, %v2895_v20  ;;  %v4702_v43 = vld [vmem:[#allocation29_spill] sm:$0xff] }
 0x16f   : > { %v2903_v47 = vpop.permute.xlu0 %2902  ;;  %v2555_v20 = vunpack.i.h.bf16 %v4697_v44  ;;  %v2554_v9 = vunpack.i.l.bf16 %v4697_v44 }
 0x170   : > { %v2905_v50 = vunpack.i.h.bf16 %v2903_v47  ;;  %v2904_v14 = vunpack.i.l.bf16 %v2903_v47  ;;  %v1611_v12 = vsel %vm1588_vm7, %v1578_v55, %v2889_v27  ;;  %v1612_v34 = vsel %vm1588_vm7, %v1579_v25, %v2890_v23 }
 0x171   : > { %v2898_v18 = vpop.permute.xlu1 %2897  ;;  %v1516_v23 = vsel %vm1489_vm4, %v4702_v43, %v2479_v15 }
 0x172   : > { %v1675_v62 = vsel %vm1654_vm9, %v1642_v28, %v2904_v14  ;;  %v1676_v16 = vsel %vm1654_vm9, %v1643_v5, %v2905_v50  ;;  %v2900_v22 = vunpack.i.h.bf16 %v2898_v18  ;;  %v2899_v17 = vunpack.i.l.bf16 %v2898_v18  ;;  %v4695_v18 = vld [vmem:[#allocation13_spill] sm:$0xff]  ;;  %v4699_v50 = vld [vmem:[#allocation39_spill] sm:$0xff] }
 0x173   : > { %v2913_v7 = vpop.permute.xlu0 %2912  ;;  %v2475_v49 = vunpack.i.h.bf16 %v4695_v18  ;;  %v2474_v45 = vunpack.i.l.bf16 %v4695_v18  ;;  %v2560_v14 = vunpack.i.h.bf16 %v4699_v50  ;;  %v2559_v10 = vunpack.i.l.bf16 %v4699_v50 }
 0x174   : > { %v2915_v42 = vunpack.i.h.bf16 %v2913_v7  ;;  %v2914_v19 = vunpack.i.l.bf16 %v2913_v7  ;;  %v1644_v3 = vsel %vm1621_vm8, %v1611_v12, %v2899_v17  ;;  %v1645_v35 = vsel %vm1621_vm8, %v1612_v34, %v2900_v22 }
 0x175   : > { %v2908_v26 = vpop.permute.xlu1 %2907  ;;  %v1515_v1 = vsel %vm1489_vm4, %v4698_v6, %v2475_v49  ;;  %v1549_v17 = vsel %vm1522_vm5, %v1516_v23, %v2559_v10 }
 0x176   : > { %v1708_v61 = vsel %vm1687_vm10, %v1675_v62, %v2914_v19  ;;  %v1709_v36 = vsel %vm1687_vm10, %v1676_v16, %v2915_v42  ;;  %v2910_v59 = vunpack.i.h.bf16 %v2908_v26  ;;  %v2909_v52 = vunpack.i.l.bf16 %v2908_v26  ;;  %v4701_v42 = vld [vmem:[#allocation28_spill] sm:$0xff] }
 0x177   : > { %v2923_v41 = vpop.permute.xlu0 %2922  ;;  %v1514_v26 = vsel %vm1489_vm4, %v4700_v60, %v2474_v45  ;;  %v1517_v19 = vsel %vm1489_vm4, %v4701_v42, %v2480_v21  ;;  %v1548_v62 = vsel %vm1522_vm5, %v1515_v1, %v2555_v20 }
 0x178   : > { %v2925_v63 = vunpack.i.h.bf16 %v2923_v41  ;;  %v2924_v37 = vunpack.i.l.bf16 %v2923_v41  ;;  %v1677_v47 = vsel %vm1654_vm9, %v1644_v3, %v2909_v52  ;;  %v1678_v56 = vsel %vm1654_vm9, %v1645_v35, %v2910_v59 }
 0x179   : > { %v2918_v40 = vpop.permute.xlu1 %2917  ;;  %v1547_v41 = vsel %vm1522_vm5, %v1514_v26, %v2554_v9  ;;  %v1550_v22 = vsel %vm1522_vm5, %v1517_v19, %v2560_v14 }
 0x17a   : > { %v1741_v54 = vsel %vm1720_vm11, %v1708_v61, %v2924_v37  ;;  %v1742_v11 = vsel %vm1720_vm11, %v1709_v36, %v2925_v63  ;;  %v2920_v58 = vunpack.i.h.bf16 %v2918_v40  ;;  %v2919_v53 = vunpack.i.l.bf16 %v2918_v40 }
 0x17b   : > { %v1763_v4 = vpack.c.bf16 %v1742_v11, %v1741_v54  ;;  %v2933_v39 = vpop.permute.xlu0 %2932 }
 0x17c   : > { %v1710_v48 = vsel %vm1687_vm10, %v1677_v47, %v2919_v53  ;;  %v1711_v0 = vsel %vm1687_vm10, %v1678_v56, %v2920_v58  ;;  %v2935_v25 = vunpack.i.h.bf16 %v2933_v39  ;;  %v2934_v38 = vunpack.i.l.bf16 %v2933_v39 }
 0x17d   : > { %v2928_v32 = vpop.permute.xlu1 %2927  ;;  %2374 = vmatprep.mubr.msk.bf16.mxu1 %vm1789_vm12, %v1763_v4 }
 0x17e   : > { %v2930_v46 = vunpack.i.h.bf16 %v2928_v32  ;;  %v2929_v29 = vunpack.i.l.bf16 %v2928_v32  ;;  %v1580_v40 = vsel %vm1555_vm6, %v1547_v41, %v2934_v38  ;;  %v1581_v59 = vsel %vm1555_vm6, %v1548_v62, %v2935_v25 }
 0x17f   : > { %v2943_v24 = vpop.permute.xlu0 %2942 }
 0x180   : > { %v1743_v51 = vsel %vm1720_vm11, %v1710_v48, %v2929_v29  ;;  %v1744_v2 = vsel %vm1720_vm11, %v1711_v0, %v2930_v46  ;;  %v2945_v28 = vunpack.i.h.bf16 %v2943_v24  ;;  %v2944_v5 = vunpack.i.l.bf16 %v2943_v24 }
 0x181   : > { %v1764_v31 = vpack.c.bf16 %v1744_v2, %v1743_v51  ;;  %v2938_v33 = vpop.permute.xlu1 %2937 }
 0x182   : > { %v2940_v27 = vunpack.i.h.bf16 %v2938_v33  ;;  %v2939_v58 = vunpack.i.l.bf16 %v2938_v33  ;;  %v1613_v53 = vsel %vm1588_vm7, %v1580_v40, %v2944_v5  ;;  %v1614_v4 = vsel %vm1588_vm7, %v1581_v59, %v2945_v28  ;;  %v4704_v40 = vld [vmem:[#allocation41_spill] sm:$0xff] }
 0x183   : > { %2375 = vmatmul.mubr.msk.bf16.gmra.mrb[4].mxu1 %vm1789_vm12, %v1764_v31  ;;  %v2953_v57 = vpop.permute.xlu0 %2952 }
 0x184   : > { %v2955_v16 = vunpack.i.h.bf16 %v2953_v57  ;;  %v2954_v63 = vunpack.i.l.bf16 %v2953_v57  ;;  %v1583_v55 = vsel %vm1555_vm6, %v1550_v22, %v2940_v27  ;;  %v1582_v18 = vsel %vm1555_vm6, %v1549_v17, %v2939_v58 }
 0x185   : > { %v2948_v30 = vpop.permute.xlu1 %2947 }
 0x186   : > { %v2950_v39 = vunpack.i.h.bf16 %v2948_v30  ;;  %v2949_v12 = vunpack.i.l.bf16 %v2948_v30  ;;  %v1646_v34 = vsel %vm1621_vm8, %v1613_v53, %v2954_v63  ;;  %v1647_v3 = vsel %vm1621_vm8, %v1614_v4, %v2955_v16 }
 0x187   : > { %v2963_v7 = vpop.permute.xlu0 %2962 }
 0x188   : > { %v2965_v61 = vunpack.i.h.bf16 %v2963_v7  ;;  %v2964_v36 = vunpack.i.l.bf16 %v2963_v7  ;;  %v1615_v30 = vsel %vm1588_vm7, %v1582_v18, %v2949_v12  ;;  %v1616_v15 = vsel %vm1588_vm7, %v1583_v55, %v2950_v39  ;;  %v4705_v55 = vld [vmem:[#allocation25_spill] sm:$0xff] }
 0x189   : > { %v2958_v8 = vpop.permute.xlu1 %2957 }
 0x18a   : > { %v1679_v32 = vsel %vm1654_vm9, %v1646_v34, %v2964_v36  ;;  %v1680_v47 = vsel %vm1654_vm9, %v1647_v3, %v2965_v61  ;;  %v2960_v29 = vunpack.i.h.bf16 %v2958_v8  ;;  %v2959_v48 = vunpack.i.l.bf16 %v2958_v8  ;;  %v4703_v61 = vld [vmem:[#allocation40_spill] sm:$0xff] }
 0x18b   : > { %v2973_v37 = vpop.permute.xlu0 %2972 }
 0x18c   : > { %v2975_v54 = vunpack.i.h.bf16 %v2973_v37  ;;  %v2974_v11 = vunpack.i.l.bf16 %v2973_v37  ;;  %v1648_v44 = vsel %vm1621_vm8, %v1615_v30, %v2959_v48  ;;  %v1649_v20 = vsel %vm1621_vm8, %v1616_v15, %v2960_v29 }
 0x18d   : > { %v2968_v52 = vpop.permute.xlu1 %2967 }
 0x18e   : > { %v1712_v0 = vsel %vm1687_vm10, %v1679_v32, %v2974_v11  ;;  %v1713_v24 = vsel %vm1687_vm10, %v1680_v47, %v2975_v54  ;;  %v2970_v2 = vunpack.i.h.bf16 %v2968_v52  ;;  %v2969_v31 = vunpack.i.l.bf16 %v2968_v52 }
 0x18f   : > { %v2983_v35 = vpop.permute.xlu0 %2982 }
 0x190   : > { %v2985_v56 = vunpack.i.h.bf16 %v2983_v35  ;;  %v2984_v46 = vunpack.i.l.bf16 %v2983_v35  ;;  %v1681_v7 = vsel %vm1654_vm9, %v1648_v44, %v2969_v31  ;;  %v1682_v6 = vsel %vm1654_vm9, %v1649_v20, %v2970_v2 }
 0x191   : > { %v2978_v51 = vpop.permute.xlu1 %2977 }
 0x192   : > { %v1745_v33 = vsel %vm1720_vm11, %v1712_v0, %v2984_v46  ;;  %v1746_v57 = vsel %vm1720_vm11, %v1713_v24, %v2985_v56  ;;  %v2980_v49 = vunpack.i.h.bf16 %v2978_v51  ;;  %v2979_v45 = vunpack.i.l.bf16 %v2978_v51 }
 0x193   : > { %v1765_v13 = vpack.c.bf16 %v1746_v57, %v1745_v33  ;;  %v2993_v21 = vpop.permute.xlu0 %2992 }
 0x194   : > { %v1714_v14 = vsel %vm1687_vm10, %v1681_v7, %v2979_v45  ;;  %v1715_v10 = vsel %vm1687_vm10, %v1682_v6, %v2980_v49  ;;  %v2995_v23 = vunpack.i.h.bf16 %v2993_v21  ;;  %v2994_v27 = vunpack.i.l.bf16 %v2993_v21  ;;  %v4706_v49 = vld [vmem:[#allocation42_spill] sm:$0xff] }
 0x195   : > { %v2988_v9 = vpop.permute.xlu1 %2987  ;;  %2378 = vmatprep.mubr.msk.bf16.mxu1 %vm1789_vm12, %v1765_v13 }
 0x196   : > { %v2990_v1 = vunpack.i.h.bf16 %v2988_v9  ;;  %v2989_v50 = vunpack.i.l.bf16 %v2988_v9  ;;  %v1584_v36 = vsel %vm1555_vm6, %v4703_v61, %v2994_v27  ;;  %v1585_v59 = vsel %vm1555_vm6, %v4704_v40, %v2995_v23 }
 0x197   : > { %v3003_v60 = vpop.permute.xlu0 %3002 }
 0x198   : > { %v1747_v26 = vsel %vm1720_vm11, %v1714_v14, %v2989_v50  ;;  %v1748_v42 = vsel %vm1720_vm11, %v1715_v10, %v2990_v1  ;;  %v3005_v41 = vunpack.i.h.bf16 %v3003_v60  ;;  %v3004_v62 = vunpack.i.l.bf16 %v3003_v60 }
 0x199   : > { %v1766_v19 = vpack.c.bf16 %v1748_v42, %v1747_v26  ;;  %v2998_v25 = vpop.permute.xlu1 %2997 }
 0x19a   : > { %v3000_v5 = vunpack.i.h.bf16 %v2998_v25  ;;  %v2999_v53 = vunpack.i.l.bf16 %v2998_v25  ;;  %v1617_v4 = vsel %vm1588_vm7, %v1584_v36, %v3004_v62  ;;  %v1618_v39 = vsel %vm1588_vm7, %v1585_v59, %v3005_v41 }
 0x19b   : > { %2379 = vmatmul.mubr.msk.bf16.gmra.mrb[8].mxu1 %vm1789_vm12, %v1766_v19  ;;  %v3013_v38 = vpop.permute.xlu0 %3012 }
 0x19c   : > { %v3015_v16 = vunpack.i.h.bf16 %v3013_v38  ;;  %v3014_v63 = vunpack.i.l.bf16 %v3013_v38  ;;  %v1587_v58 = vsel %vm1555_vm6, %v4705_v55, %v3000_v5  ;;  %v1586_v45 = vsel %vm1555_vm6, %v4706_v49, %v2999_v53 }
 0x19d   : > { %v3008_v8 = vpop.permute.xlu1 %3007 }
 0x19e   : > { %v3010_v12 = vunpack.i.h.bf16 %v3008_v8  ;;  %v3009_v34 = vunpack.i.l.bf16 %v3008_v8  ;;  %v1650_v3 = vsel %vm1621_vm8, %v1617_v4, %v3014_v63  ;;  %v1651_v35 = vsel %vm1621_vm8, %v1618_v39, %v3015_v16 }
 0x19f   : > { %v3023_v43 = vpop.permute.xlu0 %3022 }
 0x1a0   : > { %v3025_v22 = vunpack.i.h.bf16 %v3023_v43  ;;  %v3024_v17 = vunpack.i.l.bf16 %v3023_v43  ;;  %v1619_v15 = vsel %vm1588_vm7, %v1586_v45, %v3009_v34  ;;  %v1620_v44 = vsel %vm1588_vm7, %v1587_v58, %v3010_v12 }
 0x1a1   : > { %v3018_v28 = vpop.permute.xlu1 %3017 }
 0x1a2   : > { %v1683_v47 = vsel %vm1654_vm9, %v1650_v3, %v3024_v17  ;;  %v1684_v56 = vsel %vm1654_vm9, %v1651_v35, %v3025_v22  ;;  %v3020_v48 = vunpack.i.h.bf16 %v3018_v28  ;;  %v3019_v0 = vunpack.i.l.bf16 %v3018_v28 }
 0x1a3   : > { %v3033_v37 = vpop.permute.xlu0 %3032 }
 0x1a4   : > { %v3035_v54 = vunpack.i.h.bf16 %v3033_v37  ;;  %v3034_v11 = vunpack.i.l.bf16 %v3033_v37  ;;  %v1652_v20 = vsel %vm1621_vm8, %v1619_v15, %v3019_v0  ;;  %v1653_v9 = vsel %vm1621_vm8, %v1620_v44, %v3020_v48 }
 0x1a5   : > { %v3028_v52 = vpop.permute.xlu1 %3027 }
 0x1a6   : > { %v1716_v24 = vsel %vm1687_vm10, %v1683_v47, %v3034_v11  ;;  %v1717_v51 = vsel %vm1687_vm10, %v1684_v56, %v3035_v54  ;;  %v3030_v31 = vunpack.i.h.bf16 %v3028_v52  ;;  %v3029_v33 = vunpack.i.l.bf16 %v3028_v52 }
 0x1a7   : > { %v3043_v32 = vpop.permute.xlu0 %3042 }
 0x1a8   : > { %v3045_v46 = vunpack.i.h.bf16 %v3043_v32  ;;  %v3044_v29 = vunpack.i.l.bf16 %v3043_v32  ;;  %v1685_v6 = vsel %vm1654_vm9, %v1652_v20, %v3029_v33  ;;  %v1686_v1 = vsel %vm1654_vm9, %v1653_v9, %v3030_v31 }
 0x1a9   : > { %v3038_v2 = vpop.permute.xlu1 %3037 }
 0x1aa   : > { %v1749_v57 = vsel %vm1720_vm11, %v1716_v24, %v3044_v29  ;;  %v1750_v18 = vsel %vm1720_vm11, %v1717_v51, %v3045_v46  ;;  %v3040_v13 = vunpack.i.h.bf16 %v3038_v2  ;;  %v3039_v21 = vunpack.i.l.bf16 %v3038_v2 }
 0x1ab   : > { %v1767_v30 = vpack.c.bf16 %v1750_v18, %v1749_v57 }
 0x1ac   : > { %v1718_v10 = vsel %vm1687_vm10, %v1685_v6, %v3039_v21  ;;  %v1719_v60 = vsel %vm1687_vm10, %v1686_v1, %v3040_v13 }
 0x1ad   : > { %v3048_v7 = vpop.permute.xlu1 %3047  ;;  %2382 = vmatprep.mubr.msk.bf16.mxu1 %vm1789_vm12, %v1767_v30 }
 0x1ae   : > { %v3050_v50 = vunpack.i.h.bf16 %v3048_v7  ;;  %v3049_v14 = vunpack.i.l.bf16 %v3048_v7 }
 0x1b0   : > { %v1751_v26 = vsel %vm1720_vm11, %v1718_v10, %v3049_v14  ;;  %v1752_v42 = vsel %vm1720_vm11, %v1719_v60, %v3050_v50 }
 0x1b1   : > { %v1768_v19 = vpack.c.bf16 %v1752_v42, %v1751_v26 }
 0x1b3   : > { %2383 = vmatmul.mubr.msk.bf16.gmra.mrb[12].mxu1 %vm1789_vm12, %v1768_v19 }
 0x1e7   : > { %v2356_v25 = vpop.f32.mrb[0].mxu0 }
 0x1e8   : > { %2005 = vst.msk [vmem:[%s4397_s22 + $0x10] sm:$0xff] %vm1489_vm4, %v2356_v25  ;;  %v1876_v38 = vpop.f32.mrb[1].mxu0  ;;  %v2106_v27 = vmul.f32 %v2356_v25, %v2356_v25  ;;  %v2038_v16 = vsel %vm1489_vm4, %v2356_v25, 0.0 }
 0x1e9   : > { %2003 = vst.msk [vmem:[%s4397_s22] sm:$0xff] %vm1489_vm4, %v1876_v38  ;;  %v2104_v8 = vmul.f32 %v1876_v38, %v1876_v38  ;;  %v2357_v43 = vpop.f32.mrb[2].mxu0  ;;  %v2035_v28 = vsel %vm1489_vm4, %v1876_v38, 0.0 }
 0x1ea   : > { %2006 = vst.msk [vmem:[%s4397_s22 + $0x18] sm:$0xff] %vm1489_vm4, %v2357_v43  ;;  %v1879_v23 = vpop.f32.mrb[3].mxu0  ;;  %v2107_v37 = vmul.f32 %v2357_v43, %v2357_v43  ;;  %v2139_v36 = vsel %vm1489_vm4, %v2106_v27, 0.0  ;;  %v2040_v40 = vsel %vm1489_vm4, %v2357_v43, 0.0 }
 0x1eb   : > { %2004 = vst.msk [vmem:[%s4397_s22 + $0x8] sm:$0xff] %vm1489_vm4, %v1879_v23  ;;  %v2036_v5 = vsel %vm1489_vm4, %v1879_v23, 0.0  ;;  %v2105_v41 = vmul.f32 %v1879_v23, %v1879_v23  ;;  %v2136_v63 = vsel %vm1489_vm4, %v2104_v8, 0.0 }
 0x1ec   : > { %v2037_v62 = vadd.f32 %v2036_v5, %v2035_v28  ;;  %v2141_v54 = vsel %vm1489_vm4, %v2107_v37, 0.0 }
 0x1ed   : > { %v2137_v22 = vsel %vm1489_vm4, %v2105_v41, 0.0 }
 0x1ee   : > { %v2039_v17 = vadd.f32 %v2038_v16, %v2037_v62  ;;  %v2138_v61 = vadd.f32 %v2137_v22, %v2136_v63 }
 0x1f0   : > { %v2140_v59 = vadd.f32 %v2139_v36, %v2138_v61  ;;  %v2041_v52 = vadd.f32 %v2040_v40, %v2039_v17 }
 0x1f2   : > { %v2142_v11 = vadd.f32 %v2141_v54, %v2140_v59 }
 0x1fb   : > { %v2360_v55 = vpop.f32.mrb[4].mxu0 }
 0x1fc   : > { %2009 = vst.msk [vmem:[%s4397_s22 + $0x30] sm:$0xff] %vm1489_vm4, %v2360_v55  ;;  %v1892_v58 = vpop.f32.mrb[5].mxu0  ;;  %v2110_v3 = vmul.f32 %v2360_v55, %v2360_v55  ;;  %v2046_v29 = vsel %vm1489_vm4, %v2360_v55, 0.0 }
 0x1fd   : > { %2007 = vst.msk [vmem:[%s4397_s22 + $0x20] sm:$0xff] %vm1489_vm4, %v1892_v58  ;;  %v2042_v53 = vsel %vm1489_vm4, %v1892_v58, 0.0  ;;  %v2108_v4 = vmul.f32 %v1892_v58, %v1892_v58  ;;  %v2361_v39 = vpop.f32.mrb[6].mxu0 }
 0x1fe   : > { %v2043_v12 = vadd.f32 %v2042_v53, %v2041_v52  ;;  %2010 = vst.msk [vmem:[%s4397_s22 + $0x38] sm:$0xff] %vm1489_vm4, %v2361_v39  ;;  %v1895_v34 = vpop.f32.mrb[7].mxu0  ;;  %v2111_v48 = vmul.f32 %v2361_v39, %v2361_v39  ;;  %v2147_v2 = vsel %vm1489_vm4, %v2110_v3, 0.0  ;;  %v2048_v31 = vsel %vm1489_vm4, %v2361_v39, 0.0 }
 0x1ff   : > { %v2143_v35 = vsel %vm1489_vm4, %v2108_v4, 0.0  ;;  %2008 = vst.msk [vmem:[%s4397_s22 + $0x28] sm:$0xff] %vm1489_vm4, %v1895_v34  ;;  %v2044_v32 = vsel %vm1489_vm4, %v1895_v34, 0.0  ;;  %v2109_v47 = vmul.f32 %v1895_v34, %v1895_v34 }
 0x200   : > { %v2144_v56 = vadd.f32 %v2143_v35, %v2142_v11  ;;  %v2045_v46 = vadd.f32 %v2044_v32, %v2043_v12  ;;  %v2149_v18 = vsel %vm1489_vm4, %v2111_v48, 0.0 }
 0x201   : > { %v2145_v0 = vsel %vm1489_vm4, %v2109_v47, 0.0 }
 0x202   : > { %v2047_v24 = vadd.f32 %v2046_v29, %v2045_v46  ;;  %v2146_v51 = vadd.f32 %v2145_v0, %v2144_v56 }
 0x204   : > { %v2148_v33 = vadd.f32 %v2147_v2, %v2146_v51  ;;  %v2049_v57 = vadd.f32 %v2048_v31, %v2047_v24 }
 0x206   : > { %v2150_v49 = vadd.f32 %v2149_v18, %v2148_v33 }
 0x20f   : > { %v2364_v45 = vpop.f32.mrb[8].mxu0 }
 0x210   : > { %2013 = vst.msk [vmem:[%s4397_s22 + $0x50] sm:$0xff] %vm1489_vm4, %v2364_v45  ;;  %v1908_v13 = vpop.f32.mrb[9].mxu0  ;;  %v2114_v9 = vmul.f32 %v2364_v45, %v2364_v45  ;;  %v2054_v10 = vsel %vm1489_vm4, %v2364_v45, 0.0 }
 0x211   : > { %2011 = vst.msk [vmem:[%s4397_s22 + $0x40] sm:$0xff] %vm1489_vm4, %v1908_v13  ;;  %v2050_v21 = vsel %vm1489_vm4, %v1908_v13, 0.0  ;;  %v2112_v30 = vmul.f32 %v1908_v13, %v1908_v13  ;;  %v2365_v15 = vpop.f32.mrb[10].mxu0 }
 0x212   : > { %v2051_v44 = vadd.f32 %v2050_v21, %v2049_v57  ;;  %2014 = vst.msk [vmem:[%s4397_s22 + $0x58] sm:$0xff] %vm1489_vm4, %v2365_v15  ;;  %v1911_v20 = vpop.f32.mrb[11].mxu0  ;;  %v2115_v60 = vmul.f32 %v2365_v15, %v2365_v15  ;;  %v2155_v25 = vsel %vm1489_vm4, %v2114_v9, 0.0  ;;  %v2056_v38 = vsel %vm1489_vm4, %v2365_v15, 0.0 }
 0x213   : > { %v2151_v7 = vsel %vm1489_vm4, %v2112_v30, 0.0  ;;  %2012 = vst.msk [vmem:[%s4397_s22 + $0x48] sm:$0xff] %vm1489_vm4, %v1911_v20  ;;  %v2052_v6 = vsel %vm1489_vm4, %v1911_v20, 0.0  ;;  %v2113_v1 = vmul.f32 %v1911_v20, %v1911_v20 }
 0x214   : > { %v2152_v50 = vadd.f32 %v2151_v7, %v2150_v49  ;;  %v2053_v14 = vadd.f32 %v2052_v6, %v2051_v44  ;;  %v2157_v23 = vsel %vm1489_vm4, %v2115_v60, 0.0 }
 0x215   : > { %v2153_v26 = vsel %vm1489_vm4, %v2113_v1, 0.0 }
 0x216   : > { %v2055_v42 = vadd.f32 %v2054_v10, %v2053_v14  ;;  %v2154_v19 = vadd.f32 %v2153_v26, %v2152_v50 }
 0x218   : > { %v2156_v8 = vadd.f32 %v2155_v25, %v2154_v19  ;;  %v2057_v43 = vadd.f32 %v2056_v38, %v2055_v42 }
 0x21a   : > { %v2158_v27 = vadd.f32 %v2157_v23, %v2156_v8 }
 0x226   : > { %v2368_v28 = vpop.f32.mrb[12].mxu0 }
 0x227   : > { %2017 = vst.msk [vmem:[%s4397_s22 + $0x70] sm:$0xff] %vm1489_vm4, %v2368_v28  ;;  %v1924_v5 = vpop.f32.mrb[13].mxu0  ;;  %v2118_v22 = vmul.f32 %v2368_v28, %v2368_v28  ;;  %v2062_v52 = vsel %vm1489_vm4, %v2368_v28, 0.0 }
 0x228   : > { %2015 = vst.msk [vmem:[%s4397_s22 + $0x60] sm:$0xff] %vm1489_vm4, %v1924_v5  ;;  %v2058_v41 = vsel %vm1489_vm4, %v1924_v5, 0.0  ;;  %v2116_v62 = vmul.f32 %v1924_v5, %v1924_v5  ;;  %v2369_v16 = vpop.f32.mrb[14].mxu0 }
 0x229   : > { %v2059_v63 = vadd.f32 %v2058_v41, %v2057_v43  ;;  %2018 = vst.msk [vmem:[%s4397_s22 + $0x78] sm:$0xff] %vm1489_vm4, %v2369_v16  ;;  %v1927_v37 = vpop.f32.mrb[15].mxu0  ;;  %v2119_v54 = vmul.f32 %v2369_v16, %v2369_v16  ;;  %v2163_v53 = vsel %vm1489_vm4, %v2118_v22, 0.0  ;;  %v2064_v4 = vsel %vm1489_vm4, %v2369_v16, 0.0 }
 0x22a   : > { %v2159_v17 = vsel %vm1489_vm4, %v2116_v62, 0.0  ;;  %2016 = vst.msk [vmem:[%s4397_s22 + $0x68] sm:$0xff] %vm1489_vm4, %v1927_v37  ;;  %v2060_v61 = vsel %vm1489_vm4, %v1927_v37, 0.0  ;;  %v2117_v36 = vmul.f32 %v1927_v37, %v1927_v37 }
 0x22b   : > { %v2160_v40 = vadd.f32 %v2159_v17, %v2158_v27  ;;  %v2061_v59 = vadd.f32 %v2060_v61, %v2059_v63  ;;  %v2165_v34 = vsel %vm1489_vm4, %v2119_v54, 0.0 }
 0x22c   : > { %v2161_v11 = vsel %vm1489_vm4, %v2117_v36, 0.0 }
 0x22d   : > { %v2063_v55 = vadd.f32 %v2062_v52, %v2061_v59  ;;  %v2162_v58 = vadd.f32 %v2161_v11, %v2160_v40 }
 0x22f   : > { %v2164_v39 = vadd.f32 %v2163_v53, %v2162_v58  ;;  %v2065_v12 = vadd.f32 %v2064_v4, %v2063_v55 }
 0x231   : > { %v2166_v3 = vadd.f32 %v2165_v34, %v2164_v39 }
 0x23e   : > { %v2372_v35 = vpop.f32.mrb[0].mxu1 }
 0x23f   : > { %2021 = vst.msk [vmem:[%s4397_s22 + $0x90] sm:$0xff] %vm1489_vm4, %v2372_v35  ;;  %v1940_v32 = vpop.f32.mrb[1].mxu1  ;;  %v2122_v0 = vmul.f32 %v2372_v35, %v2372_v35  ;;  %v2070_v57 = vsel %vm1489_vm4, %v2372_v35, 0.0 }
 0x240   : > { %2019 = vst.msk [vmem:[%s4397_s22 + $0x80] sm:$0xff] %vm1489_vm4, %v1940_v32  ;;  %v2066_v47 = vsel %vm1489_vm4, %v1940_v32, 0.0  ;;  %v2120_v56 = vmul.f32 %v1940_v32, %v1940_v32  ;;  %v2373_v46 = vpop.f32.mrb[2].mxu1 }
 0x241   : > { %v2067_v29 = vadd.f32 %v2066_v47, %v2065_v12  ;;  %2022 = vst.msk [vmem:[%s4397_s22 + $0x98] sm:$0xff] %vm1489_vm4, %v2373_v46  ;;  %v1943_v48 = vpop.f32.mrb[3].mxu1  ;;  %v2123_v18 = vmul.f32 %v2373_v46, %v2373_v46  ;;  %v2171_v21 = vsel %vm1489_vm4, %v2122_v0, 0.0  ;;  %v2072_v30 = vsel %vm1489_vm4, %v2373_v46, 0.0 }
 0x242   : > { %v2167_v24 = vsel %vm1489_vm4, %v2120_v56, 0.0  ;;  %2020 = vst.msk [vmem:[%s4397_s22 + $0x88] sm:$0xff] %vm1489_vm4, %v1943_v48  ;;  %v2068_v51 = vsel %vm1489_vm4, %v1943_v48, 0.0  ;;  %v2121_v2 = vmul.f32 %v1943_v48, %v1943_v48 }
 0x243   : > { %v2168_v31 = vadd.f32 %v2167_v24, %v2166_v3  ;;  %v2069_v33 = vadd.f32 %v2068_v51, %v2067_v29  ;;  %v2173_v20 = vsel %vm1489_vm4, %v2123_v18, 0.0 }
 0x244   : > { %v2169_v49 = vsel %vm1489_vm4, %v2121_v2, 0.0 }
 0x245   : > { %v2071_v45 = vadd.f32 %v2070_v57, %v2069_v33  ;;  %v2170_v13 = vadd.f32 %v2169_v49, %v2168_v31 }
 0x247   : > { %v2172_v15 = vadd.f32 %v2171_v21, %v2170_v13  ;;  %v2073_v44 = vadd.f32 %v2072_v30, %v2071_v45 }
 0x249   : > { %v2174_v9 = vadd.f32 %v2173_v20, %v2172_v15 }
 0x256   : > { %v2376_v7 = vpop.f32.mrb[4].mxu1 }
 0x257   : > { %2025 = vst.msk [vmem:[%s4397_s22 + $0xb0] sm:$0xff] %vm1489_vm4, %v2376_v7  ;;  %v1956_v6 = vpop.f32.mrb[5].mxu1  ;;  %v2126_v26 = vmul.f32 %v2376_v7, %v2376_v7  ;;  %v2078_v43 = vsel %vm1489_vm4, %v2376_v7, 0.0 }
 0x258   : > { %2023 = vst.msk [vmem:[%s4397_s22 + $0xa0] sm:$0xff] %vm1489_vm4, %v1956_v6  ;;  %v2074_v1 = vsel %vm1489_vm4, %v1956_v6, 0.0  ;;  %v2124_v50 = vmul.f32 %v1956_v6, %v1956_v6  ;;  %v2377_v14 = vpop.f32.mrb[6].mxu1 }
 0x259   : > { %v2075_v10 = vadd.f32 %v2074_v1, %v2073_v44  ;;  %2026 = vst.msk [vmem:[%s4397_s22 + $0xb8] sm:$0xff] %vm1489_vm4, %v2377_v14  ;;  %v1959_v60 = vpop.f32.mrb[7].mxu1  ;;  %v2127_v23 = vmul.f32 %v2377_v14, %v2377_v14  ;;  %v2179_v41 = vsel %vm1489_vm4, %v2126_v26, 0.0  ;;  %v2080_v62 = vsel %vm1489_vm4, %v2377_v14, 0.0 }
 0x25a   : > { %v2175_v42 = vsel %vm1489_vm4, %v2124_v50, 0.0  ;;  %2024 = vst.msk [vmem:[%s4397_s22 + $0xa8] sm:$0xff] %vm1489_vm4, %v1959_v60  ;;  %v2076_v19 = vsel %vm1489_vm4, %v1959_v60, 0.0  ;;  %v2125_v25 = vmul.f32 %v1959_v60, %v1959_v60 }
 0x25b   : > { %v2176_v38 = vadd.f32 %v2175_v42, %v2174_v9  ;;  %v2077_v8 = vadd.f32 %v2076_v19, %v2075_v10  ;;  %v2181_v37 = vsel %vm1489_vm4, %v2127_v23, 0.0 }
 0x25c   : > { %v2177_v27 = vsel %vm1489_vm4, %v2125_v25, 0.0 }
 0x25d   : > { %v2079_v28 = vadd.f32 %v2078_v43, %v2077_v8  ;;  %v2178_v5 = vadd.f32 %v2177_v27, %v2176_v38 }
 0x25f   : > { %v2180_v16 = vadd.f32 %v2179_v41, %v2178_v5  ;;  %v2081_v63 = vadd.f32 %v2080_v62, %v2079_v28 }
 0x261   : > { %v2182_v22 = vadd.f32 %v2181_v37, %v2180_v16 }
 0x26e   : > { %v2380_v17 = vpop.f32.mrb[8].mxu1 }
 0x26f   : > { %2029 = vst.msk [vmem:[%s4397_s22 + $0xd0] sm:$0xff] %vm1489_vm4, %v2380_v17  ;;  %v1972_v61 = vpop.f32.mrb[9].mxu1  ;;  %v2130_v11 = vmul.f32 %v2380_v17, %v2380_v17  ;;  %v2086_v12 = vsel %vm1489_vm4, %v2380_v17, 0.0 }
 0x270   : > { %2027 = vst.msk [vmem:[%s4397_s22 + $0xc0] sm:$0xff] %vm1489_vm4, %v1972_v61  ;;  %v2082_v36 = vsel %vm1489_vm4, %v1972_v61, 0.0  ;;  %v2128_v40 = vmul.f32 %v1972_v61, %v1972_v61  ;;  %v2381_v59 = vpop.f32.mrb[10].mxu1 }
 0x271   : > { %v2083_v52 = vadd.f32 %v2082_v36, %v2081_v63  ;;  %2030 = vst.msk [vmem:[%s4397_s22 + $0xd8] sm:$0xff] %vm1489_vm4, %v2381_v59  ;;  %v1975_v54 = vpop.f32.mrb[11].mxu1  ;;  %v2131_v34 = vmul.f32 %v2381_v59, %v2381_v59  ;;  %v2187_v47 = vsel %vm1489_vm4, %v2130_v11, 0.0  ;;  %v2088_v56 = vsel %vm1489_vm4, %v2381_v59, 0.0 }
 0x272   : > { %v2183_v55 = vsel %vm1489_vm4, %v2128_v40, 0.0  ;;  %2028 = vst.msk [vmem:[%s4397_s22 + $0xc8] sm:$0xff] %vm1489_vm4, %v1975_v54  ;;  %v2084_v58 = vsel %vm1489_vm4, %v1975_v54, 0.0  ;;  %v2129_v53 = vmul.f32 %v1975_v54, %v1975_v54 }
 0x273   : > { %v2184_v4 = vadd.f32 %v2183_v55, %v2182_v22  ;;  %v2085_v39 = vadd.f32 %v2084_v58, %v2083_v52  ;;  %v2189_v48 = vsel %vm1489_vm4, %v2131_v34, 0.0 }
 0x274   : > { %v2185_v3 = vsel %vm1489_vm4, %v2129_v53, 0.0 }
 0x275   : > { %v2087_v35 = vadd.f32 %v2086_v12, %v2085_v39  ;;  %v2186_v32 = vadd.f32 %v2185_v3, %v2184_v4 }
 0x277   : > { %v2188_v46 = vadd.f32 %v2187_v47, %v2186_v32  ;;  %v2089_v29 = vadd.f32 %v2088_v56, %v2087_v35 }
 0x279   : > { %v2190_v0 = vadd.f32 %v2189_v48, %v2188_v46 }
 0x286   : > { %v2384_v24 = vpop.f32.mrb[12].mxu1 }
 0x287   : > { %2033 = vst.msk [vmem:[%s4397_s22 + $0xf0] sm:$0xff] %vm1489_vm4, %v2384_v24  ;;  %v1988_v51 = vpop.f32.mrb[13].mxu1  ;;  %v2134_v49 = vmul.f32 %v2384_v24, %v2384_v24  ;;  %v2094_v44 = vsel %vm1489_vm4, %v2384_v24, 0.0 }
 0x288   : > { %2031 = vst.msk [vmem:[%s4397_s22 + $0xe0] sm:$0xff] %vm1489_vm4, %v1988_v51  ;;  %v2090_v2 = vsel %vm1489_vm4, %v1988_v51, 0.0  ;;  %v2132_v31 = vmul.f32 %v1988_v51, %v1988_v51  ;;  %v2385_v33 = vpop.f32.mrb[14].mxu1 }
 0x289   : > { %v2091_v57 = vadd.f32 %v2090_v2, %v2089_v29  ;;  %2034 = vst.msk [vmem:[%s4397_s22 + $0xf8] sm:$0xff] %vm1489_vm4, %v2385_v33  ;;  %v1991_v18 = vpop.f32.mrb[15].mxu1  ;;  %v2135_v20 = vmul.f32 %v2385_v33, %v2385_v33  ;;  %v2195_v1 = vsel %vm1489_vm4, %v2134_v49, 0.0  ;;  %v2096_v50 = vsel %vm1489_vm4, %v2385_v33, 0.0 }
 0x28a   : > { %v2191_v45 = vsel %vm1489_vm4, %v2132_v31, 0.0  ;;  %2032 = vst.msk [vmem:[%s4397_s22 + $0xe8] sm:$0xff] %vm1489_vm4, %v1991_v18  ;;  %v2092_v13 = vsel %vm1489_vm4, %v1991_v18, 0.0  ;;  %v2133_v21 = vmul.f32 %v1991_v18, %v1991_v18 }
 0x28b   : > { %v2192_v30 = vadd.f32 %v2191_v45, %v2190_v0  ;;  %v2093_v15 = vadd.f32 %v2092_v13, %v2091_v57  ;;  %v2197_v60 = vsel %vm1489_vm4, %v2135_v20, 0.0 }
 0x28c   : > { %v2193_v9 = vsel %vm1489_vm4, %v2133_v21, 0.0 }
 0x28d   : > { %v2095_v7 = vadd.f32 %v2094_v44, %v2093_v15  ;;  %v2194_v6 = vadd.f32 %v2193_v9, %v2192_v30 }
 0x28f   : > { %v2097_v14 = vadd.f32 %v2096_v50, %v2095_v7  ;;  %v2196_v10 = vadd.f32 %v2195_v1, %v2194_v6 }
 0x291   : > { %v2098_v26 = vrot.slane %v2097_v14, 4  ;;  %v2198_v42 = vadd.f32 %v2197_v60, %v2196_v10 }
 0x293   : > { %v2099_v19 = vadd.f32 %v2098_v26, %v2097_v14  ;;  %v2199_v25 = vrot.slane %v2198_v42, 4 }
 0x295   : > { %v2100_v38 = vrot.slane %v2099_v19, 2  ;;  %v2200_v8 = vadd.f32 %v2199_v25, %v2198_v42 }
 0x297   : > { %v2101_v43 = vadd.f32 %v2100_v38, %v2099_v19  ;;  %v2201_v23 = vrot.slane %v2200_v8, 2 }
 0x299   : > { %v2102_v27 = vrot.slane %v2101_v43, 1  ;;  %v2202_v28 = vadd.f32 %v2201_v23, %v2200_v8 }
 0x29b   : > { %v2203_v5 = vrot.slane %v2202_v28, 1  ;;  %v2103_v41 = vadd.f32 %v2102_v27, %v2101_v43 }
 0x29d   : > { %v2204_v62 = vadd.f32 %v2203_v5, %v2202_v28 }
 0x29f   : > { %v2205_v16 = vsel %vm381_vm0, %v2103_v41, %v2204_v62 }
 0x2a0   : > { %2207 = vst.msk [vmem:[%s208_s25] sm:$0x3] %vm2206_vm13, %v2205_v16 }
 0x2a1 PF: > { %s15_s15 = sadd.s32 1, %s3062_s15  }
 0x2a2   : > { %p12_p4 = scmp.ge.s32.totalorder %s15_s15, 4  }
 0x2a4   :  { %14 = sbr.rel (!%p12_p4) target bundleno = 1 (0x1), region = 74 }

</bundles_post_ra>
